<compile_context>
chip_gen: v7x
topology: tpu7x:2x2x1
jax: 0.10.0
libtpu: 0.0.40
codegen_flags: <defaults>
</compile_context>

<pallas_src>
import functools

import jax
import jax.numpy as jnp
from jax.experimental import pallas as pl
from jax.experimental.pallas import tpu as pltpu


def _round_up(x, m):
    return (x + m - 1) // m * m


# ------------------------ conv layer: im2col + Pallas matmul ------------------------
def matmul_bias_relu_kernel(x_ref, w_ref, b_ref, o_ref):
    acc = jnp.dot(x_ref[...], w_ref[...], preferred_element_type=jnp.float32)
    acc = jnp.maximum(acc + b_ref[...], 0.0)
    o_ref[...] = acc.astype(o_ref.dtype)


def _matmul_bias_relu(patches, w_flat, b_row, *, block_m=128):
    m, k = patches.shape
    n = w_flat.shape[1]
    mp = _round_up(m, block_m)
    if mp != m:
        patches = jnp.pad(patches, ((0, mp - m), (0, 0)))
    out = pl.pallas_call(
        matmul_bias_relu_kernel,
        out_shape=jax.ShapeDtypeStruct((mp, n), jnp.bfloat16),
        grid=(mp // block_m,),
        in_specs=[
            pl.BlockSpec((block_m, k), lambda i: (i, 0)),
            pl.BlockSpec((k, n), lambda i: (0, 0)),
            pl.BlockSpec((1, n), lambda i: (0, 0)),
        ],
        out_specs=pl.BlockSpec((block_m, n), lambda i: (i, 0)),
        compiler_params=pltpu.CompilerParams(dimension_semantics=("parallel",)),
    )(patches, w_flat, b_row)
    return out[:m]


def conv2d_relu(x_nhwc, w_hwio, b, *, stride, block_m=128):
    """VALID conv + bias + ReLU as im2col (wrapper plumbing) + Pallas MXU matmul."""
    bsz, h, w, c = x_nhwc.shape
    kh, kw, _, oc = w_hwio.shape
    oh = (h - kh) // stride + 1
    ow = (w - kw) // stride + 1
    cols = []
    for i in range(kh):
        for j in range(kw):
            cols.append(x_nhwc[:, i:i + stride * (oh - 1) + 1:stride,
                                  j:j + stride * (ow - 1) + 1:stride, :])
    patches = jnp.stack(cols, axis=3).reshape(bsz * oh * ow, kh * kw * c)
    w_flat = w_hwio.reshape(kh * kw * c, oc).astype(jnp.bfloat16)
    out = _matmul_bias_relu(patches, w_flat, b.reshape(1, oc), block_m=block_m)
    return out.reshape(bsz, oh, ow, oc)


# ------------------------------ fused IAM head kernel --------------------------------
def iam_head_kernel(x_ref, hxs_ref, masks_ref, w1_ref, b1_ref, w2_ref, b2_ref,
                    clw_ref, clb_ref, out_ref, *, fh, rh, out_width):
    sig = lambda t: 1.0 / (1.0 + jnp.exp(-t))

    x = x_ref[...]                                   # bf16 [tb, F]
    h0 = hxs_ref[...] * masks_ref[...]               # f32  [tb, 2*rh]  (hxs * masks)
    tb = x.shape[0]

    # ---- stage 1: ONE fused MXU matmul for all x-projections -------------------
    s1 = jnp.dot(x, w1_ref[...], preferred_element_type=jnp.float32) + b1_ref[...]
    ha1 = jnp.tanh(s1[:, 0:fh])                      # actor_fnn layer 1
    hc1 = jnp.tanh(s1[:, fh:2 * fh])                 # critic_fnn layer 1
    gxa = s1[:, 2 * fh:2 * fh + 3 * rh]              # gru_A input gates (+ b_ih)
    gxb = s1[:, 2 * fh + 3 * rh:2 * fh + 6 * rh]     # gru_B input gates (+ b_ih)

    # ---- stage 2: ONE block-diagonal matmul (MLP layer 2 + GRU hidden proj) ----
    left = jnp.concatenate([ha1, hc1, h0], axis=-1).astype(jnp.bfloat16)   # [tb, 192]
    s2 = jnp.dot(left, w2_ref[...], preferred_element_type=jnp.float32) + b2_ref[...]
    ha2 = jnp.tanh(s2[:, 0:fh])                      # hidden_actor (fnn part)
    hc2 = jnp.tanh(s2[:, fh:2 * fh])                 # hidden_critic (fnn part)
    gha = s2[:, 2 * fh:2 * fh + 3 * rh]              # gru_A hidden gates (+ b_hh)
    ghb = s2[:, 2 * fh + 3 * rh:2 * fh + 6 * rh]     # gru_B hidden gates (+ b_hh)

    def gru_update(gx, gh, h_prev):
        r = sig(gx[:, 0:rh] + gh[:, 0:rh])
        z = sig(gx[:, rh:2 * rh] + gh[:, rh:2 * rh])
        n = jnp.tanh(gx[:, 2 * rh:3 * rh] + r * gh[:, 2 * rh:3 * rh])
        return (1.0 - z) * n + z * h_prev

    # torch naming quirk preserved: actor_rnn consumes LEFT hxs -> hidden_critic_rnn,
    # critic_rnn consumes RIGHT hxs -> hidden_actor_rnn.
    h_left = gru_update(gxa, gha, h0[:, 0:rh])
    h_right = gru_update(gxb, ghb, h0[:, rh:2 * rh])

    hidden_critic = jnp.concatenate([hc2, h_left], axis=-1)   # [tb, fh+rh]
    hidden_actor = jnp.concatenate([ha2, h_right], axis=-1)   # [tb, fh+rh]
    hxs_new = jnp.concatenate([h_left, h_right], axis=-1)     # [tb, 2*rh]

    # critic_linear (N=1) as VPU multiply + lane reduction instead of an MXU pass.
    value = jnp.sum(hidden_critic * clw_ref[...], axis=-1, keepdims=True) + clb_ref[0, 0]

    used = (fh + rh) + 2 * rh + 1
    pieces = [hidden_actor, hxs_new, value]
    if out_width > used:
        pieces.append(jnp.zeros((tb, out_width - used), jnp.float32))
    out_ref[...] = jnp.concatenate(pieces, axis=-1)            # lane-dense [tb, 256]


def iam_head(feat, rnn_hxs, masks, fused, *, fh, rh, block_b=128):
    bsz, f = feat.shape
    out_width = _round_up(fh + 3 * rh + 1, 128)
    bp = _round_up(max(bsz, 8), 8)
    tb = min(block_b, bp)
    bp = _round_up(bp, tb)
    if bp != bsz:
        pad = bp - bsz
        feat = jnp.pad(feat, ((0, pad), (0, 0)))
        rnn_hxs = jnp.pad(rnn_hxs, ((0, pad), (0, 0)))
        masks = jnp.pad(masks, ((0, pad), (0, 0)))

    kernel = functools.partial(iam_head_kernel, fh=fh, rh=rh, out_width=out_width)
    slab = pl.pallas_call(
        kernel,
        out_shape=jax.ShapeDtypeStruct((bp, out_width), jnp.float32),
        grid=(bp // tb,),
        in_specs=[
            pl.BlockSpec((tb, f), lambda i: (i, 0)),
            pl.BlockSpec((tb, 2 * rh), lambda i: (i, 0)),
            pl.BlockSpec((tb, 1), lambda i: (i, 0)),
            pl.BlockSpec(fused["w1"].shape, lambda i: (0, 0)),
            pl.BlockSpec(fused["b1"].shape, lambda i: (0, 0)),
            pl.BlockSpec(fused["w2"].shape, lambda i: (0, 0)),
            pl.BlockSpec(fused["b2"].shape, lambda i: (0, 0)),
            pl.BlockSpec(fused["clw"].shape, lambda i: (0, 0)),
            pl.BlockSpec(memory_space=pltpu.MemorySpace.SMEM),      # clb scalar
        ],
        out_specs=pl.BlockSpec((tb, out_width), lambda i: (i, 0)),
        compiler_params=pltpu.CompilerParams(dimension_semantics=("parallel",)),
    )(feat, rnn_hxs, masks, fused["w1"], fused["b1"], fused["w2"], fused["b2"],
      fused["clw"], fused["clb"])

    hidden_actor = slab[:bsz, 0:fh + rh]
    hxs_out = slab[:bsz, fh + rh:fh + 3 * rh]
    value = slab[:bsz, fh + 3 * rh:fh + 3 * rh + 1]
    return value, hidden_actor, hxs_out


# ------------------------------------ forward ----------------------------------------
def iam_base_cnn_forward(inputs, rnn_hxs, masks, params, *, fh=64, rh=32):
    """Pallas forward of IAMBaseCNN. inputs: [B, C, 84, 84] NCHW."""
    x = inputs.transpose(0, 2, 3, 1).astype(jnp.bfloat16)          # NCHW -> NHWC
    h = conv2d_relu(x, params["conv1_w"], params["conv1_b"], stride=4)
    h = conv2d_relu(h, params["conv2_w"], params["conv2_b"], stride=2)
    h = conv2d_relu(h, params["conv3_w"], params["conv3_b"], stride=1)
    bsz = inputs.shape[0]
    feat = h.transpose(0, 3, 1, 2).reshape(bsz, -1)                 # torch Flatten order (C,H,W)
    return iam_head(feat, rnn_hxs, masks, params["fused"], fh=fh, rh=rh)


# --------------------------------- parameters ----------------------------------------
def _build_fused(p, fh, rh):
    w1 = jnp.concatenate([p["a_w1"], p["c_w1"], p["gA_wih"], p["gB_wih"]], axis=1)
    b1 = jnp.concatenate([p["a_b1"], p["c_b1"], p["gA_bih"], p["gB_bih"]])[None, :]
    w2 = jnp.zeros((2 * fh + 2 * rh, 2 * fh + 6 * rh), jnp.float32)
    w2 = w2.at[0:fh, 0:fh].set(p["a_w2"])
    w2 = w2.at[fh:2 * fh, fh:2 * fh].set(p["c_w2"])
    w2 = w2.at[2 * fh:2 * fh + rh, 2 * fh:2 * fh + 3 * rh].set(p["gA_whh"])
    w2 = w2.at[2 * fh + rh:2 * fh + 2 * rh,
               2 * fh + 3 * rh:2 * fh + 6 * rh].set(p["gB_whh"])
    b2 = jnp.concatenate([p["a_b2"], p["c_b2"], p["gA_bhh"], p["gB_bhh"]])[None, :]
    return {
        "w1": w1.astype(jnp.bfloat16), "b1": b1,
        "w2": w2.astype(jnp.bfloat16), "b2": b2,
        "clw": p["cl_w"][None, :],                # (1, fh+rh) f32
        "clb": p["cl_b"].reshape(1, 1),           # (1, 1) f32 -> SMEM
    }


def make_params(num_channels, fh=64, rh=32, seed=0):
    keys = iter(jax.random.split(jax.random.PRNGKey(seed), 24))

    def w(k, fan_in, shape, gain=1.0):
        return gain * jax.random.normal(k, shape, jnp.float32) / jnp.sqrt(float(fan_in))

    def b(k, shape):
        # torch inits biases to 0; small random values here so the test exercises
        # the bias paths.
        return 0.1 * jax.random.normal(k, shape, jnp.float32)

    f = 64 * 7 * 7                                # final_hidden_size_flattened
    g = float(jnp.sqrt(2.0))
    p = {
        "conv1_w": w(next(keys), 8 * 8 * num_channels, (8, 8, num_channels, 32), g),
        "conv1_b": b(next(keys), (32,)),
        "conv2_w": w(next(keys), 4 * 4 * 32, (4, 4, 32, 64), g),
        "conv2_b": b(next(keys), (64,)),
        "conv3_w": w(next(keys), 3 * 3 * 64, (3, 3, 64, 64), g),
        "conv3_b": b(next(keys), (64,)),
        # actor_fnn / critic_fnn, weights stored [in, out] for x @ W
        "a_w1": w(next(keys), f, (f, fh), g), "a_b1": b(next(keys), (fh,)),
        "a_w2": w(next(keys), fh, (fh, fh), g), "a_b2": b(next(keys), (fh,)),
        "c_w1": w(next(keys), f, (f, fh), g), "c_b1": b(next(keys), (fh,)),
        "c_w2": w(next(keys), fh, (fh, fh), g), "c_b2": b(next(keys), (fh,)),
        # gru_A == torch self.actor_rnn, gru_B == torch self.critic_rnn
        # (gate column order r, z, n; weights stored [in, 3*rh])
        "gA_wih": w(next(keys), f, (f, 3 * rh)), "gA_bih": b(next(keys), (3 * rh,)),
        "gA_whh": w(next(keys), rh, (rh, 3 * rh)), "gA_bhh": b(next(keys), (3 * rh,)),
        "gB_wih": w(next(keys), f, (f, 3 * rh)), "gB_bih": b(next(keys), (3 * rh,)),
        "gB_whh": w(next(keys), rh, (rh, 3 * rh)), "gB_bhh": b(next(keys), (3 * rh,)),
        # critic_linear over concat([hidden_critic, hidden_critic_rnn])
        "cl_w": w(next(keys), fh + rh, (fh + rh,)), "cl_b": b(next(keys), (1,)),
    }
    p["fused"] = _build_fused(p, fh, rh)
    return p


# --------------------------------- pure-JAX reference --------------------------------
def reference_forward(inputs, rnn_hxs, masks, p, *, fh=64, rh=32):
    bf16 = jnp.bfloat16
    dot = lambda a, wt: jnp.dot(a.astype(bf16), wt.astype(bf16),
                                preferred_element_type=jnp.float32)
    sig = lambda t: 1.0 / (1.0 + jnp.exp(-t))

    x = inputs.transpose(0, 2, 3, 1)

    def conv(xx, wt, bb, s):
        y = jax.lax.conv_general_dilated(
            xx.astype(bf16), wt.astype(bf16), (s, s), "VALID",
            dimension_numbers=("NHWC", "HWIO", "NHWC"),
            preferred_element_type=jnp.float32)
        return jnp.maximum(y + bb, 0.0).astype(bf16)

    h = conv(x, p["conv1_w"], p["conv1_b"], 4)
    h = conv(h, p["conv2_w"], p["conv2_b"], 2)
    h = conv(h, p["conv3_w"], p["conv3_b"], 1)
    bsz = inputs.shape[0]
    feat = h.transpose(0, 3, 1, 2).reshape(bsz, -1)

    ha = jnp.tanh(dot(feat, p["a_w1"]) + p["a_b1"])
    ha = jnp.tanh(dot(ha, p["a_w2"]) + p["a_b2"])
    hc = jnp.tanh(dot(feat, p["c_w1"]) + p["c_b1"])
    hc = jnp.tanh(dot(hc, p["c_w2"]) + p["c_b2"])

    h0 = rnn_hxs * masks

    def gru(xx, hprev, wih, bih, whh, bhh):
        gx = dot(xx, wih) + bih
        gh = dot(hprev, whh) + bhh
        r = sig(gx[:, :rh] + gh[:, :rh])
        z = sig(gx[:, rh:2 * rh] + gh[:, rh:2 * rh])
        n = jnp.tanh(gx[:, 2 * rh:] + r * gh[:, 2 * rh:])
        return (1.0 - z) * n + z * hprev

    h_left = gru(feat, h0[:, :rh], p["gA_wih"], p["gA_bih"], p["gA_whh"], p["gA_bhh"])
    h_right = gru(feat, h0[:, rh:], p["gB_wih"], p["gB_bih"], p["gB_whh"], p["gB_bhh"])

    hidden_critic = jnp.concatenate([hc, h_left], axis=1)
    hidden_actor = jnp.concatenate([ha, h_right], axis=1)
    value = hidden_critic @ p["cl_w"][:, None] + p["cl_b"]
    hxs_out = jnp.concatenate([h_left, h_right], axis=1)
    return value, hidden_actor, hxs_out


# -------------------------------------- main -----------------------------------------
if __name__ == "__main__":
    # 84x84 inputs are required by the module: IAMBaseCNN hard-codes 64*7*7 flatten.
    B, C, H, W = 2, 4, 84, 84
    FH, RH = 64, 32                       # hidden_sizes=(64, 64), rnn_hidden_size=32

    kx, kh = jax.random.split(jax.random.PRNGKey(0))
    x = jax.random.normal(kx, (B, C, H, W), jnp.float32)
    rnn_hxs = 0.5 * jax.random.normal(kh, (B, 2 * RH), jnp.float32)
    masks = jnp.array([[1.0], [0.0]], jnp.float32)   # second env is resetting (mask=0)

    params = make_params(C, FH, RH, seed=0)

    fwd = jax.jit(functools.partial(iam_base_cnn_forward, fh=FH, rh=RH))
    value, hidden_actor, hxs_out = fwd(x, rnn_hxs, masks, params)
    jax.block_until_ready((value, hidden_actor, hxs_out))

    v_ref, ha_ref, hxs_ref = jax.jit(functools.partial(reference_forward, fh=FH, rh=RH))(
        x, rnn_hxs, masks, params)

    assert value.shape == (B, 1)
    assert hidden_actor.shape == (B, FH + RH)
    assert hxs_out.shape == (B, 2 * RH)
    assert jnp.allclose(value, v_ref, atol=5e-3, rtol=5e-3)
    assert jnp.allclose(hidden_actor, ha_ref, atol=5e-3, rtol=5e-3)
    assert jnp.allclose(hxs_out, hxs_ref, atol=5e-3, rtol=5e-3)

    print("KERNEL_OK")
</pallas_src>

<mosaic_0001>
module attributes {stable_mosaic.version = 11 : i64} {
  func.func @matmul_bias_relu_kernel(%arg0: i32, %arg1: memref<128x256xbf16, #tpu.memory_space<vmem>>, %arg2: memref<256x32xbf16, #tpu.memory_space<vmem>>, %arg3: memref<1x32xf32, #tpu.memory_space<vmem>>, %arg4: memref<128x32xbf16, #tpu.memory_space<vmem>>) attributes {dimension_semantics = [#tpu.dimension_semantics<parallel>], iteration_bounds = array<i64: 7>, scalar_prefetch = 0 : i64, scratch_operands = 0 : i64, tpu.core_type = #tpu.core_type<tc>, window_params = [{transform_indices = @transform_0, window_bounds = array<i64: 128, 256>}, {pipeline_mode = #tpu.pipeline_mode<synchronous>, transform_indices = @transform_1, window_bounds = array<i64: 256, 32>}, {pipeline_mode = #tpu.pipeline_mode<synchronous>, transform_indices = @transform_2, window_bounds = array<i64: 1, 32>}, {transform_indices = @transform_3, window_bounds = array<i64: 128, 32>}]} {
    %c0 = arith.constant 0 : index
    %c0_0 = arith.constant 0 : index
    %0 = vector.load %arg1[%c0, %c0_0] : memref<128x256xbf16, #tpu.memory_space<vmem>>, vector<128x256xbf16>
    %c0_1 = arith.constant 0 : index
    %c0_2 = arith.constant 0 : index
    %1 = vector.load %arg2[%c0_1, %c0_2] : memref<256x32xbf16, #tpu.memory_space<vmem>>, vector<256x32xbf16>
    %cst = arith.constant dense<0.000000e+00> : vector<128x32xf32>
    %2 = tpu.matmul %0, %1, %cst {dimension_numbers = #tpu.dot_dimension_numbers<[1], [0], [0], [1], [0, 0, 1, 1], [], []>} : vector<128x256xbf16>, vector<256x32xbf16>, vector<128x32xf32> -> vector<128x32xf32>
    %c0_3 = arith.constant 0 : index
    %c0_4 = arith.constant 0 : index
    %3 = vector.load %arg3[%c0_3, %c0_4] : memref<1x32xf32, #tpu.memory_space<vmem>>, vector<1x32xf32>
    %4 = vector.broadcast %3 : vector<1x32xf32> to vector<128x32xf32>
    %5 = arith.addf %2, %4 : vector<128x32xf32>
    %cst_5 = arith.constant 0.000000e+00 : f32
    %6 = vector.broadcast %cst_5 : f32 to vector<128x32xf32>
    %7 = arith.maximumf %5, %6 : vector<128x32xf32>
    %8 = arith.truncf %7 : vector<128x32xf32> to vector<128x32xbf16>
    %c0_6 = arith.constant 0 : index
    %c0_7 = arith.constant 0 : index
    %9 = vector.load %arg4[%c0_6, %c0_7] : memref<128x32xbf16, #tpu.memory_space<vmem>>, vector<128x32xbf16>
    tpu.vector_store %arg4[%c0_6, %c0_7], %8 {strides = array<i32>} : memref<128x32xbf16, #tpu.memory_space<vmem>>, vector<128x32xbf16>,
    return
  }
  func.func @transform_0(%arg0: i32) -> (i32, i32) {
    %c0_i32 = arith.constant 0 : i32
    %c0_i32_0 = arith.constant 0 : i32
    return %arg0, %c0_i32 : i32, i32
  }
  func.func @transform_1(%arg0: i32) -> (i32, i32) {
    %c0_i32 = arith.constant 0 : i32
    %c0_i32_0 = arith.constant 0 : i32
    %c0_i32_1 = arith.constant 0 : i32
    return %c0_i32, %c0_i32_0 : i32, i32
  }
  func.func @transform_2(%arg0: i32) -> (i32, i32) {
    %c0_i32 = arith.constant 0 : i32
    %c0_i32_0 = arith.constant 0 : i32
    %c0_i32_1 = arith.constant 0 : i32
    return %c0_i32, %c0_i32_0 : i32, i32
  }
  func.func @transform_3(%arg0: i32) -> (i32, i32) {
    %c0_i32 = arith.constant 0 : i32
    %c0_i32_0 = arith.constant 0 : i32
    return %arg0, %c0_i32 : i32, i32
  }
}

module attributes {stable_mosaic.version = 11 : i64} {
  func.func @matmul_bias_relu_kernel(%arg0: i32, %arg1: memref<128x512xbf16, #tpu.memory_space<vmem>>, %arg2: memref<512x64xbf16, #tpu.memory_space<vmem>>, %arg3: memref<1x64xf32, #tpu.memory_space<vmem>>, %arg4: memref<128x64xbf16, #tpu.memory_space<vmem>>) attributes {dimension_semantics = [#tpu.dimension_semantics<parallel>], iteration_bounds = array<i64: 2>, scalar_prefetch = 0 : i64, scratch_operands = 0 : i64, tpu.core_type = #tpu.core_type<tc>, window_params = [{transform_indices = @transform_0, window_bounds = array<i64: 128, 512>}, {pipeline_mode = #tpu.pipeline_mode<synchronous>, transform_indices = @transform_1, window_bounds = array<i64: 512, 64>}, {pipeline_mode = #tpu.pipeline_mode<synchronous>, transform_indices = @transform_2, window_bounds = array<i64: 1, 64>}, {transform_indices = @transform_3, window_bounds = array<i64: 128, 64>}]} {
    %c0 = arith.constant 0 : index
    %c0_0 = arith.constant 0 : index
    %0 = vector.load %arg1[%c0, %c0_0] : memref<128x512xbf16, #tpu.memory_space<vmem>>, vector<128x512xbf16>
    %c0_1 = arith.constant 0 : index
    %c0_2 = arith.constant 0 : index
    %1 = vector.load %arg2[%c0_1, %c0_2] : memref<512x64xbf16, #tpu.memory_space<vmem>>, vector<512x64xbf16>
    %cst = arith.constant dense<0.000000e+00> : vector<128x64xf32>
    %2 = tpu.matmul %0, %1, %cst {dimension_numbers = #tpu.dot_dimension_numbers<[1], [0], [0], [1], [0, 0, 1, 1], [], []>} : vector<128x512xbf16>, vector<512x64xbf16>, vector<128x64xf32> -> vector<128x64xf32>
    %c0_3 = arith.constant 0 : index
    %c0_4 = arith.constant 0 : index
    %3 = vector.load %arg3[%c0_3, %c0_4] : memref<1x64xf32, #tpu.memory_space<vmem>>, vector<1x64xf32>
    %4 = vector.broadcast %3 : vector<1x64xf32> to vector<128x64xf32>
    %5 = arith.addf %2, %4 : vector<128x64xf32>
    %cst_5 = arith.constant 0.000000e+00 : f32
    %6 = vector.broadcast %cst_5 : f32 to vector<128x64xf32>
    %7 = arith.maximumf %5, %6 : vector<128x64xf32>
    %8 = arith.truncf %7 : vector<128x64xf32> to vector<128x64xbf16>
    %c0_6 = arith.constant 0 : index
    %c0_7 = arith.constant 0 : index
    %9 = vector.load %arg4[%c0_6, %c0_7] : memref<128x64xbf16, #tpu.memory_space<vmem>>, vector<128x64xbf16>
    tpu.vector_store %arg4[%c0_6, %c0_7], %8 {strides = array<i32>} : memref<128x64xbf16, #tpu.memory_space<vmem>>, vector<128x64xbf16>,
    return
  }
  func.func @transform_0(%arg0: i32) -> (i32, i32) {
    %c0_i32 = arith.constant 0 : i32
    %c0_i32_0 = arith.constant 0 : i32
    return %arg0, %c0_i32 : i32, i32
  }
  func.func @transform_1(%arg0: i32) -> (i32, i32) {
    %c0_i32 = arith.constant 0 : i32
    %c0_i32_0 = arith.constant 0 : i32
    %c0_i32_1 = arith.constant 0 : i32
    return %c0_i32, %c0_i32_0 : i32, i32
  }
  func.func @transform_2(%arg0: i32) -> (i32, i32) {
    %c0_i32 = arith.constant 0 : i32
    %c0_i32_0 = arith.constant 0 : i32
    %c0_i32_1 = arith.constant 0 : i32
    return %c0_i32, %c0_i32_0 : i32, i32
  }
  func.func @transform_3(%arg0: i32) -> (i32, i32) {
    %c0_i32 = arith.constant 0 : i32
    %c0_i32_0 = arith.constant 0 : i32
    return %arg0, %c0_i32 : i32, i32
  }
}

module attributes {stable_mosaic.version = 11 : i64} {
  func.func @matmul_bias_relu_kernel(%arg0: i32, %arg1: memref<128x576xbf16, #tpu.memory_space<vmem>>, %arg2: memref<576x64xbf16, #tpu.memory_space<vmem>>, %arg3: memref<1x64xf32, #tpu.memory_space<vmem>>, %arg4: memref<128x64xbf16, #tpu.memory_space<vmem>>) attributes {dimension_semantics = [#tpu.dimension_semantics<parallel>], iteration_bounds = array<i64: 1>, scalar_prefetch = 0 : i64, scratch_operands = 0 : i64, tpu.core_type = #tpu.core_type<tc>, window_params = [{transform_indices = @transform_0, window_bounds = array<i64: 128, 576>}, {pipeline_mode = #tpu.pipeline_mode<synchronous>, transform_indices = @transform_1, window_bounds = array<i64: 576, 64>}, {pipeline_mode = #tpu.pipeline_mode<synchronous>, transform_indices = @transform_2, window_bounds = array<i64: 1, 64>}, {transform_indices = @transform_3, window_bounds = array<i64: 128, 64>}]} {
    %c0 = arith.constant 0 : index
    %c0_0 = arith.constant 0 : index
    %0 = vector.load %arg1[%c0, %c0_0] : memref<128x576xbf16, #tpu.memory_space<vmem>>, vector<128x576xbf16>
    %c0_1 = arith.constant 0 : index
    %c0_2 = arith.constant 0 : index
    %1 = vector.load %arg2[%c0_1, %c0_2] : memref<576x64xbf16, #tpu.memory_space<vmem>>, vector<576x64xbf16>
    %cst = arith.constant dense<0.000000e+00> : vector<128x64xf32>
    %2 = tpu.matmul %0, %1, %cst {dimension_numbers = #tpu.dot_dimension_numbers<[1], [0], [0], [1], [0, 0, 1, 1], [], []>} : vector<128x576xbf16>, vector<576x64xbf16>, vector<128x64xf32> -> vector<128x64xf32>
    %c0_3 = arith.constant 0 : index
    %c0_4 = arith.constant 0 : index
    %3 = vector.load %arg3[%c0_3, %c0_4] : memref<1x64xf32, #tpu.memory_space<vmem>>, vector<1x64xf32>
    %4 = vector.broadcast %3 : vector<1x64xf32> to vector<128x64xf32>
    %5 = arith.addf %2, %4 : vector<128x64xf32>
    %cst_5 = arith.constant 0.000000e+00 : f32
    %6 = vector.broadcast %cst_5 : f32 to vector<128x64xf32>
    %7 = arith.maximumf %5, %6 : vector<128x64xf32>
    %8 = arith.truncf %7 : vector<128x64xf32> to vector<128x64xbf16>
    %c0_6 = arith.constant 0 : index
    %c0_7 = arith.constant 0 : index
    %9 = vector.load %arg4[%c0_6, %c0_7] : memref<128x64xbf16, #tpu.memory_space<vmem>>, vector<128x64xbf16>
    tpu.vector_store %arg4[%c0_6, %c0_7], %8 {strides = array<i32>} : memref<128x64xbf16, #tpu.memory_space<vmem>>, vector<128x64xbf16>,
    return
  }
  func.func @transform_0(%arg0: i32) -> (i32, i32) {
    %c0_i32 = arith.constant 0 : i32
    %c0_i32_0 = arith.constant 0 : i32
    return %arg0, %c0_i32 : i32, i32
  }
  func.func @transform_1(%arg0: i32) -> (i32, i32) {
    %c0_i32 = arith.constant 0 : i32
    %c0_i32_0 = arith.constant 0 : i32
    %c0_i32_1 = arith.constant 0 : i32
    return %c0_i32, %c0_i32_0 : i32, i32
  }
  func.func @transform_2(%arg0: i32) -> (i32, i32) {
    %c0_i32 = arith.constant 0 : i32
    %c0_i32_0 = arith.constant 0 : i32
    %c0_i32_1 = arith.constant 0 : i32
    return %c0_i32, %c0_i32_0 : i32, i32
  }
  func.func @transform_3(%arg0: i32) -> (i32, i32) {
    %c0_i32 = arith.constant 0 : i32
    %c0_i32_0 = arith.constant 0 : i32
    return %arg0, %c0_i32 : i32, i32
  }
}

module attributes {stable_mosaic.version = 11 : i64} {
  func.func @iam_head_kernel(%arg0: i32, %arg1: memref<8x3136xbf16, #tpu.memory_space<vmem>>, %arg2: memref<8x64xf32, #tpu.memory_space<vmem>>, %arg3: memref<8x1xf32, #tpu.memory_space<vmem>>, %arg4: memref<3136x320xbf16, #tpu.memory_space<vmem>>, %arg5: memref<1x320xf32, #tpu.memory_space<vmem>>, %arg6: memref<192x320xbf16, #tpu.memory_space<vmem>>, %arg7: memref<1x320xf32, #tpu.memory_space<vmem>>, %arg8: memref<1x96xf32, #tpu.memory_space<vmem>>, %arg9: memref<1x1xf32, #tpu.memory_space<smem>>, %arg10: memref<8x256xf32, #tpu.memory_space<vmem>>) attributes {dimension_semantics = [#tpu.dimension_semantics<parallel>], iteration_bounds = array<i64: 1>, scalar_prefetch = 0 : i64, scratch_operands = 0 : i64, tpu.core_type = #tpu.core_type<tc>, window_params = [{transform_indices = @transform_0, window_bounds = array<i64: 8, 3136>}, {transform_indices = @transform_1, window_bounds = array<i64: 8, 64>}, {transform_indices = @transform_2, window_bounds = array<i64: 8, 1>}, {pipeline_mode = #tpu.pipeline_mode<synchronous>, transform_indices = @transform_3, window_bounds = array<i64: 3136, 320>}, {pipeline_mode = #tpu.pipeline_mode<synchronous>, transform_indices = @transform_4, window_bounds = array<i64: 1, 320>}, {pipeline_mode = #tpu.pipeline_mode<synchronous>, transform_indices = @transform_5, window_bounds = array<i64: 192, 320>}, {pipeline_mode = #tpu.pipeline_mode<synchronous>, transform_indices = @transform_6, window_bounds = array<i64: 1, 320>}, {pipeline_mode = #tpu.pipeline_mode<synchronous>, transform_indices = @transform_7, window_bounds = array<i64: 1, 96>}, {transform_indices = @transform_8, window_bounds = array<i64: 1, 1>}, {transform_indices = @transform_9, window_bounds = array<i64: 8, 256>}]} {
    %c0 = arith.constant 0 : index
    %c0_0 = arith.constant 0 : index
    %0 = vector.load %arg1[%c0, %c0_0] : memref<8x3136xbf16, #tpu.memory_space<vmem>>, vector<8x3136xbf16>
    %c0_1 = arith.constant 0 : index
    %c0_2 = arith.constant 0 : index
    %1 = vector.load %arg2[%c0_1, %c0_2] : memref<8x64xf32, #tpu.memory_space<vmem>>, vector<8x64xf32>
    %c0_3 = arith.constant 0 : index
    %c0_4 = arith.constant 0 : index
    %2 = vector.load %arg3[%c0_3, %c0_4] : memref<8x1xf32, #tpu.memory_space<vmem>>, vector<8x1xf32>
    %3 = vector.broadcast %2 : vector<8x1xf32> to vector<8x64xf32>
    %4 = arith.mulf %1, %3 : vector<8x64xf32>
    %c0_5 = arith.constant 0 : index
    %c0_6 = arith.constant 0 : index
    %5 = vector.load %arg4[%c0_5, %c0_6] : memref<3136x320xbf16, #tpu.memory_space<vmem>>, vector<3136x320xbf16>
    %cst = arith.constant dense<0.000000e+00> : vector<8x320xf32>
    %6 = tpu.matmul %0, %5, %cst {dimension_numbers = #tpu.dot_dimension_numbers<[1], [0], [0], [1], [0, 0, 1, 1], [], []>} : vector<8x3136xbf16>, vector<3136x320xbf16>, vector<8x320xf32> -> vector<8x320xf32>
    %c0_7 = arith.constant 0 : index
    %c0_8 = arith.constant 0 : index
    %7 = vector.load %arg5[%c0_7, %c0_8] : memref<1x320xf32, #tpu.memory_space<vmem>>, vector<1x320xf32>
    %8 = vector.broadcast %7 : vector<1x320xf32> to vector<8x320xf32>
    %9 = arith.addf %6, %8 : vector<8x320xf32>
    %10 = vector.extract_strided_slice %9 {offsets = [0, 0], sizes = [8, 64], strides = [1, 1]} : vector<8x320xf32> to vector<8x64xf32>
    %11 = math.tanh %10 : vector<8x64xf32>
    %12 = vector.extract_strided_slice %9 {offsets = [0, 64], sizes = [8, 64], strides = [1, 1]} : vector<8x320xf32> to vector<8x64xf32>
    %13 = math.tanh %12 : vector<8x64xf32>
    %14 = vector.extract_strided_slice %9 {offsets = [0, 128], sizes = [8, 96], strides = [1, 1]} : vector<8x320xf32> to vector<8x96xf32>
    %15 = vector.extract_strided_slice %9 {offsets = [0, 224], sizes = [8, 96], strides = [1, 1]} : vector<8x320xf32> to vector<8x96xf32>
    %16 = tpu.concatenate %11, %13, %4 in 1 : vector<8x64xf32>, vector<8x64xf32>, vector<8x64xf32> -> vector<8x192xf32>
    %17 = arith.truncf %16 : vector<8x192xf32> to vector<8x192xbf16>
    %c0_9 = arith.constant 0 : index
    %c0_10 = arith.constant 0 : index
    %18 = vector.load %arg6[%c0_9, %c0_10] : memref<192x320xbf16, #tpu.memory_space<vmem>>, vector<192x320xbf16>
    %cst_11 = arith.constant dense<0.000000e+00> : vector<8x320xf32>
    %19 = tpu.matmul %17, %18, %cst_11 {dimension_numbers = #tpu.dot_dimension_numbers<[1], [0], [0], [1], [0, 0, 1, 1], [], []>} : vector<8x192xbf16>, vector<192x320xbf16>, vector<8x320xf32> -> vector<8x320xf32>
    %c0_12 = arith.constant 0 : index
    %c0_13 = arith.constant 0 : index
    %20 = vector.load %arg7[%c0_12, %c0_13] : memref<1x320xf32, #tpu.memory_space<vmem>>, vector<1x320xf32>
    %21 = vector.broadcast %20 : vector<1x320xf32> to vector<8x320xf32>
    %22 = arith.addf %19, %21 : vector<8x320xf32>
    %23 = vector.extract_strided_slice %22 {offsets = [0, 0], sizes = [8, 64], strides = [1, 1]} : vector<8x320xf32> to vector<8x64xf32>
    %24 = math.tanh %23 : vector<8x64xf32>
    %25 = vector.extract_strided_slice %22 {offsets = [0, 64], sizes = [8, 64], strides = [1, 1]} : vector<8x320xf32> to vector<8x64xf32>
    %26 = math.tanh %25 : vector<8x64xf32>
    %27 = vector.extract_strided_slice %22 {offsets = [0, 128], sizes = [8, 96], strides = [1, 1]} : vector<8x320xf32> to vector<8x96xf32>
    %28 = vector.extract_strided_slice %22 {offsets = [0, 224], sizes = [8, 96], strides = [1, 1]} : vector<8x320xf32> to vector<8x96xf32>
    %29 = vector.extract_strided_slice %4 {offsets = [0, 0], sizes = [8, 32], strides = [1, 1]} : vector<8x64xf32> to vector<8x32xf32>
    %30 = vector.extract_strided_slice %14 {offsets = [0, 0], sizes = [8, 32], strides = [1, 1]} : vector<8x96xf32> to vector<8x32xf32>
    %31 = vector.extract_strided_slice %27 {offsets = [0, 0], sizes = [8, 32], strides = [1, 1]} : vector<8x96xf32> to vector<8x32xf32>
    %32 = arith.addf %30, %31 : vector<8x32xf32>
    %cst_14 = arith.constant 0.000000e+00 : f32
    %33 = vector.broadcast %cst_14 : f32 to vector<8x32xf32>
    %34 = arith.subf %33, %32 : vector<8x32xf32>
    %35 = math.exp %34 : vector<8x32xf32>
    %cst_15 = arith.constant 1.000000e+00 : f32
    %36 = vector.broadcast %cst_15 : f32 to vector<8x32xf32>
    %37 = arith.addf %36, %35 : vector<8x32xf32>
    %cst_16 = arith.constant 1.000000e+00 : f32
    %38 = vector.broadcast %cst_16 : f32 to vector<8x32xf32>
    %39 = arith.divf %38, %37 : vector<8x32xf32>
    %40 = vector.extract_strided_slice %14 {offsets = [0, 32], sizes = [8, 32], strides = [1, 1]} : vector<8x96xf32> to vector<8x32xf32>
    %41 = vector.extract_strided_slice %27 {offsets = [0, 32], sizes = [8, 32], strides = [1, 1]} : vector<8x96xf32> to vector<8x32xf32>
    %42 = arith.addf %40, %41 : vector<8x32xf32>
    %cst_17 = arith.constant 0.000000e+00 : f32
    %43 = vector.broadcast %cst_17 : f32 to vector<8x32xf32>
    %44 = arith.subf %43, %42 : vector<8x32xf32>
    %45 = math.exp %44 : vector<8x32xf32>
    %cst_18 = arith.constant 1.000000e+00 : f32
    %46 = vector.broadcast %cst_18 : f32 to vector<8x32xf32>
    %47 = arith.addf %46, %45 : vector<8x32xf32>
    %cst_19 = arith.constant 1.000000e+00 : f32
    %48 = vector.broadcast %cst_19 : f32 to vector<8x32xf32>
    %49 = arith.divf %48, %47 : vector<8x32xf32>
    %50 = vector.extract_strided_slice %14 {offsets = [0, 64], sizes = [8, 32], strides = [1, 1]} : vector<8x96xf32> to vector<8x32xf32>
    %51 = vector.extract_strided_slice %27 {offsets = [0, 64], sizes = [8, 32], strides = [1, 1]} : vector<8x96xf32> to vector<8x32xf32>
    %52 = arith.mulf %39, %51 : vector<8x32xf32>
    %53 = arith.addf %50, %52 : vector<8x32xf32>
    %54 = math.tanh %53 : vector<8x32xf32>
    %cst_20 = arith.constant 1.000000e+00 : f32
    %55 = vector.broadcast %cst_20 : f32 to vector<8x32xf32>
    %56 = arith.subf %55, %49 : vector<8x32xf32>
    %57 = arith.mulf %56, %54 : vector<8x32xf32>
    %58 = arith.mulf %49, %29 : vector<8x32xf32>
    %59 = arith.addf %57, %58 : vector<8x32xf32>
    %60 = vector.extract_strided_slice %4 {offsets = [0, 32], sizes = [8, 32], strides = [1, 1]} : vector<8x64xf32> to vector<8x32xf32>
    %61 = vector.extract_strided_slice %15 {offsets = [0, 0], sizes = [8, 32], strides = [1, 1]} : vector<8x96xf32> to vector<8x32xf32>
    %62 = vector.extract_strided_slice %28 {offsets = [0, 0], sizes = [8, 32], strides = [1, 1]} : vector<8x96xf32> to vector<8x32xf32>
    %63 = arith.addf %61, %62 : vector<8x32xf32>
    %cst_21 = arith.constant 0.000000e+00 : f32
    %64 = vector.broadcast %cst_21 : f32 to vector<8x32xf32>
    %65 = arith.subf %64, %63 : vector<8x32xf32>
    %66 = math.exp %65 : vector<8x32xf32>
    %cst_22 = arith.constant 1.000000e+00 : f32
    %67 = vector.broadcast %cst_22 : f32 to vector<8x32xf32>
    %68 = arith.addf %67, %66 : vector<8x32xf32>
    %cst_23 = arith.constant 1.000000e+00 : f32
    %69 = vector.broadcast %cst_23 : f32 to vector<8x32xf32>
    %70 = arith.divf %69, %68 : vector<8x32xf32>
    %71 = vector.extract_strided_slice %15 {offsets = [0, 32], sizes = [8, 32], strides = [1, 1]} : vector<8x96xf32> to vector<8x32xf32>
    %72 = vector.extract_strided_slice %28 {offsets = [0, 32], sizes = [8, 32], strides = [1, 1]} : vector<8x96xf32> to vector<8x32xf32>
    %73 = arith.addf %71, %72 : vector<8x32xf32>
    %cst_24 = arith.constant 0.000000e+00 : f32
    %74 = vector.broadcast %cst_24 : f32 to vector<8x32xf32>
    %75 = arith.subf %74, %73 : vector<8x32xf32>
    %76 = math.exp %75 : vector<8x32xf32>
    %cst_25 = arith.constant 1.000000e+00 : f32
    %77 = vector.broadcast %cst_25 : f32 to vector<8x32xf32>
    %78 = arith.addf %77, %76 : vector<8x32xf32>
    %cst_26 = arith.constant 1.000000e+00 : f32
    %79 = vector.broadcast %cst_26 : f32 to vector<8x32xf32>
    %80 = arith.divf %79, %78 : vector<8x32xf32>
    %81 = vector.extract_strided_slice %15 {offsets = [0, 64], sizes = [8, 32], strides = [1, 1]} : vector<8x96xf32> to vector<8x32xf32>
    %82 = vector.extract_strided_slice %28 {offsets = [0, 64], sizes = [8, 32], strides = [1, 1]} : vector<8x96xf32> to vector<8x32xf32>
    %83 = arith.mulf %70, %82 : vector<8x32xf32>
    %84 = arith.addf %81, %83 : vector<8x32xf32>
    %85 = math.tanh %84 : vector<8x32xf32>
    %cst_27 = arith.constant 1.000000e+00 : f32
    %86 = vector.broadcast %cst_27 : f32 to vector<8x32xf32>
    %87 = arith.subf %86, %80 : vector<8x32xf32>
    %88 = arith.mulf %87, %85 : vector<8x32xf32>
    %89 = arith.mulf %80, %60 : vector<8x32xf32>
    %90 = arith.addf %88, %89 : vector<8x32xf32>
    %91 = tpu.concatenate %26, %59 in 1 : vector<8x64xf32>, vector<8x32xf32> -> vector<8x96xf32>
    %92 = tpu.concatenate %24, %90 in 1 : vector<8x64xf32>, vector<8x32xf32> -> vector<8x96xf32>
    %93 = tpu.concatenate %59, %90 in 1 : vector<8x32xf32>, vector<8x32xf32> -> vector<8x64xf32>
    %c0_28 = arith.constant 0 : index
    %c0_29 = arith.constant 0 : index
    %94 = vector.load %arg8[%c0_28, %c0_29] : memref<1x96xf32, #tpu.memory_space<vmem>>, vector<1x96xf32>
    %95 = vector.broadcast %94 : vector<1x96xf32> to vector<8x96xf32>
    %96 = arith.mulf %91, %95 : vector<8x96xf32>
    %cst_30 = arith.constant dense<0.000000e+00> : vector<8xf32>
    %97 = vector.multi_reduction <add>, %96, %cst_30 [1] : vector<8x96xf32> to vector<8xf32>
    %98 = vector.shape_cast %97 : vector<8xf32> to vector<8x1xf32>
    %c0_31 = arith.constant 0 : index
    %c0_32 = arith.constant 0 : index
    %99 = memref.load %arg9[%c0_31, %c0_32] : memref<1x1xf32, #tpu.memory_space<smem>>
    %100 = vector.broadcast %99 : f32 to vector<8x1xf32>
    %101 = arith.addf %98, %100 : vector<8x1xf32>
    %cst_33 = arith.constant 0.000000e+00 : f32
    %102 = vector.broadcast %cst_33 : f32 to vector<8x95xf32>
    %103 = tpu.concatenate %92, %93, %101, %102 in 1 : vector<8x96xf32>, vector<8x64xf32>, vector<8x1xf32>, vector<8x95xf32> -> vector<8x256xf32>
    %c0_34 = arith.constant 0 : index
    %c0_35 = arith.constant 0 : index
    %104 = vector.load %arg10[%c0_34, %c0_35] : memref<8x256xf32, #tpu.memory_space<vmem>>, vector<8x256xf32>
    tpu.vector_store %arg10[%c0_34, %c0_35], %103 {strides = array<i32>} : memref<8x256xf32, #tpu.memory_space<vmem>>, vector<8x256xf32>,
    return
  }
  func.func @transform_0(%arg0: i32) -> (i32, i32) {
    %c0_i32 = arith.constant 0 : i32
    %c0_i32_0 = arith.constant 0 : i32
    return %arg0, %c0_i32 : i32, i32
  }
  func.func @transform_1(%arg0: i32) -> (i32, i32) {
    %c0_i32 = arith.constant 0 : i32
    %c0_i32_0 = arith.constant 0 : i32
    return %arg0, %c0_i32 : i32, i32
  }
  func.func @transform_2(%arg0: i32) -> (i32, i32) {
    %c0_i32 = arith.constant 0 : i32
    %c0_i32_0 = arith.constant 0 : i32
    return %arg0, %c0_i32 : i32, i32
  }
  func.func @transform_3(%arg0: i32) -> (i32, i32) {
    %c0_i32 = arith.constant 0 : i32
    %c0_i32_0 = arith.constant 0 : i32
    %c0_i32_1 = arith.constant 0 : i32
    return %c0_i32, %c0_i32_0 : i32, i32
  }
  func.func @transform_4(%arg0: i32) -> (i32, i32) {
    %c0_i32 = arith.constant 0 : i32
    %c0_i32_0 = arith.constant 0 : i32
    %c0_i32_1 = arith.constant 0 : i32
    return %c0_i32, %c0_i32_0 : i32, i32
  }
  func.func @transform_5(%arg0: i32) -> (i32, i32) {
    %c0_i32 = arith.constant 0 : i32
    %c0_i32_0 = arith.constant 0 : i32
    %c0_i32_1 = arith.constant 0 : i32
    return %c0_i32, %c0_i32_0 : i32, i32
  }
  func.func @transform_6(%arg0: i32) -> (i32, i32) {
    %c0_i32 = arith.constant 0 : i32
    %c0_i32_0 = arith.constant 0 : i32
    %c0_i32_1 = arith.constant 0 : i32
    return %c0_i32, %c0_i32_0 : i32, i32
  }
  func.func @transform_7(%arg0: i32) -> (i32, i32) {
    %c0_i32 = arith.constant 0 : i32
    %c0_i32_0 = arith.constant 0 : i32
    %c0_i32_1 = arith.constant 0 : i32
    return %c0_i32, %c0_i32_0 : i32, i32
  }
  func.func @transform_8(%arg0: i32) -> (i32, i32) {
    %c0_i32 = arith.constant 0 : i32
    %c0_i32_0 = arith.constant 0 : i32
    %c0_i32_1 = arith.constant 0 : i32
    return %c0_i32, %c0_i32_0 : i32, i32
  }
  func.func @transform_9(%arg0: i32) -> (i32, i32) {
    %c0_i32 = arith.constant 0 : i32
    %c0_i32_0 = arith.constant 0 : i32
    return %arg0, %c0_i32 : i32, i32
  }
}

</mosaic_0001>

<bundles_post_ra>
// kernel: iam_base_cnn_forward.4
= control target key start
LH: loop header
LB: loop body
LE: loop exit
PB: predicated region body
PF: predicated region fallthrough
CT: control target
= control target key end

     0   :  { %s893_s12 = smov 0   ;;  %s1035_s0 = inlined_call_operand.vmem [shape: bf16[896,256], index: 0, kind: input, shape index: {}]   ;;  %s1036_s1 = inlined_call_operand.vmem [shape: bf16[256,32], index: 1, kind: input, shape index: {}]   ;;  %s1037_s2 = inlined_call_operand.vmem [shape: f32[1,32], index: 2, kind: input, shape index: {}]   ;;  %s1038_s3 = inlined_call_operand.vmem [shape: bf16[896,32], index: 3, kind: output, shape index: {}]  }
   0x1 LB: > { %s659_s13 = sadd.s32 4294967295, %s871_s12   ;;  %p663_p0 = scmp.ge.s32.totalorder %s871_s12, 1  ;;  %s871_s12 = sphi %s893_s12, %s13_s12  }
   0x2   : > { %p139_p1 = scmp.lt.s32.totalorder %s871_s12, 8 }
   0x4   : > { %p140_p2 = pnand %p663_p0, %p139_p1 }
   0x5   : > { %v825_v0 = vld [vmem:[%s1036_s1 + $0x40] sm:$0xff] (!%p140_p2)   ;;  %s664_s16 = sshll.u32 (!%p140_p2), %s659_s13, 4  ;;  %v827_v2 = vld [vmem:[%s1036_s1 + $0x48] sm:$0xff] (!%p140_p2)   ;;  %v829_v4 = vld [vmem:[%s1036_s1 + $0x50] sm:$0xff] (!%p140_p2)   ;;  %vm586_vm0 = vcmask (!%p140_p2), 257024  }
   0x6   : > { %143 = sbr.rel (%p140_p2) target bundleno = 286 (0x11e), region = 32  ;;  %v826_v1 = vld [vmem:[%s1036_s1] sm:$0xff] (!%p140_p2)   ;;  %737 = vmatprep.subr.bf16.mxu0 (!%p140_p2), %v825_v0  ;;  %801 = vmatprep.subr.bf16.mxu1 (!%p140_p2), %v825_v0  ;;  %v828_v3 = vld [vmem:[%s1036_s1 + $0x8] sm:$0xff] (!%p140_p2)   ;;  %p165_p3 = scmp.lt.s32.totalorder (!%p140_p2), %s664_s16, 111  ;;  %v830_v5 = vld [vmem:[%s1036_s1 + $0x10] sm:$0xff] (!%p140_p2)  }
   0x7   : > { %738 = vmatpush3.bf16.msra.mxu0 (!%p140_p2), %v826_v1  ;;  %809 = vmatpush3.bf16.msra.mxu1 (!%p140_p2), %v826_v1  ;;  %v831_v6 = vld [vmem:[%s1036_s1 + $0x58] sm:$0xff] (!%p140_p2)   ;;  %v833_v8 = vld [vmem:[%s1036_s1 + $0x60] sm:$0xff] (!%p140_p2)   ;;  %v835_v10 = vld [vmem:[%s1036_s1 + $0x68] sm:$0xff] (!%p140_p2)  }
   0x8   : > { %739 = vmatprep.subr.bf16.mxu0 (!%p140_p2), %v827_v2  ;;  %802 = vmatprep.subr.bf16.mxu1 (!%p140_p2), %v827_v2  ;;  %v832_v7 = vld [vmem:[%s1036_s1 + $0x18] sm:$0xff] (!%p140_p2)   ;;  %v834_v9 = vld [vmem:[%s1036_s1 + $0x20] sm:$0xff] (!%p140_p2)   ;;  %v836_v13 = vld [vmem:[%s1036_s1 + $0x28] sm:$0xff] (!%p140_p2)  }
   0x9   : > { %v837_v14 = vld [vmem:[%s1036_s1 + $0x70] sm:$0xff] (!%p140_p2)   ;;  %v839_v16 = vld [vmem:[%s1036_s1 + $0x78] sm:$0xff] (!%p140_p2)   ;;  %v976_v34 = vld [vmem:[%s1037_s2] ss:$0 sm:$0xff] (!%p140_p2) }
   0xa   : > { %v838_v15 = vld [vmem:[%s1036_s1 + $0x30] sm:$0xff] (!%p140_p2)   ;;  %v840_v17 = vld [vmem:[%s1036_s1 + $0x38] sm:$0xff] (!%p140_p2)  }
   0xb   : > { %740 = vmatpush3.bf16.msra.mxu0 (!%p140_p2), %v828_v3  ;;  %810 = vmatpush3.bf16.msra.mxu1 (!%p140_p2), %v828_v3 }
   0xc   : > { %741 = vmatprep.subr.bf16.mxu0 (!%p140_p2), %v829_v4  ;;  %803 = vmatprep.subr.bf16.mxu1 (!%p140_p2), %v829_v4 }
   0xd   : > { %s1040_s16 = smov (!%p165_p3, %s664_s16), 111 }
   0xe   : > { %s720_s4 = sshll.u32 %s1040_s16, 3  ;;  %s668_s28 = sshll.u32 %s1040_s16, 2 }
   0xf   : > { %742 = vmatpush3.bf16.msra.mxu0 %v830_v5  ;;  %811 = vmatpush3.bf16.msra.mxu1 %v830_v5  ;;  %s934_s9 = scalar_lea.vmem %s1035_s0, %s720_s4  ;;  %s986_s4 = scalar_lea.vmem %s1038_s3, %s668_s28 }
  0x10   : > { %743 = vmatprep.subr.bf16.mxu0 %v831_v6  ;;  %804 = vmatprep.subr.bf16.mxu1 %v831_v6  ;;  %v843_v11 = vld [vmem:[%s934_s9 + $0x4] ss:$8 sps:$4 sm:$0xff]   ;;  %v841_v18 = vld [vmem:[%s934_s9] ss:$8 sps:$4 sm:$0xff]   ;;  %v847_v20 = vld [vmem:[%s934_s9 + $0x14] ss:$8 sps:$4 sm:$0xff]  }
  0x11   : > { %v846_v12 = vld [vmem:[%s934_s9 + $0x44] ss:$8 sps:$4 sm:$0xff]   ;;  %441 = vmatprep.mubr.bf16.mxu0 %v843_v11  ;;  %v844_v19 = vld [vmem:[%s934_s9 + $0x40] ss:$8 sps:$4 sm:$0xff]   ;;  %v849_v21 = vld [vmem:[%s934_s9 + $0x54] ss:$8 sps:$4 sm:$0xff]  }
  0x12   : > { %473 = vmatprep.mubr.bf16.mxu1 %v846_v12  ;;  %v851_v22 = vld [vmem:[%s934_s9 + $0x10] ss:$8 sps:$4 sm:$0xff]   ;;  %v853_v24 = vld [vmem:[%s934_s9 + $0x24] ss:$8 sps:$4 sm:$0xff]   ;;  %v857_v26 = vld [vmem:[%s934_s9 + $0x20] ss:$8 sps:$4 sm:$0xff]  }
  0x13   : > { %744 = vmatpush3.bf16.msra.mxu0 %v832_v7  ;;  %812 = vmatpush3.bf16.msra.mxu1 %v832_v7  ;;  %v852_v23 = vld [vmem:[%s934_s9 + $0x50] ss:$8 sps:$4 sm:$0xff]   ;;  %v855_v25 = vld [vmem:[%s934_s9 + $0x64] ss:$8 sps:$4 sm:$0xff]   ;;  %v858_v27 = vld [vmem:[%s934_s9 + $0x60] ss:$8 sps:$4 sm:$0xff]  }
  0x14   : > { %745 = vmatprep.subr.bf16.mxu0 %v833_v8  ;;  %805 = vmatprep.subr.bf16.mxu1 %v833_v8  ;;  %v859_v28 = vld [vmem:[%s934_s9 + $0x34] ss:$8 sps:$4 sm:$0xff]   ;;  %v863_v30 = vld [vmem:[%s934_s9 + $0x30] ss:$8 sps:$4 sm:$0xff]  }
  0x15   : > { %v861_v29 = vld [vmem:[%s934_s9 + $0x74] ss:$8 sps:$4 sm:$0xff]   ;;  %v864_v31 = vld [vmem:[%s934_s9 + $0x70] ss:$8 sps:$4 sm:$0xff]  }
  0x17   : > { %746 = vmatpush3.bf16.msra.mxu0 %v834_v9  ;;  %813 = vmatpush3.bf16.msra.mxu1 %v834_v9 }
  0x18   : > { %747 = vmatprep.subr.bf16.mxu0 %v835_v10  ;;  %806 = vmatprep.subr.bf16.mxu1 %v835_v10 }
  0x1b   : > { %748 = vmatpush3.bf16.msra.mxu0 %v836_v13  ;;  %814 = vmatpush3.bf16.msra.mxu1 %v836_v13 }
  0x1c   : > { %749 = vmatprep.subr.bf16.mxu0 %v837_v14  ;;  %807 = vmatprep.subr.bf16.mxu1 %v837_v14 }
  0x1f   : > { %750 = vmatpush3.bf16.msra.mxu0 %v838_v15  ;;  %815 = vmatpush3.bf16.msra.mxu1 %v838_v15 }
  0x20   : > { %751 = vmatprep.subr.bf16.mxu0 %v839_v16  ;;  %808 = vmatprep.subr.bf16.mxu1 %v839_v16 }
  0x23   : > { %752 = vmatpush3.bf16.msra.mxu0 %v840_v17  ;;  %816 = vmatpush3.bf16.msra.mxu1 %v840_v17 }
  0x26   : > { %442 = vmatmul.mubr.bf16.vlgmr.msra.gmra.mrb[0].mxu0 %v841_v18  ;;  %474 = vmatmul.mubr.bf16.vlgmr.msra.gmra.mrb[0].mxu1 %v844_v19 }
  0x27   : > { %449 = vmatprep.mubr.bf16.mxu0 %v847_v20  ;;  %481 = vmatprep.mubr.bf16.mxu1 %v849_v21 }
  0x2e   : > { %450 = vmatmul.mubr.bf16.gmra.mrb[4].mxu0 %v851_v22  ;;  %482 = vmatmul.mubr.bf16.gmra.mrb[4].mxu1 %v852_v23 }
  0x2f   : > { %457 = vmatprep.mubr.bf16.mxu0 %v853_v24  ;;  %489 = vmatprep.mubr.bf16.mxu1 %v855_v25 }
  0x36   : > { %458 = vmatmul.mubr.bf16.gmra.mrb[8].mxu0 %v857_v26  ;;  %490 = vmatmul.mubr.bf16.gmra.mrb[8].mxu1 %v858_v27 }
  0x37   : > { %465 = vmatprep.mubr.bf16.mxu0 %v859_v28  ;;  %497 = vmatprep.mubr.bf16.mxu1 %v861_v29 }
  0x3e   : > { %466 = vmatmul.mubr.bf16.gmra.mrb[12].mxu0 %v863_v30  ;;  %498 = vmatmul.mubr.bf16.gmra.mrb[12].mxu1 %v864_v31 }
  0xf9   : > { %v753_v32 = vpop.f32.mrb[0].mxu0  ;;  %v777_v33 = vpop.f32.mrb[0].mxu1 }
  0xfa   : > { %v754_v35 = vpop.f32.mrb[1].mxu0  ;;  %v778_v36 = vpop.f32.mrb[1].mxu1 }
  0xfb   : > { %v755_v37 = vadd.f32 %v754_v35, %v753_v32  ;;  %v779_v38 = vadd.f32 %v778_v36, %v777_v33  ;;  %v756_v39 = vpop.f32.mrb[2].mxu0  ;;  %v780_v40 = vpop.f32.mrb[2].mxu1 }
  0xfc   : > { %v757_v41 = vpop.f32.mrb[3].mxu0  ;;  %v781_v42 = vpop.f32.mrb[3].mxu1 }
  0xfd   : > { %v444_v43 = vadd.f32 %v755_v37, %v976_v34  ;;  %v476_v44 = vadd.f32 %v779_v38, %v976_v34  ;;  %v758_v45 = vadd.f32 %v757_v41, %v756_v39  ;;  %v782_v46 = vadd.f32 %v781_v42, %v780_v40 }
  0xff   : > { %v506_v47 = vmax.f32 %v444_v43, 0.0  ;;  %v514_v48 = vmax.f32 %v476_v44, 0.0  ;;  %v447_v49 = vadd.f32 %v758_v45, %v976_v34  ;;  %v479_v50 = vadd.f32 %v782_v46, %v976_v34 }
 0x101   : > { %v721_v51 = vpack.c.bf16 %v506_v47, %v506_v47  ;;  %v729_v52 = vpack.c.bf16 %v514_v48, %v514_v48  ;;  %v507_v53 = vmax.f32 %v447_v49, 0.0  ;;  %v515_v54 = vmax.f32 %v479_v50, 0.0  ;;  %v759_v55 = vpop.f32.mrb[4].mxu0  ;;  %v783_v56 = vpop.f32.mrb[4].mxu1 }
 0x102   : > { %v760_v57 = vpop.f32.mrb[5].mxu0  ;;  %v784_v58 = vpop.f32.mrb[5].mxu1 }
 0x103   : > { %587 = vst.msk [vmem:[%s986_s4] sm:$0xf] %vm586_vm0, %v721_v51  ;;  %595 = vst.msk [vmem:[%s986_s4 + $0x20] sm:$0xf] %vm586_vm0, %v729_v52  ;;  %v722_v59 = vpack.c.bf16 %v507_v53, %v507_v53  ;;  %v730_v60 = vpack.c.bf16 %v515_v54, %v515_v54  ;;  %v761_v61 = vadd.f32 %v760_v57, %v759_v55  ;;  %v762_v63 = vpop.f32.mrb[6].mxu0  ;;  %v786_v0 = vpop.f32.mrb[6].mxu1 }
 0x104   : > { %v785_v62 = vadd.f32 %v784_v58, %v783_v56  ;;  %v763_v1 = vpop.f32.mrb[7].mxu0  ;;  %v787_v2 = vpop.f32.mrb[7].mxu1 }
 0x105   : > { %588 = vst.msk [vmem:[%s986_s4 + $0x4] sm:$0xf] %vm586_vm0, %v722_v59  ;;  %596 = vst.msk [vmem:[%s986_s4 + $0x24] sm:$0xf] %vm586_vm0, %v730_v60  ;;  %v452_v3 = vadd.f32 %v761_v61, %v976_v34  ;;  %v764_v5 = vadd.f32 %v763_v1, %v762_v63  ;;  %v788_v6 = vadd.f32 %v787_v2, %v786_v0 }
 0x106   : > { %v484_v4 = vadd.f32 %v785_v62, %v976_v34 }
 0x107   : > { %v508_v7 = vmax.f32 %v452_v3, 0.0  ;;  %v455_v9 = vadd.f32 %v764_v5, %v976_v34  ;;  %v487_v10 = vadd.f32 %v788_v6, %v976_v34 }
 0x108   : > { %v516_v8 = vmax.f32 %v484_v4, 0.0 }
 0x109   : > { %v723_v11 = vpack.c.bf16 %v508_v7, %v508_v7  ;;  %v509_v13 = vmax.f32 %v455_v9, 0.0  ;;  %v517_v14 = vmax.f32 %v487_v10, 0.0  ;;  %v765_v15 = vpop.f32.mrb[8].mxu0  ;;  %v789_v16 = vpop.f32.mrb[8].mxu1 }
 0x10a   : > { %v731_v12 = vpack.c.bf16 %v516_v8, %v516_v8  ;;  %v766_v17 = vpop.f32.mrb[9].mxu0  ;;  %v790_v18 = vpop.f32.mrb[9].mxu1 }
 0x10b   : > { %589 = vst.msk [vmem:[%s986_s4 + $0x8] sm:$0xf] %vm586_vm0, %v723_v11  ;;  %v724_v19 = vpack.c.bf16 %v509_v13, %v509_v13  ;;  %v732_v20 = vpack.c.bf16 %v517_v14, %v517_v14  ;;  %v767_v21 = vadd.f32 %v766_v17, %v765_v15  ;;  %v791_v22 = vadd.f32 %v790_v18, %v789_v16  ;;  %v768_v23 = vpop.f32.mrb[10].mxu0  ;;  %v792_v24 = vpop.f32.mrb[10].mxu1 }
 0x10c   : > { %597 = vst.msk [vmem:[%s986_s4 + $0x28] sm:$0xf] %vm586_vm0, %v731_v12  ;;  %v769_v25 = vpop.f32.mrb[11].mxu0  ;;  %v793_v26 = vpop.f32.mrb[11].mxu1 }
 0x10d   : > { %590 = vst.msk [vmem:[%s986_s4 + $0xc] sm:$0xf] %vm586_vm0, %v724_v19  ;;  %598 = vst.msk [vmem:[%s986_s4 + $0x2c] sm:$0xf] %vm586_vm0, %v732_v20  ;;  %v460_v27 = vadd.f32 %v767_v21, %v976_v34  ;;  %v492_v28 = vadd.f32 %v791_v22, %v976_v34  ;;  %v770_v29 = vadd.f32 %v769_v25, %v768_v23 }
 0x10e   : > { %v794_v30 = vadd.f32 %v793_v26, %v792_v24 }
 0x10f   : > { %v510_v31 = vmax.f32 %v460_v27, 0.0  ;;  %v518_v32 = vmax.f32 %v492_v28, 0.0  ;;  %v463_v33 = vadd.f32 %v770_v29, %v976_v34 }
 0x110   : > { %v495_v35 = vadd.f32 %v794_v30, %v976_v34 }
 0x111   : > { %v725_v36 = vpack.c.bf16 %v510_v31, %v510_v31  ;;  %v733_v37 = vpack.c.bf16 %v518_v32, %v518_v32  ;;  %v511_v38 = vmax.f32 %v463_v33, 0.0  ;;  %v771_v40 = vpop.f32.mrb[12].mxu0  ;;  %v795_v41 = vpop.f32.mrb[12].mxu1 }
 0x112   : > { %v519_v39 = vmax.f32 %v495_v35, 0.0  ;;  %v772_v42 = vpop.f32.mrb[13].mxu0  ;;  %v796_v43 = vpop.f32.mrb[13].mxu1 }
 0x113   : > { %591 = vst.msk [vmem:[%s986_s4 + $0x10] sm:$0xf] %vm586_vm0, %v725_v36  ;;  %599 = vst.msk [vmem:[%s986_s4 + $0x30] sm:$0xf] %vm586_vm0, %v733_v37  ;;  %v726_v44 = vpack.c.bf16 %v511_v38, %v511_v38  ;;  %v773_v46 = vadd.f32 %v772_v42, %v771_v40  ;;  %v797_v47 = vadd.f32 %v796_v43, %v795_v41  ;;  %v774_v48 = vpop.f32.mrb[14].mxu0  ;;  %v798_v49 = vpop.f32.mrb[14].mxu1 }
 0x114   : > { %v734_v45 = vpack.c.bf16 %v519_v39, %v519_v39  ;;  %v775_v50 = vpop.f32.mrb[15].mxu0  ;;  %v799_v51 = vpop.f32.mrb[15].mxu1 }
 0x115   : > { %592 = vst.msk [vmem:[%s986_s4 + $0x14] sm:$0xf] %vm586_vm0, %v726_v44  ;;  %v468_v52 = vadd.f32 %v773_v46, %v976_v34  ;;  %v500_v53 = vadd.f32 %v797_v47, %v976_v34  ;;  %v776_v54 = vadd.f32 %v775_v50, %v774_v48  ;;  %v800_v55 = vadd.f32 %v799_v51, %v798_v49 }
 0x116   : > { %600 = vst.msk [vmem:[%s986_s4 + $0x34] sm:$0xf] %vm586_vm0, %v734_v45 }
 0x117   : > { %v512_v56 = vmax.f32 %v468_v52, 0.0  ;;  %v520_v57 = vmax.f32 %v500_v53, 0.0  ;;  %v471_v58 = vadd.f32 %v776_v54, %v976_v34  ;;  %v503_v59 = vadd.f32 %v800_v55, %v976_v34 }
 0x119   : > { %v727_v60 = vpack.c.bf16 %v512_v56, %v512_v56  ;;  %v735_v61 = vpack.c.bf16 %v520_v57, %v520_v57  ;;  %v513_v62 = vmax.f32 %v471_v58, 0.0  ;;  %v521_v63 = vmax.f32 %v503_v59, 0.0 }
 0x11b   : > { %593 = vst.msk [vmem:[%s986_s4 + $0x18] sm:$0xf] %vm586_vm0, %v727_v60  ;;  %601 = vst.msk [vmem:[%s986_s4 + $0x38] sm:$0xf] %vm586_vm0, %v735_v61  ;;  %v728_v0 = vpack.c.bf16 %v513_v62, %v513_v62  ;;  %v736_v1 = vpack.c.bf16 %v521_v63, %v521_v63 }
 0x11d   : > { %594 = vst.msk [vmem:[%s986_s4 + $0x1c] sm:$0xf] %vm586_vm0, %v728_v0  ;;  %602 = vst.msk [vmem:[%s986_s4 + $0x3c] sm:$0xf] %vm586_vm0, %v736_v1 }
 0x11e PF: > { %s13_s12 = sadd.s32 1, %s871_s12  }
 0x11f   : > { %p10_p4 = scmp.ge.s32.totalorder %s13_s12, 9  }
 0x121   :  { %12 = sbr.rel (!%p10_p4) target bundleno = 1 (0x1), region = 62 }

// kernel: iam_base_cnn_forward.5
= control target key start
LH: loop header
LB: loop body
LE: loop exit
PB: predicated region body
PF: predicated region fallthrough
CT: control target
= control target key end

     0   :  { %s1334_s12 = smov 0   ;;  %s1542_s0 = inlined_call_operand.vmem [shape: bf16[256,512], index: 0, kind: input, shape index: {}]   ;;  %s1543_s1 = inlined_call_operand.vmem [shape: bf16[512,64], index: 1, kind: input, shape index: {}]   ;;  %s1544_s2 = inlined_call_operand.vmem [shape: f32[1,64], index: 2, kind: input, shape index: {}]   ;;  %s1545_s3 = inlined_call_operand.vmem [shape: bf16[256,64], index: 3, kind: output, shape index: {}]  }
   0x1 LB: > { %s980_s13 = sadd.s32 4294967295, %s1312_s12   ;;  %p984_p0 = scmp.ge.s32.totalorder %s1312_s12, 1  ;;  %s1312_s12 = sphi %s1334_s12, %s13_s12  }
   0x2   : > { %p139_p1 = scmp.lt.s32.totalorder %s1312_s12, 3 }
   0x4   : > { %p140_p2 = pnand %p984_p0, %p139_p1 }
   0x5   : > { %v1226_v0 = vld [vmem:[%s1543_s1 + $0x40] sm:$0xff] (!%p140_p2)   ;;  %v1230_v4 = vld [vmem:[%s1543_s1 + $0x48] sm:$0xff] (!%p140_p2)   ;;  %v1234_v8 = vld [vmem:[%s1543_s1 + $0x50] sm:$0xff] (!%p140_p2)   ;;  %s985_s21 = sshll.u32 (!%p140_p2), %s980_s13, 4  ;;  %vm907_vm0 = vcmask (!%p140_p2), 519168  }
   0x6   : > { %143 = sbr.rel (%p140_p2) target bundleno = 321 (0x141), region = 32  ;;  %v1227_v1 = vld [vmem:[%s1543_s1 + $0xc0] sm:$0xff] (!%p140_p2)   ;;  %1090 = vmatprep.subr.bf16.mxu0 (!%p140_p2), %v1226_v0  ;;  %v1231_v5 = vld [vmem:[%s1543_s1 + $0xc8] sm:$0xff] (!%p140_p2)   ;;  %v1235_v9 = vld [vmem:[%s1543_s1 + $0xd0] sm:$0xff] (!%p140_p2)   ;;  %p165_p3 = scmp.lt.s32.totalorder (!%p140_p2), %s985_s21, 31 }
   0x7   : > { %v1228_v2 = vld [vmem:[%s1543_s1] sm:$0xff] (!%p140_p2)   ;;  %1154 = vmatprep.subr.bf16.mxu1 (!%p140_p2), %v1227_v1  ;;  %v1232_v6 = vld [vmem:[%s1543_s1 + $0x8] sm:$0xff] (!%p140_p2)   ;;  %v1236_v10 = vld [vmem:[%s1543_s1 + $0x10] sm:$0xff] (!%p140_p2)  }
   0x8   : > { %v1229_v3 = vld [vmem:[%s1543_s1 + $0x80] sm:$0xff] (!%p140_p2)   ;;  %1091 = vmatpush3.bf16.msra.mxu0 (!%p140_p2), %v1228_v2  ;;  %v1233_v7 = vld [vmem:[%s1543_s1 + $0x88] sm:$0xff] (!%p140_p2)   ;;  %v1237_v11 = vld [vmem:[%s1543_s1 + $0x90] sm:$0xff] (!%p140_p2)  }
   0x9   : > { %1155 = vmatpush3.bf16.msra.mxu1 (!%p140_p2), %v1229_v3  ;;  %1092 = vmatprep.subr.bf16.mxu0 (!%p140_p2), %v1230_v4  ;;  %v1238_v12 = vld [vmem:[%s1543_s1 + $0x58] sm:$0xff] (!%p140_p2)   ;;  %v1242_v16 = vld [vmem:[%s1543_s1 + $0x60] sm:$0xff] (!%p140_p2)   ;;  %v1246_v20 = vld [vmem:[%s1543_s1 + $0x68] sm:$0xff] (!%p140_p2)  }
   0xa   : > { %1156 = vmatprep.subr.bf16.mxu1 (!%p140_p2), %v1231_v5  ;;  %v1239_v13 = vld [vmem:[%s1543_s1 + $0xd8] sm:$0xff] (!%p140_p2)   ;;  %v1243_v17 = vld [vmem:[%s1543_s1 + $0xe0] sm:$0xff] (!%p140_p2)   ;;  %v1247_v21 = vld [vmem:[%s1543_s1 + $0xe8] sm:$0xff] (!%p140_p2)  }
   0xb   : > { %v1240_v14 = vld [vmem:[%s1543_s1 + $0x18] sm:$0xff] (!%p140_p2)   ;;  %v1244_v18 = vld [vmem:[%s1543_s1 + $0x20] sm:$0xff] (!%p140_p2)   ;;  %v1248_v22 = vld [vmem:[%s1543_s1 + $0x28] sm:$0xff] (!%p140_p2)  }
   0xc   : > { %1093 = vmatpush3.bf16.msra.mxu0 (!%p140_p2), %v1232_v6  ;;  %v1241_v15 = vld [vmem:[%s1543_s1 + $0x98] sm:$0xff] (!%p140_p2)   ;;  %v1245_v19 = vld [vmem:[%s1543_s1 + $0xa0] sm:$0xff] (!%p140_p2)   ;;  %v1249_v23 = vld [vmem:[%s1543_s1 + $0xa8] sm:$0xff] (!%p140_p2)  }
   0xd   : > { %1157 = vmatpush3.bf16.msra.mxu1 %v1233_v7  ;;  %1094 = vmatprep.subr.bf16.mxu0 %v1234_v8  ;;  %s1547_s21 = smov (!%p165_p3, %s985_s21), 31  ;;  %v1250_v24 = vld [vmem:[%s1543_s1 + $0x70] sm:$0xff]   ;;  %v1254_v28 = vld [vmem:[%s1543_s1 + $0x78] sm:$0xff]   ;;  %v1483_v2 = vld [vmem:[%s1544_s2] ss:$0 sm:$0xff] }
   0xe   : > { %1158 = vmatprep.subr.bf16.mxu1 %v1235_v9  ;;  %v1251_v25 = vld [vmem:[%s1543_s1 + $0xf0] sm:$0xff]   ;;  %s1073_s18 = sshll.u32 %s1547_s21, 4  ;;  %v1255_v29 = vld [vmem:[%s1543_s1 + $0xf8] sm:$0xff]   ;;  %s989_s7 = sshll.u32 %s1547_s21, 2 }
   0xf   : > { %v1252_v26 = vld [vmem:[%s1543_s1 + $0x30] sm:$0xff]   ;;  %s1440_s28 = scalar_lea.vmem %s1542_s0, %s1073_s18  ;;  %v1256_v30 = vld [vmem:[%s1543_s1 + $0x38] sm:$0xff]   ;;  %s1491_s10 = scalar_lea.vmem %s1545_s3, %s989_s7 }
  0x10   : > { %1095 = vmatpush3.bf16.msra.mxu0 %v1236_v10  ;;  %v1253_v27 = vld [vmem:[%s1543_s1 + $0xb0] sm:$0xff]   ;;  %v1257_v31 = vld [vmem:[%s1543_s1 + $0xb8] sm:$0xff]  }
  0x11   : > { %1159 = vmatpush3.bf16.msra.mxu1 %v1237_v11  ;;  %1096 = vmatprep.subr.bf16.mxu0 %v1238_v12  ;;  %v1258_v32 = vld [vmem:[%s1440_s28] ss:$16 sps:$4 sm:$0xff]   ;;  %v1260_v33 = vld [vmem:[%s1440_s28 + $0x4] ss:$16 sps:$4 sm:$0xff]   ;;  %v1261_v34 = vld [vmem:[%s1440_s28 + $0x8] ss:$16 sps:$4 sm:$0xff]  }
  0x12   : > { %1160 = vmatprep.subr.bf16.mxu1 %v1239_v13  ;;  %v1263_v35 = vld [vmem:[%s1440_s28 + $0xc] ss:$16 sps:$4 sm:$0xff]   ;;  %665 = vmatprep.mubr.bf16.mxu0 %v1260_v33  ;;  %v1264_v36 = vld [vmem:[%s1440_s28 + $0x24] ss:$16 sps:$4 sm:$0xff]   ;;  %v1268_v38 = vld [vmem:[%s1440_s28 + $0x20] ss:$16 sps:$4 sm:$0xff]  }
  0x13   : > { %762 = vmatprep.mubr.bf16.mxu1 %v1263_v35  ;;  %v1266_v37 = vld [vmem:[%s1440_s28 + $0x2c] ss:$16 sps:$4 sm:$0xff]   ;;  %v1269_v39 = vld [vmem:[%s1440_s28 + $0x28] ss:$16 sps:$4 sm:$0xff]   ;;  %v1270_v40 = vld [vmem:[%s1440_s28 + $0x44] ss:$16 sps:$4 sm:$0xff]  }
  0x14   : > { %1097 = vmatpush3.bf16.msra.mxu0 %v1240_v14  ;;  %v1272_v41 = vld [vmem:[%s1440_s28 + $0x4c] ss:$16 sps:$4 sm:$0xff]   ;;  %v1274_v42 = vld [vmem:[%s1440_s28 + $0x40] ss:$16 sps:$4 sm:$0xff]   ;;  %v1275_v43 = vld [vmem:[%s1440_s28 + $0x48] ss:$16 sps:$4 sm:$0xff]  }
  0x15   : > { %1161 = vmatpush3.bf16.msra.mxu1 %v1241_v15  ;;  %1098 = vmatprep.subr.bf16.mxu0 %v1242_v16  ;;  %v1276_v44 = vld [vmem:[%s1440_s28 + $0x64] ss:$16 sps:$4 sm:$0xff]   ;;  %v1278_v45 = vld [vmem:[%s1440_s28 + $0x6c] ss:$16 sps:$4 sm:$0xff]   ;;  %v1280_v46 = vld [vmem:[%s1440_s28 + $0x60] ss:$16 sps:$4 sm:$0xff]  }
  0x16   : > { %1162 = vmatprep.subr.bf16.mxu1 %v1243_v17  ;;  %v1281_v47 = vld [vmem:[%s1440_s28 + $0x68] ss:$16 sps:$4 sm:$0xff]   ;;  %v1282_v48 = vld [vmem:[%s1440_s28 + $0x84] ss:$16 sps:$4 sm:$0xff]   ;;  %v1284_v49 = vld [vmem:[%s1440_s28 + $0x8c] ss:$16 sps:$4 sm:$0xff]  }
  0x17   : > { %v1286_v50 = vld [vmem:[%s1440_s28 + $0x80] ss:$16 sps:$4 sm:$0xff]   ;;  %v1287_v51 = vld [vmem:[%s1440_s28 + $0x88] ss:$16 sps:$4 sm:$0xff]   ;;  %v1288_v52 = vld [vmem:[%s1440_s28 + $0xa4] ss:$16 sps:$4 sm:$0xff]  }
  0x18   : > { %1099 = vmatpush3.bf16.msra.mxu0 %v1244_v18  ;;  %v1290_v53 = vld [vmem:[%s1440_s28 + $0xac] ss:$16 sps:$4 sm:$0xff]   ;;  %v1292_v54 = vld [vmem:[%s1440_s28 + $0xa0] ss:$16 sps:$4 sm:$0xff]   ;;  %v1293_v55 = vld [vmem:[%s1440_s28 + $0xa8] ss:$16 sps:$4 sm:$0xff]  }
  0x19   : > { %1163 = vmatpush3.bf16.msra.mxu1 %v1245_v19  ;;  %1100 = vmatprep.subr.bf16.mxu0 %v1246_v20  ;;  %v1294_v56 = vld [vmem:[%s1440_s28 + $0xc4] ss:$16 sps:$4 sm:$0xff]   ;;  %v1296_v57 = vld [vmem:[%s1440_s28 + $0xcc] ss:$16 sps:$4 sm:$0xff]   ;;  %v1298_v58 = vld [vmem:[%s1440_s28 + $0xc0] ss:$16 sps:$4 sm:$0xff]  }
  0x1a   : > { %1164 = vmatprep.subr.bf16.mxu1 %v1247_v21  ;;  %v1299_v59 = vld [vmem:[%s1440_s28 + $0xc8] ss:$16 sps:$4 sm:$0xff]   ;;  %v1300_v60 = vld [vmem:[%s1440_s28 + $0xe4] ss:$16 sps:$4 sm:$0xff]   ;;  %v1302_v61 = vld [vmem:[%s1440_s28 + $0xec] ss:$16 sps:$4 sm:$0xff]  }
  0x1b   : > { %v1304_v62 = vld [vmem:[%s1440_s28 + $0xe0] ss:$16 sps:$4 sm:$0xff]   ;;  %v1305_v63 = vld [vmem:[%s1440_s28 + $0xe8] ss:$16 sps:$4 sm:$0xff]  }
  0x1c   : > { %1101 = vmatpush3.bf16.msra.mxu0 %v1248_v22 }
  0x1d   : > { %1165 = vmatpush3.bf16.msra.mxu1 %v1249_v23  ;;  %1102 = vmatprep.subr.bf16.mxu0 %v1250_v24 }
  0x1e   : > { %1166 = vmatprep.subr.bf16.mxu1 %v1251_v25 }
  0x20   : > { %1103 = vmatpush3.bf16.msra.mxu0 %v1252_v26 }
  0x21   : > { %1167 = vmatpush3.bf16.msra.mxu1 %v1253_v27  ;;  %1104 = vmatprep.subr.bf16.mxu0 %v1254_v28 }
  0x22   : > { %1168 = vmatprep.subr.bf16.mxu1 %v1255_v29 }
  0x24   : > { %1105 = vmatpush3.bf16.msra.mxu0 %v1256_v30 }
  0x25   : > { %1169 = vmatpush3.bf16.msra.mxu1 %v1257_v31 }
  0x27   : > { %666 = vmatmul.mubr.bf16.vlgmr.msra.gmra.mrb[0].mxu0 %v1258_v32 }
  0x28   : > { %763 = vmatmul.mubr.bf16.vlgmr.msra.gmra.mrb[0].mxu1 %v1261_v34  ;;  %673 = vmatprep.mubr.bf16.mxu0 %v1264_v36 }
  0x29   : > { %770 = vmatprep.mubr.bf16.mxu1 %v1266_v37 }
  0x2f   : > { %674 = vmatmul.mubr.bf16.gmra.mrb[4].mxu0 %v1268_v38 }
  0x30   : > { %771 = vmatmul.mubr.bf16.gmra.mrb[4].mxu1 %v1269_v39  ;;  %681 = vmatprep.mubr.bf16.mxu0 %v1270_v40 }
  0x31   : > { %778 = vmatprep.mubr.bf16.mxu1 %v1272_v41 }
  0x37   : > { %682 = vmatmul.mubr.bf16.gmra.mrb[8].mxu0 %v1274_v42 }
  0x38   : > { %779 = vmatmul.mubr.bf16.gmra.mrb[8].mxu1 %v1275_v43  ;;  %689 = vmatprep.mubr.bf16.mxu0 %v1276_v44 }
  0x39   : > { %786 = vmatprep.mubr.bf16.mxu1 %v1278_v45 }
  0x3f   : > { %690 = vmatmul.mubr.bf16.gmra.mrb[12].mxu0 %v1280_v46 }
  0x40   : > { %787 = vmatmul.mubr.bf16.gmra.mrb[12].mxu1 %v1281_v47  ;;  %697 = vmatprep.mubr.bf16.mxu0 %v1282_v48 }
  0x41   : > { %794 = vmatprep.mubr.bf16.mxu1 %v1284_v49 }
  0x47   : > { %698 = vmatmul.mubr.bf16.gmra.mrb[16].mxu0 %v1286_v50 }
  0x48   : > { %795 = vmatmul.mubr.bf16.gmra.mrb[16].mxu1 %v1287_v51  ;;  %705 = vmatprep.mubr.bf16.mxu0 %v1288_v52 }
  0x49   : > { %802 = vmatprep.mubr.bf16.mxu1 %v1290_v53 }
  0x4f   : > { %706 = vmatmul.mubr.bf16.gmra.mrb[20].mxu0 %v1292_v54 }
  0x50   : > { %803 = vmatmul.mubr.bf16.gmra.mrb[20].mxu1 %v1293_v55  ;;  %713 = vmatprep.mubr.bf16.mxu0 %v1294_v56 }
  0x51   : > { %810 = vmatprep.mubr.bf16.mxu1 %v1296_v57 }
  0x57   : > { %714 = vmatmul.mubr.bf16.gmra.mrb[24].mxu0 %v1298_v58 }
  0x58   : > { %811 = vmatmul.mubr.bf16.gmra.mrb[24].mxu1 %v1299_v59  ;;  %721 = vmatprep.mubr.bf16.mxu0 %v1300_v60 }
  0x59   : > { %818 = vmatprep.mubr.bf16.mxu1 %v1302_v61 }
  0x5f   : > { %722 = vmatmul.mubr.bf16.gmra.mrb[28].mxu0 %v1304_v62 }
  0x60   : > { %819 = vmatmul.mubr.bf16.gmra.mrb[28].mxu1 %v1305_v63 }
  0xfa   : > { %v1106_v0 = vpop.f32.mrb[0].mxu0 }
  0xfb   : > { %v1170_v1 = vpop.f32.mrb[0].mxu1  ;;  %v1107_v3 = vpop.f32.mrb[1].mxu0 }
  0xfc   : > { %v1108_v4 = vadd.f32 %v1107_v3, %v1106_v0  ;;  %v1171_v5 = vpop.f32.mrb[1].mxu1  ;;  %v1109_v6 = vpop.f32.mrb[2].mxu0 }
  0xfd   : > { %v1172_v7 = vadd.f32 %v1171_v5, %v1170_v1  ;;  %v1173_v8 = vpop.f32.mrb[2].mxu1  ;;  %v1110_v9 = vpop.f32.mrb[3].mxu0 }
  0xfe   : > { %v668_v10 = vadd.f32 %v1108_v4, %v1483_v2  ;;  %v1111_v11 = vadd.f32 %v1110_v9, %v1109_v6  ;;  %v1174_v12 = vpop.f32.mrb[3].mxu1 }
  0xff   : > { %v1175_v13 = vadd.f32 %v1174_v12, %v1173_v8 }
 0x100   : > { %v765_v14 = vadd.f32 %v1172_v7, %v668_v10  ;;  %v671_v15 = vadd.f32 %v1111_v11, %v1483_v2 }
 0x102   : > { %v827_v16 = vmax.f32 %v765_v14, 0.0  ;;  %v768_v17 = vadd.f32 %v1175_v13, %v671_v15  ;;  %v1112_v18 = vpop.f32.mrb[4].mxu0 }
 0x103   : > { %v1176_v19 = vpop.f32.mrb[4].mxu1  ;;  %v1113_v20 = vpop.f32.mrb[5].mxu0 }
 0x104   : > { %v1074_v21 = vpack.c.bf16 %v827_v16, %v827_v16  ;;  %v828_v22 = vmax.f32 %v768_v17, 0.0  ;;  %v1114_v23 = vadd.f32 %v1113_v20, %v1112_v18  ;;  %v1177_v24 = vpop.f32.mrb[5].mxu1  ;;  %v1115_v25 = vpop.f32.mrb[6].mxu0 }
 0x105   : > { %v1178_v26 = vadd.f32 %v1177_v24, %v1176_v19  ;;  %v1179_v27 = vpop.f32.mrb[6].mxu1  ;;  %v1116_v28 = vpop.f32.mrb[7].mxu0 }
 0x106   : > { %908 = vst.msk [vmem:[%s1491_s10] sm:$0xf] %vm907_vm0, %v1074_v21  ;;  %v1075_v29 = vpack.c.bf16 %v828_v22, %v828_v22  ;;  %v676_v30 = vadd.f32 %v1114_v23, %v1483_v2  ;;  %v1117_v31 = vadd.f32 %v1116_v28, %v1115_v25  ;;  %v1180_v32 = vpop.f32.mrb[7].mxu1 }
 0x107   : > { %v1181_v33 = vadd.f32 %v1180_v32, %v1179_v27 }
 0x108   : > { %909 = vst.msk [vmem:[%s1491_s10 + $0x4] sm:$0xf] %vm907_vm0, %v1075_v29  ;;  %v773_v34 = vadd.f32 %v1178_v26, %v676_v30  ;;  %v679_v35 = vadd.f32 %v1117_v31, %v1483_v2 }
 0x10a   : > { %v829_v36 = vmax.f32 %v773_v34, 0.0  ;;  %v776_v37 = vadd.f32 %v1181_v33, %v679_v35  ;;  %v1118_v38 = vpop.f32.mrb[8].mxu0 }
 0x10b   : > { %v1182_v39 = vpop.f32.mrb[8].mxu1  ;;  %v1119_v40 = vpop.f32.mrb[9].mxu0 }
 0x10c   : > { %v1076_v41 = vpack.c.bf16 %v829_v36, %v829_v36  ;;  %v830_v42 = vmax.f32 %v776_v37, 0.0  ;;  %v1120_v43 = vadd.f32 %v1119_v40, %v1118_v38  ;;  %v1183_v44 = vpop.f32.mrb[9].mxu1  ;;  %v1121_v45 = vpop.f32.mrb[10].mxu0 }
 0x10d   : > { %v1184_v46 = vadd.f32 %v1183_v44, %v1182_v39  ;;  %v1185_v47 = vpop.f32.mrb[10].mxu1  ;;  %v1122_v48 = vpop.f32.mrb[11].mxu0 }
 0x10e   : > { %910 = vst.msk [vmem:[%s1491_s10 + $0x8] sm:$0xf] %vm907_vm0, %v1076_v41  ;;  %v1077_v49 = vpack.c.bf16 %v830_v42, %v830_v42  ;;  %v684_v50 = vadd.f32 %v1120_v43, %v1483_v2  ;;  %v1123_v51 = vadd.f32 %v1122_v48, %v1121_v45  ;;  %v1186_v52 = vpop.f32.mrb[11].mxu1 }
 0x10f   : > { %v1187_v53 = vadd.f32 %v1186_v52, %v1185_v47 }
 0x110   : > { %911 = vst.msk [vmem:[%s1491_s10 + $0xc] sm:$0xf] %vm907_vm0, %v1077_v49  ;;  %v781_v54 = vadd.f32 %v1184_v46, %v684_v50  ;;  %v687_v55 = vadd.f32 %v1123_v51, %v1483_v2 }
 0x112   : > { %v831_v56 = vmax.f32 %v781_v54, 0.0  ;;  %v784_v57 = vadd.f32 %v1187_v53, %v687_v55  ;;  %v1124_v58 = vpop.f32.mrb[12].mxu0 }
 0x113   : > { %v1188_v59 = vpop.f32.mrb[12].mxu1  ;;  %v1125_v60 = vpop.f32.mrb[13].mxu0 }
 0x114   : > { %v1078_v61 = vpack.c.bf16 %v831_v56, %v831_v56  ;;  %v832_v62 = vmax.f32 %v784_v57, 0.0  ;;  %v1126_v63 = vadd.f32 %v1125_v60, %v1124_v58  ;;  %v1189_v0 = vpop.f32.mrb[13].mxu1  ;;  %v1127_v1 = vpop.f32.mrb[14].mxu0 }
 0x115   : > { %v1190_v3 = vadd.f32 %v1189_v0, %v1188_v59  ;;  %v1191_v4 = vpop.f32.mrb[14].mxu1  ;;  %v1128_v5 = vpop.f32.mrb[15].mxu0 }
 0x116   : > { %912 = vst.msk [vmem:[%s1491_s10 + $0x10] sm:$0xf] %vm907_vm0, %v1078_v61  ;;  %v1079_v6 = vpack.c.bf16 %v832_v62, %v832_v62  ;;  %v692_v7 = vadd.f32 %v1126_v63, %v1483_v2  ;;  %v1129_v8 = vadd.f32 %v1128_v5, %v1127_v1  ;;  %v1192_v9 = vpop.f32.mrb[15].mxu1 }
 0x117   : > { %v1193_v10 = vadd.f32 %v1192_v9, %v1191_v4 }
 0x118   : > { %913 = vst.msk [vmem:[%s1491_s10 + $0x14] sm:$0xf] %vm907_vm0, %v1079_v6  ;;  %v789_v11 = vadd.f32 %v1190_v3, %v692_v7  ;;  %v695_v12 = vadd.f32 %v1129_v8, %v1483_v2 }
 0x11a   : > { %v833_v13 = vmax.f32 %v789_v11, 0.0  ;;  %v792_v14 = vadd.f32 %v1193_v10, %v695_v12  ;;  %v1130_v15 = vpop.f32.mrb[16].mxu0 }
 0x11b   : > { %v1194_v16 = vpop.f32.mrb[16].mxu1  ;;  %v1131_v17 = vpop.f32.mrb[17].mxu0 }
 0x11c   : > { %v1080_v18 = vpack.c.bf16 %v833_v13, %v833_v13  ;;  %v834_v19 = vmax.f32 %v792_v14, 0.0  ;;  %v1132_v20 = vadd.f32 %v1131_v17, %v1130_v15  ;;  %v1195_v21 = vpop.f32.mrb[17].mxu1  ;;  %v1133_v22 = vpop.f32.mrb[18].mxu0 }
 0x11d   : > { %v1196_v23 = vadd.f32 %v1195_v21, %v1194_v16  ;;  %v1197_v24 = vpop.f32.mrb[18].mxu1  ;;  %v1134_v25 = vpop.f32.mrb[19].mxu0 }
 0x11e   : > { %914 = vst.msk [vmem:[%s1491_s10 + $0x18] sm:$0xf] %vm907_vm0, %v1080_v18  ;;  %v1081_v26 = vpack.c.bf16 %v834_v19, %v834_v19  ;;  %v700_v27 = vadd.f32 %v1132_v20, %v1483_v2  ;;  %v1135_v28 = vadd.f32 %v1134_v25, %v1133_v22  ;;  %v1198_v29 = vpop.f32.mrb[19].mxu1 }
 0x11f   : > { %v1199_v30 = vadd.f32 %v1198_v29, %v1197_v24 }
 0x120   : > { %915 = vst.msk [vmem:[%s1491_s10 + $0x1c] sm:$0xf] %vm907_vm0, %v1081_v26  ;;  %v797_v31 = vadd.f32 %v1196_v23, %v700_v27  ;;  %v703_v32 = vadd.f32 %v1135_v28, %v1483_v2 }
 0x122   : > { %v835_v33 = vmax.f32 %v797_v31, 0.0  ;;  %v800_v34 = vadd.f32 %v1199_v30, %v703_v32  ;;  %v1136_v35 = vpop.f32.mrb[20].mxu0 }
 0x123   : > { %v1200_v36 = vpop.f32.mrb[20].mxu1  ;;  %v1137_v37 = vpop.f32.mrb[21].mxu0 }
 0x124   : > { %v1082_v38 = vpack.c.bf16 %v835_v33, %v835_v33  ;;  %v836_v39 = vmax.f32 %v800_v34, 0.0  ;;  %v1138_v40 = vadd.f32 %v1137_v37, %v1136_v35  ;;  %v1201_v41 = vpop.f32.mrb[21].mxu1  ;;  %v1139_v42 = vpop.f32.mrb[22].mxu0 }
 0x125   : > { %v1202_v43 = vadd.f32 %v1201_v41, %v1200_v36  ;;  %v1203_v44 = vpop.f32.mrb[22].mxu1  ;;  %v1140_v45 = vpop.f32.mrb[23].mxu0 }
 0x126   : > { %916 = vst.msk [vmem:[%s1491_s10 + $0x20] sm:$0xf] %vm907_vm0, %v1082_v38  ;;  %v1083_v46 = vpack.c.bf16 %v836_v39, %v836_v39  ;;  %v708_v47 = vadd.f32 %v1138_v40, %v1483_v2  ;;  %v1141_v48 = vadd.f32 %v1140_v45, %v1139_v42  ;;  %v1204_v49 = vpop.f32.mrb[23].mxu1 }
 0x127   : > { %v1205_v50 = vadd.f32 %v1204_v49, %v1203_v44 }
 0x128   : > { %917 = vst.msk [vmem:[%s1491_s10 + $0x24] sm:$0xf] %vm907_vm0, %v1083_v46  ;;  %v805_v51 = vadd.f32 %v1202_v43, %v708_v47  ;;  %v711_v52 = vadd.f32 %v1141_v48, %v1483_v2 }
 0x12a   : > { %v837_v53 = vmax.f32 %v805_v51, 0.0  ;;  %v808_v54 = vadd.f32 %v1205_v50, %v711_v52  ;;  %v1142_v55 = vpop.f32.mrb[24].mxu0 }
 0x12b   : > { %v1206_v56 = vpop.f32.mrb[24].mxu1  ;;  %v1143_v57 = vpop.f32.mrb[25].mxu0 }
 0x12c   : > { %v1084_v58 = vpack.c.bf16 %v837_v53, %v837_v53  ;;  %v838_v59 = vmax.f32 %v808_v54, 0.0  ;;  %v1144_v60 = vadd.f32 %v1143_v57, %v1142_v55  ;;  %v1207_v61 = vpop.f32.mrb[25].mxu1  ;;  %v1145_v62 = vpop.f32.mrb[26].mxu0 }
 0x12d   : > { %v1208_v63 = vadd.f32 %v1207_v61, %v1206_v56  ;;  %v1209_v0 = vpop.f32.mrb[26].mxu1  ;;  %v1146_v1 = vpop.f32.mrb[27].mxu0 }
 0x12e   : > { %918 = vst.msk [vmem:[%s1491_s10 + $0x28] sm:$0xf] %vm907_vm0, %v1084_v58  ;;  %v1085_v3 = vpack.c.bf16 %v838_v59, %v838_v59  ;;  %v716_v4 = vadd.f32 %v1144_v60, %v1483_v2  ;;  %v1147_v5 = vadd.f32 %v1146_v1, %v1145_v62  ;;  %v1210_v6 = vpop.f32.mrb[27].mxu1 }
 0x12f   : > { %v1211_v7 = vadd.f32 %v1210_v6, %v1209_v0 }
 0x130   : > { %919 = vst.msk [vmem:[%s1491_s10 + $0x2c] sm:$0xf] %vm907_vm0, %v1085_v3  ;;  %v813_v8 = vadd.f32 %v1208_v63, %v716_v4  ;;  %v719_v9 = vadd.f32 %v1147_v5, %v1483_v2 }
 0x132   : > { %v839_v10 = vmax.f32 %v813_v8, 0.0  ;;  %v816_v11 = vadd.f32 %v1211_v7, %v719_v9  ;;  %v1148_v12 = vpop.f32.mrb[28].mxu0 }
 0x133   : > { %v1212_v13 = vpop.f32.mrb[28].mxu1  ;;  %v1149_v14 = vpop.f32.mrb[29].mxu0 }
 0x134   : > { %v1086_v15 = vpack.c.bf16 %v839_v10, %v839_v10  ;;  %v840_v16 = vmax.f32 %v816_v11, 0.0  ;;  %v1150_v17 = vadd.f32 %v1149_v14, %v1148_v12  ;;  %v1213_v18 = vpop.f32.mrb[29].mxu1  ;;  %v1151_v19 = vpop.f32.mrb[30].mxu0 }
 0x135   : > { %v1214_v20 = vadd.f32 %v1213_v18, %v1212_v13  ;;  %v1215_v21 = vpop.f32.mrb[30].mxu1  ;;  %v1152_v22 = vpop.f32.mrb[31].mxu0 }
 0x136   : > { %920 = vst.msk [vmem:[%s1491_s10 + $0x30] sm:$0xf] %vm907_vm0, %v1086_v15  ;;  %v1087_v23 = vpack.c.bf16 %v840_v16, %v840_v16  ;;  %v724_v24 = vadd.f32 %v1150_v17, %v1483_v2  ;;  %v1153_v25 = vadd.f32 %v1152_v22, %v1151_v19  ;;  %v1216_v26 = vpop.f32.mrb[31].mxu1 }
 0x137   : > { %v1217_v27 = vadd.f32 %v1216_v26, %v1215_v21 }
 0x138   : > { %921 = vst.msk [vmem:[%s1491_s10 + $0x34] sm:$0xf] %vm907_vm0, %v1087_v23  ;;  %v821_v28 = vadd.f32 %v1214_v20, %v724_v24  ;;  %v727_v29 = vadd.f32 %v1153_v25, %v1483_v2 }
 0x13a   : > { %v841_v30 = vmax.f32 %v821_v28, 0.0  ;;  %v824_v31 = vadd.f32 %v1217_v27, %v727_v29 }
 0x13c   : > { %v1088_v32 = vpack.c.bf16 %v841_v30, %v841_v30  ;;  %v842_v33 = vmax.f32 %v824_v31, 0.0 }
 0x13e   : > { %922 = vst.msk [vmem:[%s1491_s10 + $0x38] sm:$0xf] %vm907_vm0, %v1088_v32  ;;  %v1089_v34 = vpack.c.bf16 %v842_v33, %v842_v33 }
 0x140   : > { %923 = vst.msk [vmem:[%s1491_s10 + $0x3c] sm:$0xf] %vm907_vm0, %v1089_v34 }
 0x141 PF: > { %s13_s12 = sadd.s32 1, %s1312_s12  }
 0x142   : > { %p10_p4 = scmp.ge.s32.totalorder %s13_s12, 4  }
 0x144   :  { %12 = sbr.rel (!%p10_p4) target bundleno = 1 (0x1), region = 62 }

// kernel: iam_base_cnn_forward.6
= control target key start
LH: loop header
LB: loop body
LE: loop exit
PB: predicated region body
PF: predicated region fallthrough
CT: control target
= control target key end

     0   :  { %vm558_vm0 = vcmask 523264   ;;  %vm954_vm1 = vcmask 519168   ;;  %s1730_s1 = inlined_call_operand.vmem [shape: bf16[576,64], index: 1, kind: input, shape index: {}]   ;;  %s1731_s0 = inlined_call_operand.vmem [shape: bf16[128,576], index: 0, kind: input, shape index: {}]   ;;  %s1732_s2 = inlined_call_operand.vmem [shape: f32[1,64], index: 2, kind: input, shape index: {}]   ;;  %s1733_s3 = inlined_call_operand.vmem [shape: bf16[128,64], index: 3, kind: output, shape index: {}]  }
   0x1   :  { %v1264_v0 = vld [vmem:[%s1730_s1 + $0x40] sm:$0xff]   ;;  %v1268_v4 = vld [vmem:[%s1730_s1 + $0x48] sm:$0xff]   ;;  %v1272_v8 = vld [vmem:[%s1730_s1 + $0x50] sm:$0xff]  }
   0x2   :  { %v1265_v1 = vld [vmem:[%s1730_s1 + $0xc0] sm:$0xff]   ;;  %1092 = vmatprep.subr.bf16.mxu0 %v1264_v0  ;;  %v1269_v5 = vld [vmem:[%s1730_s1 + $0xc8] sm:$0xff]   ;;  %v1273_v9 = vld [vmem:[%s1730_s1 + $0xd0] sm:$0xff]  }
   0x3   :  { %v1266_v2 = vld [vmem:[%s1730_s1] sm:$0xff]   ;;  %1156 = vmatprep.subr.bf16.mxu1 %v1265_v1  ;;  %v1270_v6 = vld [vmem:[%s1730_s1 + $0x8] sm:$0xff]   ;;  %v1274_v10 = vld [vmem:[%s1730_s1 + $0x10] sm:$0xff]  }
   0x4   :  { %v1267_v3 = vld [vmem:[%s1730_s1 + $0x80] sm:$0xff]   ;;  %1093 = vmatpush3.bf16.msra.mxu0 %v1266_v2  ;;  %v1271_v7 = vld [vmem:[%s1730_s1 + $0x88] sm:$0xff]   ;;  %v1275_v11 = vld [vmem:[%s1730_s1 + $0x90] sm:$0xff]  }
   0x5   :  { %1157 = vmatpush3.bf16.msra.mxu1 %v1267_v3  ;;  %1094 = vmatprep.subr.bf16.mxu0 %v1268_v4  ;;  %v1276_v12 = vld [vmem:[%s1730_s1 + $0x58] sm:$0xff]   ;;  %v1280_v16 = vld [vmem:[%s1730_s1 + $0x60] sm:$0xff]   ;;  %v1284_v20 = vld [vmem:[%s1730_s1 + $0x68] sm:$0xff]  }
   0x6   :  { %1158 = vmatprep.subr.bf16.mxu1 %v1269_v5  ;;  %v1277_v13 = vld [vmem:[%s1730_s1 + $0xd8] sm:$0xff]   ;;  %v1281_v17 = vld [vmem:[%s1730_s1 + $0xe0] sm:$0xff]   ;;  %v1285_v21 = vld [vmem:[%s1730_s1 + $0xe8] sm:$0xff]  }
   0x7   :  { %v1278_v14 = vld [vmem:[%s1730_s1 + $0x18] sm:$0xff]   ;;  %v1282_v18 = vld [vmem:[%s1730_s1 + $0x20] sm:$0xff]   ;;  %v1286_v22 = vld [vmem:[%s1730_s1 + $0x28] sm:$0xff]  }
   0x8   :  { %1095 = vmatpush3.bf16.msra.mxu0 %v1270_v6  ;;  %v1279_v15 = vld [vmem:[%s1730_s1 + $0x98] sm:$0xff]   ;;  %v1283_v19 = vld [vmem:[%s1730_s1 + $0xa0] sm:$0xff]   ;;  %v1287_v23 = vld [vmem:[%s1730_s1 + $0xa8] sm:$0xff]  }
   0x9   :  { %1159 = vmatpush3.bf16.msra.mxu1 %v1271_v7  ;;  %1096 = vmatprep.subr.bf16.mxu0 %v1272_v8  ;;  %v1288_v24 = vld [vmem:[%s1730_s1 + $0x70] sm:$0xff]   ;;  %v1292_v28 = vld [vmem:[%s1730_s1 + $0x78] sm:$0xff]   ;;  %v1301_v35 = vld [vmem:[%s1731_s0 + $0xc] ss:$20 sps:$4 sm:$0xff]  }
   0xa   :  { %1160 = vmatprep.subr.bf16.mxu1 %v1273_v9  ;;  %v1289_v25 = vld [vmem:[%s1730_s1 + $0xf0] sm:$0xff]   ;;  %v1293_v29 = vld [vmem:[%s1730_s1 + $0xf8] sm:$0xff]   ;;  %v1302_v36 = vld [vmem:[%s1730_s1 + $0x100] sm:$0xff]   ;;  %712 = vmatprep.mubr.bf16.mxu1 %v1301_v35 }
   0xb   :  { %v1290_v26 = vld [vmem:[%s1730_s1 + $0x30] sm:$0xff]   ;;  %v1294_v30 = vld [vmem:[%s1730_s1 + $0x38] sm:$0xff]   ;;  %v1303_v37 = vld [vmem:[%s1731_s0 + $0x2c] ss:$20 sps:$4 sm:$0xff]  }
   0xc   :  { %1097 = vmatpush3.bf16.msra.mxu0 %v1274_v10  ;;  %v1291_v27 = vld [vmem:[%s1730_s1 + $0xb0] sm:$0xff]   ;;  %v1295_v31 = vld [vmem:[%s1730_s1 + $0xb8] sm:$0xff]   ;;  %v1315_v42 = vld [vmem:[%s1730_s1 + $0x108] sm:$0xff]  }
   0xd   :  { %1161 = vmatpush3.bf16.msra.mxu1 %v1275_v11  ;;  %1098 = vmatprep.subr.bf16.mxu0 %v1276_v12  ;;  %v1296_v32 = vld [vmem:[%s1731_s0] ss:$20 sps:$4 sm:$0xff]   ;;  %v1298_v33 = vld [vmem:[%s1731_s0 + $0x4] ss:$20 sps:$4 sm:$0xff]   ;;  %v1299_v34 = vld [vmem:[%s1731_s0 + $0x8] ss:$20 sps:$4 sm:$0xff]  }
   0xe   :  { %1162 = vmatprep.subr.bf16.mxu1 %v1277_v13  ;;  %615 = vmatprep.mubr.bf16.mxu0 %v1298_v33  ;;  %v1305_v38 = vld [vmem:[%s1731_s0 + $0x34] ss:$20 sps:$4 sm:$0xff]   ;;  %v1308_v40 = vld [vmem:[%s1731_s0 + $0x30] ss:$20 sps:$4 sm:$0xff]   ;;  %v1314_v45 = vld [vmem:[%s1731_s0 + $0x58] ss:$20 sps:$4 sm:$0xff]  }
   0xf   :  { %v1307_v39 = vld [vmem:[%s1731_s0 + $0x28] ss:$20 sps:$4 sm:$0xff]   ;;  %v1313_v44 = vld [vmem:[%s1731_s0 + $0x50] ss:$20 sps:$4 sm:$0xff]   ;;  %v1320_v50 = vld [vmem:[%s1731_s0 + $0x78] ss:$20 sps:$4 sm:$0xff]  }
  0x10   :  { %1099 = vmatpush3.bf16.msra.mxu0 %v1278_v14  ;;  %v1309_v41 = vld [vmem:[%s1731_s0 + $0x54] ss:$20 sps:$4 sm:$0xff]   ;;  %v1311_v43 = vld [vmem:[%s1731_s0 + $0x5c] ss:$20 sps:$4 sm:$0xff]   ;;  %v1318_v48 = vld [vmem:[%s1731_s0 + $0x84] ss:$20 sps:$4 sm:$0xff]  }
  0x11   :  { %1163 = vmatpush3.bf16.msra.mxu1 %v1279_v15  ;;  %1100 = vmatprep.subr.bf16.mxu0 %v1280_v16  ;;  %v1328_v46 = vld [vmem:[%s1730_s1 + $0x110] sm:$0xff]   ;;  %v1341_v49 = vld [vmem:[%s1730_s1 + $0x118] sm:$0xff]   ;;  %v1324_v53 = vld [vmem:[%s1731_s0 + $0xac] ss:$20 sps:$4 sm:$0xff]  }
  0x12   :  { %1164 = vmatprep.subr.bf16.mxu1 %v1281_v17  ;;  %v1316_v47 = vld [vmem:[%s1731_s0 + $0x7c] ss:$20 sps:$4 sm:$0xff]   ;;  %v1321_v51 = vld [vmem:[%s1731_s0 + $0x80] ss:$20 sps:$4 sm:$0xff]   ;;  %v1322_v52 = vld [vmem:[%s1731_s0 + $0xa4] ss:$20 sps:$4 sm:$0xff]  }
  0x13   :  { %v1326_v54 = vld [vmem:[%s1731_s0 + $0xa0] ss:$20 sps:$4 sm:$0xff]   ;;  %v1327_v55 = vld [vmem:[%s1731_s0 + $0xa8] ss:$20 sps:$4 sm:$0xff]   ;;  %v1334_v59 = vld [vmem:[%s1731_s0 + $0xd0] ss:$20 sps:$4 sm:$0xff]  }
  0x14   :  { %1101 = vmatpush3.bf16.msra.mxu0 %v1282_v18  ;;  %v1329_v56 = vld [vmem:[%s1731_s0 + $0xcc] ss:$20 sps:$4 sm:$0xff]   ;;  %v1331_v57 = vld [vmem:[%s1731_s0 + $0xd4] ss:$20 sps:$4 sm:$0xff]   ;;  %v1337_v61 = vld [vmem:[%s1731_s0 + $0xfc] ss:$20 sps:$4 sm:$0xff]  }
  0x15   :  { %1165 = vmatpush3.bf16.msra.mxu1 %v1283_v19  ;;  %1102 = vmatprep.subr.bf16.mxu0 %v1284_v20  ;;  %v1333_v58 = vld [vmem:[%s1731_s0 + $0xc8] ss:$20 sps:$4 sm:$0xff]   ;;  %v1339_v62 = vld [vmem:[%s1731_s0 + $0xf0] ss:$20 sps:$4 sm:$0xff]   ;;  %v1340_v63 = vld [vmem:[%s1731_s0 + $0xf8] ss:$20 sps:$4 sm:$0xff]  }
  0x16   :  { %1166 = vmatprep.subr.bf16.mxu1 %v1285_v21  ;;  %v1335_v60 = vld [vmem:[%s1731_s0 + $0xf4] ss:$20 sps:$4 sm:$0xff]   ;;  %v1342_v0 = vld [vmem:[%s1731_s0 + $0x11c] ss:$20 sps:$4 sm:$0xff]   ;;  %v1344_v1 = vld [vmem:[%s1731_s0 + $0x124] ss:$20 sps:$4 sm:$0xff]  }
  0x17   :  { %v1346_v2 = vld [vmem:[%s1731_s0 + $0x118] ss:$20 sps:$4 sm:$0xff]   ;;  %v1347_v3 = vld [vmem:[%s1731_s0 + $0x120] ss:$20 sps:$4 sm:$0xff]   ;;  %v1348_v4 = vld [vmem:[%s1731_s0 + $0x10] ss:$20 sps:$4 sm:$0xff]  }
  0x18   :  { %1103 = vmatpush3.bf16.msra.mxu0 %v1286_v22  ;;  %v1349_v5 = vld [vmem:[%s1731_s0 + $0xb0] ss:$20 sps:$4 sm:$0xff]   ;;  %v1350_v6 = vld [vmem:[%s1731_s0 + $0x38] ss:$20 sps:$4 sm:$0xff]   ;;  %v1352_v8 = vld [vmem:[%s1731_s0 + $0x60] ss:$20 sps:$4 sm:$0xff]  }
  0x19   :  { %1167 = vmatpush3.bf16.msra.mxu1 %v1287_v23  ;;  %1104 = vmatprep.subr.bf16.mxu0 %v1288_v24  ;;  %v1351_v7 = vld [vmem:[%s1731_s0 + $0xd8] ss:$20 sps:$4 sm:$0xff]   ;;  %v1353_v9 = vld [vmem:[%s1731_s0 + $0x100] ss:$20 sps:$4 sm:$0xff]   ;;  %v1354_v10 = vld [vmem:[%s1731_s0 + $0x88] ss:$20 sps:$4 sm:$0xff]  }
  0x1a   :  { %1168 = vmatprep.subr.bf16.mxu1 %v1289_v25  ;;  %v1355_v11 = vld [vmem:[%s1731_s0 + $0x128] ss:$20 sps:$4 sm:$0xff]   ;;  %v1615_v14 = vld [vmem:[%s1732_s2] ss:$0 sm:$0xff] }
  0x1c   :  { %1105 = vmatpush3.bf16.msra.mxu0 %v1290_v26 }
  0x1d   :  { %1169 = vmatpush3.bf16.msra.mxu1 %v1291_v27  ;;  %1106 = vmatprep.subr.bf16.mxu0 %v1292_v28 }
  0x1e   :  { %1170 = vmatprep.subr.bf16.mxu1 %v1293_v29 }
  0x20   :  { %1107 = vmatpush3.bf16.msra.mxu0 %v1294_v30 }
  0x21   :  { %1171 = vmatpush3.bf16.msra.mxu1 %v1295_v31  ;;  %1232 = vmatprep.subr.bf16.mxu0 %v1302_v36 }
  0x22   :  { %1256 = vmatprep.subr.bf16.mxu1 %v1302_v36 }
  0x23   :  { %616 = vmatmul.mubr.bf16.vlgmr.msra.gmra.mrb[0].mxu0 %v1296_v32 }
  0x24   :  { %713 = vmatmul.mubr.bf16.vlgmr.msra.gmra.mrb[0].mxu1 %v1299_v34  ;;  %1233 = vmatpush3.bf16.msra.mxu0 %v1302_v36 }
  0x25   :  { %1260 = vmatpush3.bf16.msra.mxu1 %v1302_v36  ;;  %623 = vmatprep.mubr.bf16.mxu0 %v1303_v37 }
  0x26   :  { %720 = vmatprep.mubr.bf16.mxu1 %v1305_v38  ;;  %1234 = vmatprep.subr.bf16.mxu0 %v1315_v42 }
  0x27   :  { %1257 = vmatprep.subr.bf16.mxu1 %v1315_v42 }
  0x28   :  { %1235 = vmatpush3.bf16.msra.mxu0 %v1315_v42 }
  0x29   :  { %1261 = vmatpush3.bf16.msra.mxu1 %v1315_v42  ;;  %1236 = vmatprep.subr.bf16.mxu0 %v1328_v46 }
  0x2a   :  { %1258 = vmatprep.subr.bf16.mxu1 %v1328_v46 }
  0x2b   :  { %624 = vmatmul.mubr.bf16.gmra.mrb[4].mxu0 %v1307_v39 }
  0x2c   :  { %721 = vmatmul.mubr.bf16.gmra.mrb[4].mxu1 %v1308_v40  ;;  %631 = vmatprep.mubr.bf16.mxu0 %v1309_v41 }
  0x2d   :  { %728 = vmatprep.mubr.bf16.mxu1 %v1311_v43  ;;  %1237 = vmatpush3.bf16.msra.mxu0 %v1328_v46 }
  0x2e   :  { %1262 = vmatpush3.bf16.msra.mxu1 %v1328_v46  ;;  %1238 = vmatprep.subr.bf16.mxu0 %v1341_v49 }
  0x2f   :  { %1259 = vmatprep.subr.bf16.mxu1 %v1341_v49 }
  0x31   :  { %1239 = vmatpush3.bf16.msra.mxu0 %v1341_v49 }
  0x32   :  { %1263 = vmatpush3.bf16.msra.mxu1 %v1341_v49 }
  0x33   :  { %632 = vmatmul.mubr.bf16.gmra.mrb[8].mxu0 %v1313_v44 }
  0x34   :  { %729 = vmatmul.mubr.bf16.gmra.mrb[8].mxu1 %v1314_v45  ;;  %639 = vmatprep.mubr.bf16.mxu0 %v1316_v47 }
  0x35   :  { %736 = vmatprep.mubr.bf16.mxu1 %v1318_v48 }
  0x3b   :  { %640 = vmatmul.mubr.bf16.gmra.mrb[12].mxu0 %v1320_v50 }
  0x3c   :  { %737 = vmatmul.mubr.bf16.gmra.mrb[12].mxu1 %v1321_v51  ;;  %647 = vmatprep.mubr.bf16.mxu0 %v1322_v52 }
  0x3d   :  { %744 = vmatprep.mubr.bf16.mxu1 %v1324_v53 }
  0x43   :  { %648 = vmatmul.mubr.bf16.gmra.mrb[16].mxu0 %v1326_v54 }
  0x44   :  { %745 = vmatmul.mubr.bf16.gmra.mrb[16].mxu1 %v1327_v55  ;;  %655 = vmatprep.mubr.bf16.mxu0 %v1329_v56 }
  0x45   :  { %752 = vmatprep.mubr.bf16.mxu1 %v1331_v57 }
  0x4b   :  { %656 = vmatmul.mubr.bf16.gmra.mrb[20].mxu0 %v1333_v58 }
  0x4c   :  { %753 = vmatmul.mubr.bf16.gmra.mrb[20].mxu1 %v1334_v59  ;;  %663 = vmatprep.mubr.bf16.mxu0 %v1335_v60 }
  0x4d   :  { %760 = vmatprep.mubr.bf16.mxu1 %v1337_v61 }
  0x53   :  { %664 = vmatmul.mubr.bf16.gmra.mrb[24].mxu0 %v1339_v62 }
  0x54   :  { %761 = vmatmul.mubr.bf16.gmra.mrb[24].mxu1 %v1340_v63  ;;  %671 = vmatprep.mubr.bf16.mxu0 %v1342_v0 }
  0x55   :  { %768 = vmatprep.mubr.bf16.mxu1 %v1344_v1 }
  0x5b   :  { %672 = vmatmul.mubr.bf16.gmra.mrb[28].mxu0 %v1346_v2 }
  0x5c   :  { %769 = vmatmul.mubr.bf16.gmra.mrb[28].mxu1 %v1347_v3  ;;  %1240 = vmatprep.mubr.msk.bf16.mxu0 %vm558_vm0, %v1348_v4 }
  0x5d   :  { %1248 = vmatprep.mubr.msk.bf16.mxu1 %vm558_vm0, %v1349_v5 }
  0x63   :  { %1241 = vmatmul.mubr.msk.bf16.vlgmr.msra.gmra.mrb[32].mxu0 %vm558_vm0, %v1350_v6 }
  0x64   :  { %1249 = vmatmul.mubr.msk.bf16.vlgmr.msra.gmra.mrb[32].mxu1 %vm558_vm0, %v1351_v7  ;;  %1244 = vmatprep.mubr.msk.bf16.mxu0 %vm558_vm0, %v1352_v8 }
  0x65   :  { %1252 = vmatprep.mubr.msk.bf16.mxu1 %vm558_vm0, %v1353_v9 }
  0x6b   :  { %1245 = vmatmul.mubr.msk.bf16.gmra.mrb[36].mxu0 %vm558_vm0, %v1354_v10 }
  0x6c   :  { %1253 = vmatmul.mubr.msk.bf16.gmra.mrb[36].mxu1 %vm558_vm0, %v1355_v11 }
  0xf6   :  { %v1108_v12 = vpop.f32.mrb[0].mxu0 }
  0xf7   :  { %v1172_v13 = vpop.f32.mrb[0].mxu1  ;;  %v1109_v15 = vpop.f32.mrb[1].mxu0 }
  0xf8   :  { %v1110_v16 = vadd.f32 %v1109_v15, %v1108_v12  ;;  %v1173_v17 = vpop.f32.mrb[1].mxu1  ;;  %v1111_v18 = vpop.f32.mrb[2].mxu0 }
  0xf9   :  { %v1174_v19 = vadd.f32 %v1173_v17, %v1172_v13  ;;  %v1175_v20 = vpop.f32.mrb[2].mxu1  ;;  %v1112_v21 = vpop.f32.mrb[3].mxu0 }
  0xfa   :  { %v618_v22 = vadd.f32 %v1110_v16, %v1615_v14  ;;  %v1113_v23 = vadd.f32 %v1112_v21, %v1111_v18  ;;  %v1176_v24 = vpop.f32.mrb[3].mxu1 }
  0xfb   :  { %v1177_v25 = vadd.f32 %v1176_v24, %v1175_v20 }
  0xfc   :  { %v621_v26 = vadd.f32 %v1113_v23, %v1615_v14  ;;  %v1619_v27 = vadd.f32 %v1174_v19, %v618_v22 }
  0xfe   :  { %v1114_v28 = vpop.f32.mrb[4].mxu0  ;;  %v1621_v29 = vadd.f32 %v1177_v25, %v621_v26 }
  0xff   :  { %v1178_v30 = vpop.f32.mrb[4].mxu1  ;;  %v1115_v31 = vpop.f32.mrb[5].mxu0 }
 0x100   :  { %v1116_v32 = vadd.f32 %v1115_v31, %v1114_v28  ;;  %v1179_v33 = vpop.f32.mrb[5].mxu1  ;;  %v1117_v34 = vpop.f32.mrb[6].mxu0 }
 0x101   :  { %v1180_v35 = vadd.f32 %v1179_v33, %v1178_v30  ;;  %v1181_v36 = vpop.f32.mrb[6].mxu1  ;;  %v1118_v37 = vpop.f32.mrb[7].mxu0 }
 0x102   :  { %v626_v38 = vadd.f32 %v1116_v32, %v1615_v14  ;;  %v1119_v39 = vadd.f32 %v1118_v37, %v1117_v34  ;;  %v1182_v40 = vpop.f32.mrb[7].mxu1 }
 0x103   :  { %v1183_v41 = vadd.f32 %v1182_v40, %v1181_v36 }
 0x104   :  { %v629_v42 = vadd.f32 %v1119_v39, %v1615_v14  ;;  %v1625_v43 = vadd.f32 %v1180_v35, %v626_v38 }
 0x106   :  { %v1120_v44 = vpop.f32.mrb[8].mxu0  ;;  %v1627_v45 = vadd.f32 %v1183_v41, %v629_v42 }
 0x107   :  { %v1184_v46 = vpop.f32.mrb[8].mxu1  ;;  %v1121_v47 = vpop.f32.mrb[9].mxu0 }
 0x108   :  { %v1122_v48 = vadd.f32 %v1121_v47, %v1120_v44  ;;  %v1185_v49 = vpop.f32.mrb[9].mxu1  ;;  %v1123_v50 = vpop.f32.mrb[10].mxu0 }
 0x109   :  { %v1186_v51 = vadd.f32 %v1185_v49, %v1184_v46  ;;  %v1187_v52 = vpop.f32.mrb[10].mxu1  ;;  %v1124_v53 = vpop.f32.mrb[11].mxu0 }
 0x10a   :  { %v634_v54 = vadd.f32 %v1122_v48, %v1615_v14  ;;  %v1125_v55 = vadd.f32 %v1124_v53, %v1123_v50  ;;  %v1188_v56 = vpop.f32.mrb[11].mxu1 }
 0x10b   :  { %v1189_v57 = vadd.f32 %v1188_v56, %v1187_v52 }
 0x10c   :  { %v637_v58 = vadd.f32 %v1125_v55, %v1615_v14  ;;  %v1631_v59 = vadd.f32 %v1186_v51, %v634_v54 }
 0x10e   :  { %v1126_v60 = vpop.f32.mrb[12].mxu0  ;;  %v1633_v61 = vadd.f32 %v1189_v57, %v637_v58 }
 0x10f   :  { %v1190_v62 = vpop.f32.mrb[12].mxu1  ;;  %v1127_v63 = vpop.f32.mrb[13].mxu0 }
 0x110   :  { %v1128_v0 = vadd.f32 %v1127_v63, %v1126_v60  ;;  %v1191_v1 = vpop.f32.mrb[13].mxu1  ;;  %v1129_v2 = vpop.f32.mrb[14].mxu0 }
 0x111   :  { %v1192_v3 = vadd.f32 %v1191_v1, %v1190_v62  ;;  %v1193_v4 = vpop.f32.mrb[14].mxu1  ;;  %v1130_v5 = vpop.f32.mrb[15].mxu0 }
 0x112   :  { %v642_v6 = vadd.f32 %v1128_v0, %v1615_v14  ;;  %v1131_v7 = vadd.f32 %v1130_v5, %v1129_v2  ;;  %v1194_v8 = vpop.f32.mrb[15].mxu1 }
 0x113   :  { %v1195_v9 = vadd.f32 %v1194_v8, %v1193_v4 }
 0x114   :  { %v645_v10 = vadd.f32 %v1131_v7, %v1615_v14  ;;  %v1637_v11 = vadd.f32 %v1192_v3, %v642_v6 }
 0x116   :  { %v1132_v12 = vpop.f32.mrb[16].mxu0  ;;  %v1639_v13 = vadd.f32 %v1195_v9, %v645_v10 }
 0x117   :  { %v1196_v15 = vpop.f32.mrb[16].mxu1  ;;  %v1133_v16 = vpop.f32.mrb[17].mxu0 }
 0x118   :  { %v1134_v17 = vadd.f32 %v1133_v16, %v1132_v12  ;;  %v1197_v18 = vpop.f32.mrb[17].mxu1  ;;  %v1135_v19 = vpop.f32.mrb[18].mxu0 }
 0x119   :  { %v1198_v20 = vadd.f32 %v1197_v18, %v1196_v15  ;;  %v1199_v21 = vpop.f32.mrb[18].mxu1  ;;  %v1136_v22 = vpop.f32.mrb[19].mxu0 }
 0x11a   :  { %v650_v23 = vadd.f32 %v1134_v17, %v1615_v14  ;;  %v1137_v24 = vadd.f32 %v1136_v22, %v1135_v19  ;;  %v1200_v25 = vpop.f32.mrb[19].mxu1 }
 0x11b   :  { %v1201_v26 = vadd.f32 %v1200_v25, %v1199_v21 }
 0x11c   :  { %v653_v28 = vadd.f32 %v1137_v24, %v1615_v14  ;;  %v747_v30 = vadd.f32 %v1198_v20, %v650_v23 }
 0x11e   :  { %v1138_v31 = vpop.f32.mrb[20].mxu0  ;;  %v1643_v32 = vadd.f32 %v1201_v26, %v653_v28 }
 0x11f   :  { %v1202_v33 = vpop.f32.mrb[20].mxu1  ;;  %v1139_v34 = vpop.f32.mrb[21].mxu0 }
 0x120   :  { %v1140_v35 = vadd.f32 %v1139_v34, %v1138_v31  ;;  %v1203_v36 = vpop.f32.mrb[21].mxu1  ;;  %v1141_v37 = vpop.f32.mrb[22].mxu0 }
 0x121   :  { %v1204_v38 = vadd.f32 %v1203_v36, %v1202_v33  ;;  %v1205_v39 = vpop.f32.mrb[22].mxu1  ;;  %v1142_v40 = vpop.f32.mrb[23].mxu0 }
 0x122   :  { %v658_v41 = vadd.f32 %v1140_v35, %v1615_v14  ;;  %v1143_v42 = vadd.f32 %v1142_v40, %v1141_v37  ;;  %v1206_v44 = vpop.f32.mrb[23].mxu1 }
 0x123   :  { %v1207_v46 = vadd.f32 %v1206_v44, %v1205_v39 }
 0x124   :  { %v661_v47 = vadd.f32 %v1143_v42, %v1615_v14  ;;  %v755_v48 = vadd.f32 %v1204_v38, %v658_v41 }
 0x126   :  { %v1144_v49 = vpop.f32.mrb[24].mxu0  ;;  %v758_v50 = vadd.f32 %v1207_v46, %v661_v47 }
 0x127   :  { %v1208_v51 = vpop.f32.mrb[24].mxu1  ;;  %v1145_v52 = vpop.f32.mrb[25].mxu0 }
 0x128   :  { %v1146_v53 = vadd.f32 %v1145_v52, %v1144_v49  ;;  %v1209_v54 = vpop.f32.mrb[25].mxu1  ;;  %v1147_v55 = vpop.f32.mrb[26].mxu0 }
 0x129   :  { %v1210_v56 = vadd.f32 %v1209_v54, %v1208_v51  ;;  %v1211_v57 = vpop.f32.mrb[26].mxu1  ;;  %v1148_v58 = vpop.f32.mrb[27].mxu0 }
 0x12a   :  { %v666_v60 = vadd.f32 %v1146_v53, %v1615_v14  ;;  %v1149_v62 = vadd.f32 %v1148_v58, %v1147_v55  ;;  %v1212_v63 = vpop.f32.mrb[27].mxu1 }
 0x12b   :  { %v1213_v0 = vadd.f32 %v1212_v63, %v1211_v57 }
 0x12c   :  { %v669_v1 = vadd.f32 %v1149_v62, %v1615_v14  ;;  %v1649_v2 = vadd.f32 %v1210_v56, %v666_v60 }
 0x12e   :  { %v1150_v3 = vpop.f32.mrb[28].mxu0  ;;  %v1651_v4 = vadd.f32 %v1213_v0, %v669_v1 }
 0x12f   :  { %v1214_v5 = vpop.f32.mrb[28].mxu1  ;;  %v1151_v6 = vpop.f32.mrb[29].mxu0 }
 0x130   :  { %v1152_v7 = vadd.f32 %v1151_v6, %v1150_v3  ;;  %v1215_v8 = vpop.f32.mrb[29].mxu1  ;;  %v1153_v9 = vpop.f32.mrb[30].mxu0 }
 0x131   :  { %v1216_v10 = vadd.f32 %v1215_v8, %v1214_v5  ;;  %v1217_v12 = vpop.f32.mrb[30].mxu1  ;;  %v1154_v15 = vpop.f32.mrb[31].mxu0 }
 0x132   :  { %v674_v16 = vadd.f32 %v1152_v7, %v1615_v14  ;;  %v1155_v17 = vadd.f32 %v1154_v15, %v1153_v9  ;;  %v1218_v18 = vpop.f32.mrb[31].mxu1 }
 0x133   :  { %v1219_v19 = vadd.f32 %v1218_v18, %v1217_v12 }
 0x134   :  { %v677_v20 = vadd.f32 %v1155_v17, %v1615_v14  ;;  %v771_v21 = vadd.f32 %v1216_v10, %v674_v16 }
 0x136   :  { %v1242_v22 = vpop.f32.mrb[32].mxu0  ;;  %v774_v23 = vadd.f32 %v1219_v19, %v677_v20 }
 0x137   :  { %v820_v24 = vadd.f32 %v1242_v22, %v1625_v43  ;;  %v1250_v25 = vpop.f32.mrb[32].mxu1  ;;  %v811_v26 = vpop.f32.mrb[33].mxu0 }
 0x138   :  { %v852_v28 = vadd.f32 %v1250_v25, %v755_v48  ;;  %v812_v31 = vadd.f32 %v811_v26, %v1619_v27  ;;  %v843_v33 = vpop.f32.mrb[33].mxu1  ;;  %v1243_v34 = vpop.f32.mrb[34].mxu0 }
 0x139   :  { %v876_v35 = vmax.f32 %v820_v24, 0.0  ;;  %v844_v36 = vadd.f32 %v843_v33, %v747_v30  ;;  %v823_v37 = vadd.f32 %v1243_v34, %v1627_v45  ;;  %v1251_v38 = vpop.f32.mrb[34].mxu1  ;;  %v814_v39 = vpop.f32.mrb[35].mxu0 }
 0x13a   :  { %v884_v14 = vmax.f32 %v852_v28, 0.0  ;;  %v874_v40 = vmax.f32 %v812_v31, 0.0  ;;  %v855_v41 = vadd.f32 %v1251_v38, %v758_v50  ;;  %v815_v42 = vadd.f32 %v814_v39, %v1621_v29  ;;  %v846_v43 = vpop.f32.mrb[35].mxu1 }
 0x13b   :  { %v1078_v44 = vpack.c.bf16 %v876_v35, %v876_v35  ;;  %v882_v46 = vmax.f32 %v844_v36, 0.0  ;;  %v877_v47 = vmax.f32 %v823_v37, 0.0  ;;  %v847_v27 = vadd.f32 %v846_v43, %v1643_v32 }
 0x13c   :  { %v1086_v48 = vpack.c.bf16 %v884_v14, %v884_v14  ;;  %v1076_v49 = vpack.c.bf16 %v874_v40, %v874_v40  ;;  %v885_v51 = vmax.f32 %v855_v41, 0.0  ;;  %v875_v52 = vmax.f32 %v815_v42, 0.0 }
 0x13d   :  { %957 = vst.msk [vmem:[%s1733_s3 + $0x8] sm:$0xf] %vm954_vm1, %v1078_v44  ;;  %v1084_v45 = vpack.c.bf16 %v882_v46, %v882_v46  ;;  %v1079_v30 = vpack.c.bf16 %v877_v47, %v877_v47  ;;  %v883_v50 = vmax.f32 %v847_v27, 0.0 }
 0x13e   :  { %965 = vst.msk [vmem:[%s1733_s3 + $0x28] sm:$0xf] %vm954_vm1, %v1086_v48  ;;  %955 = vst.msk [vmem:[%s1733_s3] sm:$0xf] %vm954_vm1, %v1076_v49  ;;  %v1087_v29 = vpack.c.bf16 %v885_v51, %v885_v51  ;;  %v1077_v32 = vpack.c.bf16 %v875_v52, %v875_v52  ;;  %v1246_v53 = vpop.f32.mrb[36].mxu0 }
 0x13f   :  { %963 = vst.msk [vmem:[%s1733_s3 + $0x20] sm:$0xf] %vm954_vm1, %v1084_v45  ;;  %958 = vst.msk [vmem:[%s1733_s3 + $0xc] sm:$0xf] %vm954_vm1, %v1079_v30  ;;  %v1085_v54 = vpack.c.bf16 %v883_v50, %v883_v50  ;;  %v836_v55 = vadd.f32 %v1246_v53, %v1637_v11  ;;  %v1254_v56 = vpop.f32.mrb[36].mxu1  ;;  %v827_v57 = vpop.f32.mrb[37].mxu0 }
 0x140   :  { %966 = vst.msk [vmem:[%s1733_s3 + $0x2c] sm:$0xf] %vm954_vm1, %v1087_v29  ;;  %956 = vst.msk [vmem:[%s1733_s3 + $0x4] sm:$0xf] %vm954_vm1, %v1077_v32  ;;  %v868_v58 = vadd.f32 %v1254_v56, %v771_v21  ;;  %v828_v60 = vadd.f32 %v827_v57, %v1631_v59  ;;  %v859_v62 = vpop.f32.mrb[37].mxu1  ;;  %v1247_v63 = vpop.f32.mrb[38].mxu0 }
 0x141   :  { %964 = vst.msk [vmem:[%s1733_s3 + $0x24] sm:$0xf] %vm954_vm1, %v1085_v54  ;;  %v880_v11 = vmax.f32 %v836_v55, 0.0  ;;  %v860_v0 = vadd.f32 %v859_v62, %v1649_v2  ;;  %v839_v1 = vadd.f32 %v1247_v63, %v1639_v13  ;;  %v1255_v3 = vpop.f32.mrb[38].mxu1  ;;  %v830_v5 = vpop.f32.mrb[39].mxu0 }
 0x142   :  { %v888_v6 = vmax.f32 %v868_v58, 0.0  ;;  %v878_v7 = vmax.f32 %v828_v60, 0.0  ;;  %v871_v8 = vadd.f32 %v1255_v3, %v774_v23  ;;  %v831_v9 = vadd.f32 %v830_v5, %v1633_v61  ;;  %v862_v59 = vpop.f32.mrb[39].mxu1 }
 0x143   :  { %v1082_v10 = vpack.c.bf16 %v880_v11, %v880_v11  ;;  %v886_v12 = vmax.f32 %v860_v0, 0.0  ;;  %v881_v15 = vmax.f32 %v839_v1, 0.0  ;;  %v863_v16 = vadd.f32 %v862_v59, %v1651_v4 }
 0x144   :  { %v1090_v17 = vpack.c.bf16 %v888_v6, %v888_v6  ;;  %v1080_v18 = vpack.c.bf16 %v878_v7, %v878_v7  ;;  %v889_v19 = vmax.f32 %v871_v8, 0.0  ;;  %v879_v20 = vmax.f32 %v831_v9, 0.0 }
 0x145   :  { %961 = vst.msk [vmem:[%s1733_s3 + $0x18] sm:$0xf] %vm954_vm1, %v1082_v10  ;;  %v1088_v13 = vpack.c.bf16 %v886_v12, %v886_v12  ;;  %v1083_v2 = vpack.c.bf16 %v881_v15, %v881_v15  ;;  %v887_v21 = vmax.f32 %v863_v16, 0.0 }
 0x146   :  { %969 = vst.msk [vmem:[%s1733_s3 + $0x38] sm:$0xf] %vm954_vm1, %v1090_v17  ;;  %959 = vst.msk [vmem:[%s1733_s3 + $0x10] sm:$0xf] %vm954_vm1, %v1080_v18  ;;  %v1091_v61 = vpack.c.bf16 %v889_v19, %v889_v19  ;;  %v1081_v4 = vpack.c.bf16 %v879_v20, %v879_v20 }
 0x147   :  { %967 = vst.msk [vmem:[%s1733_s3 + $0x30] sm:$0xf] %vm954_vm1, %v1088_v13  ;;  %962 = vst.msk [vmem:[%s1733_s3 + $0x1c] sm:$0xf] %vm954_vm1, %v1083_v2  ;;  %v1089_v22 = vpack.c.bf16 %v887_v21, %v887_v21 }
 0x148   :  { %970 = vst.msk [vmem:[%s1733_s3 + $0x3c] sm:$0xf] %vm954_vm1, %v1091_v61  ;;  %960 = vst.msk [vmem:[%s1733_s3 + $0x14] sm:$0xf] %vm954_vm1, %v1081_v4 }
 0x149   :  { %968 = vst.msk [vmem:[%s1733_s3 + $0x34] sm:$0xf] %vm954_vm1, %v1089_v22 }

// kernel: iam_base_cnn_forward.7
= control target key start
LH: loop header
LB: loop body
LE: loop exit
PB: predicated region body
PF: predicated region fallthrough
CT: control target
= control target key end

     0   :  { %v7453_v22 = vmov 0   ;;  %vm4079_vm0 = vcmask 523264   ;;  %vm7455_vm1 = vmmov 0   ;;  %vm5570_vm2 = vcmask 785408   ;;  %s9667_s3 = inlined_call_operand.vmem [shape: bf16[3136,320], index: 3, kind: input, shape index: {}]   ;;  %s9668_s0 = inlined_call_operand.vmem [shape: bf16[8,3136], index: 0, kind: input, shape index: {}]   ;;  %s9669_s4 = inlined_call_operand.vmem [shape: f32[1,320], index: 4, kind: input, shape index: {}]   ;;  %s9670_s2 = inlined_call_operand.vmem [shape: f32[8,1], index: 2, kind: input, shape index: {}]   ;;  %s9671_s5 = inlined_call_operand.vmem [shape: bf16[192,320], index: 5, kind: input, shape index: {}]   ;;  %s9672_s1 = inlined_call_operand.vmem [shape: f32[8,64], index: 1, kind: input, shape index: {}]   ;;  %s9673_s6 = inlined_call_operand.vmem [shape: f32[1,320], index: 6, kind: input, shape index: {}]   ;;  %s9674_s7 = inlined_call_operand.vmem [shape: f32[1,96], index: 7, kind: input, shape index: {}]   ;;  %s9675_s8 = inlined_call_operand.<no memory space> [shape: f32[1,1], index: 8, kind: input, shape index: {}]   ;;  %s9676_s9 = inlined_call_operand.vmem [shape: f32[8,256], index: 9, kind: output, shape index: {}]  }
   0x1   :  { %v6579_v0 = vld [vmem:[%s9667_s3 + $0x4] ss:$12 sps:$4 sm:$0xff]   ;;  %v6583_v2 = vld [vmem:[%s9667_s3] ss:$12 sps:$4 sm:$0xff]   ;;  %v6585_v4 = vld [vmem:[%s9667_s3 + $0x1c] ss:$12 sps:$4 sm:$0xff]   ;;  %6578 = vset.pattern.permute.xlu0 %v7453_v22 }
   0x2   :  { %v6581_v1 = vld [vmem:[%s9667_s3 + $0x304] ss:$12 sps:$4 sm:$0xff]   ;;  %4083 = vmatprep.subr.bf16.mxu1 %v6579_v0  ;;  %v6584_v3 = vld [vmem:[%s9667_s3 + $0x300] ss:$12 sps:$4 sm:$0xff]   ;;  %v6587_v5 = vld [vmem:[%s9667_s3 + $0x31c] ss:$12 sps:$4 sm:$0xff]  }
   0x3   :  { %4165 = vmatprep.subr.bf16.mxu0 %v6581_v1  ;;  %4084 = vmatpush1.bf16.msra.mxu1 %v6583_v2  ;;  %v6589_v6 = vld [vmem:[%s9667_s3 + $0x18] ss:$12 sps:$4 sm:$0xff]   ;;  %v6591_v8 = vld [vmem:[%s9667_s3 + $0x34] ss:$12 sps:$4 sm:$0xff]   ;;  %v6595_v10 = vld [vmem:[%s9667_s3 + $0x30] ss:$12 sps:$4 sm:$0xff]  }
   0x4   :  { %4166 = vmatpush1.bf16.msra.mxu0 %v6584_v3  ;;  %4085 = vmatprep.subr.bf16.mxu1 %v6585_v4  ;;  %v6590_v7 = vld [vmem:[%s9667_s3 + $0x318] ss:$12 sps:$4 sm:$0xff]   ;;  %v6593_v9 = vld [vmem:[%s9667_s3 + $0x334] ss:$12 sps:$4 sm:$0xff]   ;;  %v6596_v11 = vld [vmem:[%s9667_s3 + $0x330] ss:$12 sps:$4 sm:$0xff]  }
   0x5   :  { %4167 = vmatprep.subr.bf16.mxu0 %v6587_v5  ;;  %v6597_v12 = vld [vmem:[%s9667_s3 + $0x4c] ss:$12 sps:$4 sm:$0xff]   ;;  %v6601_v14 = vld [vmem:[%s9667_s3 + $0x48] ss:$12 sps:$4 sm:$0xff]   ;;  %v6603_v16 = vld [vmem:[%s9667_s3 + $0x64] ss:$12 sps:$4 sm:$0xff]  }
   0x6   :  { %v6599_v13 = vld [vmem:[%s9667_s3 + $0x34c] ss:$12 sps:$4 sm:$0xff]   ;;  %v6602_v15 = vld [vmem:[%s9667_s3 + $0x348] ss:$12 sps:$4 sm:$0xff]   ;;  %v6605_v17 = vld [vmem:[%s9667_s3 + $0x364] ss:$12 sps:$4 sm:$0xff]  }
   0x7   :  { %4086 = vmatpush1.bf16.msra.mxu1 %v6589_v6  ;;  %v6607_v18 = vld [vmem:[%s9667_s3 + $0x60] ss:$12 sps:$4 sm:$0xff]   ;;  %v6609_v20 = vld [vmem:[%s9667_s3 + $0x7c] ss:$12 sps:$4 sm:$0xff]   ;;  %v6613_v23 = vld [vmem:[%s9667_s3 + $0x78] ss:$12 sps:$4 sm:$0xff]  }
   0x8   :  { %4168 = vmatpush1.bf16.msra.mxu0 %v6590_v7  ;;  %4087 = vmatprep.subr.bf16.mxu1 %v6591_v8  ;;  %v6608_v19 = vld [vmem:[%s9667_s3 + $0x360] ss:$12 sps:$4 sm:$0xff]   ;;  %v6611_v21 = vld [vmem:[%s9667_s3 + $0x37c] ss:$12 sps:$4 sm:$0xff]   ;;  %v6614_v24 = vld [vmem:[%s9667_s3 + $0x378] ss:$12 sps:$4 sm:$0xff]  }
   0x9   :  { %4169 = vmatprep.subr.bf16.mxu0 %v6593_v9  ;;  %v6615_v25 = vld [vmem:[%s9667_s3 + $0x94] ss:$12 sps:$4 sm:$0xff]   ;;  %v6619_v27 = vld [vmem:[%s9667_s3 + $0x90] ss:$12 sps:$4 sm:$0xff]   ;;  %v6621_v29 = vld [vmem:[%s9667_s3 + $0xac] ss:$12 sps:$4 sm:$0xff]  }
   0xa   :  { %v6617_v26 = vld [vmem:[%s9667_s3 + $0x394] ss:$12 sps:$4 sm:$0xff]   ;;  %v6620_v28 = vld [vmem:[%s9667_s3 + $0x390] ss:$12 sps:$4 sm:$0xff]   ;;  %v6623_v30 = vld [vmem:[%s9667_s3 + $0x3ac] ss:$12 sps:$4 sm:$0xff]  }
   0xb   :  { %4088 = vmatpush1.bf16.msra.mxu1 %v6595_v10  ;;  %v6625_v31 = vld [vmem:[%s9667_s3 + $0xa8] ss:$12 sps:$4 sm:$0xff]   ;;  %v6627_v33 = vld [vmem:[%s9667_s3 + $0xc4] ss:$12 sps:$4 sm:$0xff]   ;;  %v6631_v35 = vld [vmem:[%s9667_s3 + $0xc0] ss:$12 sps:$4 sm:$0xff]  }
   0xc   :  { %4170 = vmatpush1.bf16.msra.mxu0 %v6596_v11  ;;  %4089 = vmatprep.subr.bf16.mxu1 %v6597_v12  ;;  %v6626_v32 = vld [vmem:[%s9667_s3 + $0x3a8] ss:$12 sps:$4 sm:$0xff]   ;;  %v6629_v34 = vld [vmem:[%s9667_s3 + $0x3c4] ss:$12 sps:$4 sm:$0xff]   ;;  %v6632_v36 = vld [vmem:[%s9667_s3 + $0x3c0] ss:$12 sps:$4 sm:$0xff]  }
   0xd   :  { %4171 = vmatprep.subr.bf16.mxu0 %v6599_v13  ;;  %v6633_v37 = vld [vmem:[%s9667_s3 + $0xdc] ss:$12 sps:$4 sm:$0xff]   ;;  %v6637_v39 = vld [vmem:[%s9667_s3 + $0xd8] ss:$12 sps:$4 sm:$0xff]   ;;  %v6639_v41 = vld [vmem:[%s9667_s3 + $0xf4] ss:$12 sps:$4 sm:$0xff]  }
   0xe   :  { %v6635_v38 = vld [vmem:[%s9667_s3 + $0x3dc] ss:$12 sps:$4 sm:$0xff]   ;;  %v6638_v40 = vld [vmem:[%s9667_s3 + $0x3d8] ss:$12 sps:$4 sm:$0xff]   ;;  %v6641_v42 = vld [vmem:[%s9667_s3 + $0x3f4] ss:$12 sps:$4 sm:$0xff]  }
   0xf   :  { %4090 = vmatpush1.bf16.msra.mxu1 %v6601_v14  ;;  %v6643_v43 = vld [vmem:[%s9667_s3 + $0xf0] ss:$12 sps:$4 sm:$0xff]   ;;  %v6645_v45 = vld [vmem:[%s9667_s3 + $0x10c] ss:$12 sps:$4 sm:$0xff]   ;;  %v34_v47 = vld [vmem:[%s9668_s0] sm:$0xff]  ;;  %vm5560_vm3 = vcmask 261120  }
  0x10   :  { %4172 = vmatpush1.bf16.msra.mxu0 %v6602_v15  ;;  %4091 = vmatprep.subr.bf16.mxu1 %v6603_v16  ;;  %v6644_v44 = vld [vmem:[%s9667_s3 + $0x3f0] ss:$12 sps:$4 sm:$0xff]   ;;  %v6647_v46 = vld [vmem:[%s9667_s3 + $0x40c] ss:$12 sps:$4 sm:$0xff]   ;;  %v6649_v48 = vld [vmem:[%s9667_s3 + $0x108] ss:$12 sps:$4 sm:$0xff]   ;;  %v7654_v49 = vcombine.high %v34_v47, %v34_v47  ;;  %v7720_v7 = vcombine.low %v34_v47, %v34_v47 }
  0x11   :  { %4173 = vmatprep.subr.bf16.mxu0 %v6605_v17  ;;  %v6650_v50 = vld [vmem:[%s9667_s3 + $0x408] ss:$12 sps:$4 sm:$0xff]   ;;  %v6651_v52 = vld [vmem:[%s9667_s3 + $0x124] ss:$12 sps:$4 sm:$0xff]   ;;  %v6655_v55 = vld [vmem:[%s9667_s3 + $0x120] ss:$12 sps:$4 sm:$0xff]  }
  0x12   :  { %v36_v51 = vld [vmem:[%s9668_s0 + $0x10] sm:$0xff]  ;;  %4115 = vmatprep.mubr.bf16.mxu1 %v7654_v49  ;;  %v6656_v56 = vld [vmem:[%s9667_s3 + $0x420] ss:$12 sps:$4 sm:$0xff]   ;;  %v6657_v57 = vld [vmem:[%s9667_s3 + $0x13c] ss:$12 sps:$4 sm:$0xff]   ;;  %vm5583_vm4 = vcmask 269312  }
  0x13   :  { %4092 = vmatpush1.bf16.msra.mxu1 %v6607_v18  ;;  %v6653_v53 = vld [vmem:[%s9667_s3 + $0x424] ss:$12 sps:$4 sm:$0xff]   ;;  %v7668_v54 = vcombine.high %v36_v51, %v36_v51  ;;  %v6659_v58 = vld [vmem:[%s9667_s3 + $0x43c] ss:$12 sps:$4 sm:$0xff]   ;;  %v6663_v61 = vld [vmem:[%s9667_s3 + $0x154] ss:$12 sps:$4 sm:$0xff]   ;;  %v7722_v8 = vcombine.low %v36_v51, %v36_v51 }
  0x14   :  { %4174 = vmatpush1.bf16.msra.mxu0 %v6608_v19  ;;  %4093 = vmatprep.subr.bf16.mxu1 %v6609_v20  ;;  %v6661_v59 = vld [vmem:[%s9667_s3 + $0x138] ss:$12 sps:$4 sm:$0xff]   ;;  %v6665_v62 = vld [vmem:[%s9667_s3 + $0x454] ss:$12 sps:$4 sm:$0xff]   ;;  %v6667_v63 = vld [vmem:[%s9667_s3 + $0x150] ss:$12 sps:$4 sm:$0xff]  }
  0x15   :  { %4175 = vmatprep.subr.bf16.mxu0 %v6611_v21  ;;  %4197 = vmatprep.mubr.bf16.mxu0 %v7668_v54  ;;  %v6662_v60 = vld [vmem:[%s9667_s3 + $0x438] ss:$12 sps:$4 sm:$0xff]   ;;  %v6668_v0 = vld [vmem:[%s9667_s3 + $0x450] ss:$12 sps:$4 sm:$0xff]   ;;  %v6673_v3 = vld [vmem:[%s9667_s3 + $0x168] ss:$12 sps:$4 sm:$0xff]  }
  0x16   :  { %v6669_v1 = vld [vmem:[%s9667_s3 + $0x16c] ss:$12 sps:$4 sm:$0xff]   ;;  %v6674_v4 = vld [vmem:[%s9667_s3 + $0x468] ss:$12 sps:$4 sm:$0xff]   ;;  %v6679_v5 = vld [vmem:[%s9667_s3 + $0x184] ss:$12 sps:$4 sm:$0xff]  }
  0x17   :  { %4094 = vmatpush1.bf16.msra.mxu1 %v6613_v23  ;;  %v6671_v2 = vld [vmem:[%s9667_s3 + $0x46c] ss:$12 sps:$4 sm:$0xff]   ;;  %v6684_v6 = vld [vmem:[%s9667_s3 + $0x484] ss:$12 sps:$4 sm:$0xff]   ;;  %v6687_v11 = vld [vmem:[%s9667_s3 + $0x19c] ss:$12 sps:$4 sm:$0xff]  }
  0x18   :  { %4176 = vmatpush1.bf16.msra.mxu0 %v6614_v24  ;;  %4095 = vmatprep.subr.bf16.mxu1 %v6615_v25  ;;  %v6677_v9 = vld [vmem:[%s9667_s3 + $0x180] ss:$12 sps:$4 sm:$0xff]   ;;  %v6690_v12 = vld [vmem:[%s9667_s3 + $0x49c] ss:$12 sps:$4 sm:$0xff]   ;;  %v6685_v13 = vld [vmem:[%s9667_s3 + $0x198] ss:$12 sps:$4 sm:$0xff]  }
  0x19   :  { %4177 = vmatprep.subr.bf16.mxu0 %v6617_v26  ;;  %v6682_v10 = vld [vmem:[%s9667_s3 + $0x480] ss:$12 sps:$4 sm:$0xff]   ;;  %v6688_v14 = vld [vmem:[%s9667_s3 + $0x498] ss:$12 sps:$4 sm:$0xff]   ;;  %v6691_v17 = vld [vmem:[%s9667_s3 + $0x1b0] ss:$12 sps:$4 sm:$0xff]  }
  0x1a   :  { %v6693_v15 = vld [vmem:[%s9667_s3 + $0x1b4] ss:$12 sps:$4 sm:$0xff]   ;;  %v6694_v18 = vld [vmem:[%s9667_s3 + $0x4b0] ss:$12 sps:$4 sm:$0xff]   ;;  %v6699_v19 = vld [vmem:[%s9667_s3 + $0x1cc] ss:$12 sps:$4 sm:$0xff]  }
  0x1b   :  { %4096 = vmatpush1.bf16.msra.mxu1 %v6619_v27  ;;  %v6696_v16 = vld [vmem:[%s9667_s3 + $0x4b4] ss:$12 sps:$4 sm:$0xff]   ;;  %v6702_v20 = vld [vmem:[%s9667_s3 + $0x4cc] ss:$12 sps:$4 sm:$0xff]   ;;  %v6705_v24 = vld [vmem:[%s9667_s3 + $0x1e4] ss:$12 sps:$4 sm:$0xff]  }
  0x1c   :  { %4178 = vmatpush1.bf16.msra.mxu0 %v6620_v28  ;;  %4097 = vmatprep.subr.bf16.mxu1 %v6621_v29  ;;  %v6697_v21 = vld [vmem:[%s9667_s3 + $0x1c8] ss:$12 sps:$4 sm:$0xff]   ;;  %v6708_v25 = vld [vmem:[%s9667_s3 + $0x4e4] ss:$12 sps:$4 sm:$0xff]   ;;  %v6703_v26 = vld [vmem:[%s9667_s3 + $0x1e0] ss:$12 sps:$4 sm:$0xff]  }
  0x1d   :  { %4179 = vmatprep.subr.bf16.mxu0 %v6623_v30  ;;  %v6700_v23 = vld [vmem:[%s9667_s3 + $0x4c8] ss:$12 sps:$4 sm:$0xff]   ;;  %v6706_v27 = vld [vmem:[%s9667_s3 + $0x4e0] ss:$12 sps:$4 sm:$0xff]   ;;  %v6709_v30 = vld [vmem:[%s9667_s3 + $0x1f8] ss:$12 sps:$4 sm:$0xff]  }
  0x1e   :  { %v6711_v28 = vld [vmem:[%s9667_s3 + $0x1fc] ss:$12 sps:$4 sm:$0xff]   ;;  %v6730_v47 = vld [vmem:[%s9667_s3 + $0x540] ss:$12 sps:$4 sm:$0xff]   ;;  %v6733_v51 = vld [vmem:[%s9667_s3 + $0x258] ss:$12 sps:$4 sm:$0xff]  }
  0x1f   :  { %4098 = vmatpush1.bf16.msra.mxu1 %v6625_v31  ;;  %v6714_v29 = vld [vmem:[%s9667_s3 + $0x4fc] ss:$12 sps:$4 sm:$0xff]   ;;  %v6712_v31 = vld [vmem:[%s9667_s3 + $0x4f8] ss:$12 sps:$4 sm:$0xff]  }
  0x20   :  { %4180 = vmatpush1.bf16.msra.mxu0 %v6626_v32  ;;  %4099 = vmatprep.subr.bf16.mxu1 %v6627_v33  ;;  %v6717_v32 = vld [vmem:[%s9667_s3 + $0x214] ss:$12 sps:$4 sm:$0xff]  }
  0x21   :  { %4181 = vmatprep.subr.bf16.mxu0 %v6629_v34  ;;  %v6720_v33 = vld [vmem:[%s9667_s3 + $0x514] ss:$12 sps:$4 sm:$0xff]   ;;  %v7801_v34 = vld [vmem:[%s9668_s0 + $0x8] sm:$0xff] }
  0x23   :  { %4100 = vmatpush1.bf16.msra.mxu1 %v6631_v35  ;;  %v7806_v35 = vld [vmem:[%s9668_s0 + $0x18] sm:$0xff] }
  0x24   :  { %4182 = vmatpush1.bf16.msra.mxu0 %v6632_v36  ;;  %4101 = vmatprep.subr.bf16.mxu1 %v6633_v37  ;;  %v6715_v36 = vld [vmem:[%s9667_s3 + $0x210] ss:$12 sps:$4 sm:$0xff]  }
  0x25   :  { %4183 = vmatprep.subr.bf16.mxu0 %v6635_v38  ;;  %v6718_v37 = vld [vmem:[%s9667_s3 + $0x510] ss:$12 sps:$4 sm:$0xff]   ;;  %v7816_v38 = vcombine.high %v7801_v34, %v7801_v34 }
  0x27   :  { %4102 = vmatpush1.bf16.msra.mxu1 %v6637_v39  ;;  %v7820_v39 = vcombine.high %v7806_v35, %v7806_v35 }
  0x28   :  { %4184 = vmatpush1.bf16.msra.mxu0 %v6638_v40  ;;  %4103 = vmatprep.subr.bf16.mxu1 %v6639_v41  ;;  %v6723_v40 = vld [vmem:[%s9667_s3 + $0x22c] ss:$12 sps:$4 sm:$0xff]  }
  0x29   :  { %4185 = vmatprep.subr.bf16.mxu0 %v6641_v42  ;;  %v6726_v41 = vld [vmem:[%s9667_s3 + $0x52c] ss:$12 sps:$4 sm:$0xff]   ;;  %v6721_v42 = vld [vmem:[%s9667_s3 + $0x228] ss:$12 sps:$4 sm:$0xff]  }
  0x2b   :  { %4104 = vmatpush1.bf16.msra.mxu1 %v6643_v43  ;;  %v6724_v43 = vld [vmem:[%s9667_s3 + $0x528] ss:$12 sps:$4 sm:$0xff]  }
  0x2c   :  { %4186 = vmatpush1.bf16.msra.mxu0 %v6644_v44  ;;  %4105 = vmatprep.subr.bf16.mxu1 %v6645_v45  ;;  %v6729_v44 = vld [vmem:[%s9667_s3 + $0x244] ss:$12 sps:$4 sm:$0xff]  }
  0x2d   :  { %4187 = vmatprep.subr.bf16.mxu0 %v6647_v46  ;;  %v6732_v45 = vld [vmem:[%s9667_s3 + $0x544] ss:$12 sps:$4 sm:$0xff]   ;;  %v6727_v46 = vld [vmem:[%s9667_s3 + $0x240] ss:$12 sps:$4 sm:$0xff]  }
  0x2f   :  { %4106 = vmatpush1.bf16.msra.mxu1 %v6649_v48  ;;  %v6735_v48 = vld [vmem:[%s9667_s3 + $0x25c] ss:$12 sps:$4 sm:$0xff]  }
  0x30   :  { %4188 = vmatpush1.bf16.msra.mxu0 %v6650_v50  ;;  %4107 = vmatprep.subr.bf16.mxu1 %v6651_v52  ;;  %v6738_v50 = vld [vmem:[%s9667_s3 + $0x55c] ss:$12 sps:$4 sm:$0xff]   ;;  %v6736_v52 = vld [vmem:[%s9667_s3 + $0x558] ss:$12 sps:$4 sm:$0xff]  }
  0x31   :  { %4189 = vmatprep.subr.bf16.mxu0 %v6653_v53  ;;  %v6741_v53 = vld [vmem:[%s9667_s3 + $0x274] ss:$12 sps:$4 sm:$0xff]  }
  0x33   :  { %4108 = vmatpush1.bf16.msra.mxu1 %v6655_v55  ;;  %v6744_v55 = vld [vmem:[%s9667_s3 + $0x574] ss:$12 sps:$4 sm:$0xff]  }
  0x34   :  { %4190 = vmatpush1.bf16.msra.mxu0 %v6656_v56  ;;  %4109 = vmatprep.subr.bf16.mxu1 %v6657_v57  ;;  %v6739_v56 = vld [vmem:[%s9667_s3 + $0x270] ss:$12 sps:$4 sm:$0xff]  }
  0x35   :  { %4191 = vmatprep.subr.bf16.mxu0 %v6659_v58  ;;  %v6742_v57 = vld [vmem:[%s9667_s3 + $0x570] ss:$12 sps:$4 sm:$0xff]   ;;  %v6747_v58 = vld [vmem:[%s9667_s3 + $0x28c] ss:$12 sps:$4 sm:$0xff]  }
  0x37   :  { %4110 = vmatpush1.bf16.msra.mxu1 %v6661_v59  ;;  %v6750_v59 = vld [vmem:[%s9667_s3 + $0x58c] ss:$12 sps:$4 sm:$0xff]  }
  0x38   :  { %4192 = vmatpush1.bf16.msra.mxu0 %v6662_v60  ;;  %4111 = vmatprep.subr.bf16.mxu1 %v6663_v61  ;;  %v6745_v60 = vld [vmem:[%s9667_s3 + $0x288] ss:$12 sps:$4 sm:$0xff]  }
  0x39   :  { %4193 = vmatprep.subr.bf16.mxu0 %v6665_v62  ;;  %v6748_v61 = vld [vmem:[%s9667_s3 + $0x588] ss:$12 sps:$4 sm:$0xff]   ;;  %v6753_v62 = vld [vmem:[%s9667_s3 + $0x2a4] ss:$12 sps:$4 sm:$0xff]  }
  0x3b   :  { %4112 = vmatpush1.bf16.msra.mxu1 %v6667_v63  ;;  %v6756_v63 = vld [vmem:[%s9667_s3 + $0x5a4] ss:$12 sps:$4 sm:$0xff]  }
  0x3c   :  { %4194 = vmatpush1.bf16.msra.mxu0 %v6668_v0  ;;  %4113 = vmatprep.subr.bf16.mxu1 %v6669_v1  ;;  %v6751_v0 = vld [vmem:[%s9667_s3 + $0x2a0] ss:$12 sps:$4 sm:$0xff]  }
  0x3d   :  { %4195 = vmatprep.subr.bf16.mxu0 %v6671_v2  ;;  %v6754_v1 = vld [vmem:[%s9667_s3 + $0x5a0] ss:$12 sps:$4 sm:$0xff]   ;;  %v6759_v2 = vld [vmem:[%s9667_s3 + $0x2bc] ss:$12 sps:$4 sm:$0xff]  }
  0x3f   :  { %4114 = vmatpush1.bf16.msra.mxu1 %v6673_v3  ;;  %v6762_v3 = vld [vmem:[%s9667_s3 + $0x5bc] ss:$12 sps:$4 sm:$0xff]  }
  0x40   :  { %4196 = vmatpush1.bf16.msra.mxu0 %v6674_v4  ;;  %4124 = vmatprep.subr.bf16.mxu1 %v6679_v5  ;;  %v6757_v4 = vld [vmem:[%s9667_s3 + $0x2b8] ss:$12 sps:$4 sm:$0xff]  }
  0x41   :  { %4206 = vmatprep.subr.bf16.mxu0 %v6684_v6  ;;  %v6760_v5 = vld [vmem:[%s9667_s3 + $0x5b8] ss:$12 sps:$4 sm:$0xff]   ;;  %v6765_v6 = vld [vmem:[%s9667_s3 + $0x2d4] ss:$12 sps:$4 sm:$0xff]  }
  0x42   :  { %4116 = vmatmul.mubr.bf16.vlgmr.msra.gmra.mrb[0].mxu1 %v7720_v7 }
  0x43   :  { %4198 = vmatmul.mubr.bf16.vlgmr.msra.gmra.mrb[0].mxu0 %v7722_v8  ;;  %4125 = vmatpush1.bf16.msra.mxu1 %v6677_v9  ;;  %v6768_v9 = vld [vmem:[%s9667_s3 + $0x5d4] ss:$12 sps:$4 sm:$0xff]  }
  0x44   :  { %4207 = vmatpush1.bf16.msra.mxu0 %v6682_v10  ;;  %4126 = vmatprep.subr.bf16.mxu1 %v6687_v11  ;;  %v6763_v10 = vld [vmem:[%s9667_s3 + $0x2d0] ss:$12 sps:$4 sm:$0xff]  }
  0x45   :  { %4208 = vmatprep.subr.bf16.mxu0 %v6690_v12  ;;  %4156 = vmatprep.mubr.bf16.mxu1 %v7816_v38  ;;  %v6766_v11 = vld [vmem:[%s9667_s3 + $0x5d0] ss:$12 sps:$4 sm:$0xff]   ;;  %v6771_v12 = vld [vmem:[%s9667_s3 + $0x2ec] ss:$12 sps:$4 sm:$0xff]  }
  0x46   :  { %4238 = vmatprep.mubr.bf16.mxu0 %v7820_v39 }
  0x47   :  { %4127 = vmatpush1.bf16.msra.mxu1 %v6685_v13  ;;  %v6774_v13 = vld [vmem:[%s9667_s3 + $0x5ec] ss:$12 sps:$4 sm:$0xff]  }
  0x48   :  { %4209 = vmatpush1.bf16.msra.mxu0 %v6688_v14  ;;  %4128 = vmatprep.subr.bf16.mxu1 %v6693_v15  ;;  %v6769_v14 = vld [vmem:[%s9667_s3 + $0x2e8] ss:$12 sps:$4 sm:$0xff]  }
  0x49   :  { %4210 = vmatprep.subr.bf16.mxu0 %v6696_v16  ;;  %v6772_v15 = vld [vmem:[%s9667_s3 + $0x5e8] ss:$12 sps:$4 sm:$0xff]   ;;  %v6781_v16 = vld [vmem:[%s9667_s3 + $0x604] ss:$12 sps:$4 sm:$0xff]  }
  0x4b   :  { %4129 = vmatpush1.bf16.msra.mxu1 %v6691_v17  ;;  %v6784_v17 = vld [vmem:[%s9667_s3 + $0x1204] ss:$12 sps:$4 sm:$0xff]  }
  0x4c   :  { %4211 = vmatpush1.bf16.msra.mxu0 %v6694_v18  ;;  %4130 = vmatprep.subr.bf16.mxu1 %v6699_v19  ;;  %v6779_v18 = vld [vmem:[%s9667_s3 + $0x600] ss:$12 sps:$4 sm:$0xff]   ;;  %v7943_v19 = vcombine.low %v7801_v34, %v7801_v34  ;;  %v6797_v34 = vld [vmem:[%s9667_s3 + $0x648] ss:$12 sps:$4 sm:$0xff]  }
  0x4d   :  { %4212 = vmatprep.subr.bf16.mxu0 %v6702_v20  ;;  %v7947_v20 = vcombine.low %v7806_v35, %v7806_v35  ;;  %v6800_v35 = vld [vmem:[%s9667_s3 + $0x1248] ss:$12 sps:$4 sm:$0xff]  }
  0x4f   :  { %4131 = vmatpush1.bf16.msra.mxu1 %v6697_v21  ;;  %v6782_v21 = vld [vmem:[%s9667_s3 + $0x1200] ss:$12 sps:$4 sm:$0xff]  }
  0x50   :  { %4213 = vmatpush1.bf16.msra.mxu0 %v6700_v23  ;;  %4132 = vmatprep.subr.bf16.mxu1 %v6705_v24  ;;  %v6787_v23 = vld [vmem:[%s9667_s3 + $0x61c] ss:$12 sps:$4 sm:$0xff]  }
  0x51   :  { %4214 = vmatprep.subr.bf16.mxu0 %v6708_v25  ;;  %v6790_v24 = vld [vmem:[%s9667_s3 + $0x121c] ss:$12 sps:$4 sm:$0xff]   ;;  %v6785_v25 = vld [vmem:[%s9667_s3 + $0x618] ss:$12 sps:$4 sm:$0xff]  }
  0x53   :  { %4133 = vmatpush1.bf16.msra.mxu1 %v6703_v26  ;;  %v6788_v26 = vld [vmem:[%s9667_s3 + $0x1218] ss:$12 sps:$4 sm:$0xff]  }
  0x54   :  { %4215 = vmatpush1.bf16.msra.mxu0 %v6706_v27  ;;  %4134 = vmatprep.subr.bf16.mxu1 %v6711_v28  ;;  %v6793_v27 = vld [vmem:[%s9667_s3 + $0x634] ss:$12 sps:$4 sm:$0xff]  }
  0x55   :  { %4216 = vmatprep.subr.bf16.mxu0 %v6714_v29  ;;  %v6796_v28 = vld [vmem:[%s9667_s3 + $0x1234] ss:$12 sps:$4 sm:$0xff]   ;;  %v6791_v29 = vld [vmem:[%s9667_s3 + $0x630] ss:$12 sps:$4 sm:$0xff]  }
  0x57   :  { %4135 = vmatpush1.bf16.msra.mxu1 %v6709_v30  ;;  %v6794_v30 = vld [vmem:[%s9667_s3 + $0x1230] ss:$12 sps:$4 sm:$0xff]  }
  0x58   :  { %4217 = vmatpush1.bf16.msra.mxu0 %v6712_v31  ;;  %4136 = vmatprep.subr.bf16.mxu1 %v6717_v32  ;;  %v6799_v31 = vld [vmem:[%s9667_s3 + $0x64c] ss:$12 sps:$4 sm:$0xff]  }
  0x59   :  { %4218 = vmatprep.subr.bf16.mxu0 %v6720_v33  ;;  %v6802_v32 = vld [vmem:[%s9667_s3 + $0x124c] ss:$12 sps:$4 sm:$0xff]   ;;  %v7988_v33 = vld [vmem:[%s9668_s0 + $0x20] sm:$0xff] }
  0x5b   :  { %4137 = vmatpush1.bf16.msra.mxu1 %v6715_v36  ;;  %v7998_v36 = vcombine.high %v7988_v33, %v7988_v33 }
  0x5c   :  { %4219 = vmatpush1.bf16.msra.mxu0 %v6718_v37  ;;  %4138 = vmatprep.subr.bf16.mxu1 %v6723_v40  ;;  %v6805_v37 = vld [vmem:[%s9667_s3 + $0x664] ss:$12 sps:$4 sm:$0xff]   ;;  %v6806_v40 = vld [vmem:[%s9667_s3 + $0xc8] ss:$12 sps:$4 sm:$0xff]  }
  0x5d   :  { %4220 = vmatprep.subr.bf16.mxu0 %v6726_v41  ;;  %v6803_v41 = vld [vmem:[%s9667_s3 + $0x660] ss:$12 sps:$4 sm:$0xff]  }
  0x5f   :  { %4139 = vmatpush1.bf16.msra.mxu1 %v6721_v42  ;;  %v6807_v42 = vld [vmem:[%s9668_s0 + $0x60] ss:$0 sps:$4 sm:$0xff]  }
  0x60   :  { %4221 = vmatpush1.bf16.msra.mxu0 %v6724_v43  ;;  %4140 = vmatprep.subr.bf16.mxu1 %v6729_v44  ;;  %v6808_v43 = vld [vmem:[%s9667_s3 + $0x8] ss:$12 sps:$4 sm:$0xff]  }
  0x61   :  { %4222 = vmatprep.subr.bf16.mxu0 %v6732_v45  ;;  %v6811_v44 = vld [vmem:[%s9667_s3 + $0x67c] ss:$12 sps:$4 sm:$0xff]   ;;  %v6812_v45 = vld [vmem:[%s9667_s3 + $0xe0] ss:$12 sps:$4 sm:$0xff]  }
  0x63   :  { %4141 = vmatpush1.bf16.msra.mxu1 %v6727_v46  ;;  %v6809_v46 = vld [vmem:[%s9667_s3 + $0x678] ss:$12 sps:$4 sm:$0xff]  }
  0x64   :  { %4223 = vmatpush1.bf16.msra.mxu0 %v6730_v47  ;;  %4142 = vmatprep.subr.bf16.mxu1 %v6735_v48  ;;  %v6813_v47 = vld [vmem:[%s9667_s3 + $0x20] ss:$12 sps:$4 sm:$0xff]  }
  0x65   :  { %4224 = vmatprep.subr.bf16.mxu0 %v6738_v50  ;;  %v6816_v48 = vld [vmem:[%s9667_s3 + $0x694] ss:$12 sps:$4 sm:$0xff]   ;;  %v6817_v50 = vld [vmem:[%s9667_s3 + $0xf8] ss:$12 sps:$4 sm:$0xff]  }
  0x67   :  { %4143 = vmatpush1.bf16.msra.mxu1 %v6733_v51  ;;  %v6814_v51 = vld [vmem:[%s9667_s3 + $0x690] ss:$12 sps:$4 sm:$0xff]  }
  0x68   :  { %4225 = vmatpush1.bf16.msra.mxu0 %v6736_v52  ;;  %4144 = vmatprep.subr.bf16.mxu1 %v6741_v53  ;;  %v6818_v52 = vld [vmem:[%s9667_s3 + $0x38] ss:$12 sps:$4 sm:$0xff]  }
  0x69   :  { %4226 = vmatprep.subr.bf16.mxu0 %v6744_v55  ;;  %v6821_v53 = vld [vmem:[%s9667_s3 + $0x6ac] ss:$12 sps:$4 sm:$0xff]   ;;  %v6819_v55 = vld [vmem:[%s9667_s3 + $0x6a8] ss:$12 sps:$4 sm:$0xff]  }
  0x6b   :  { %4145 = vmatpush1.bf16.msra.mxu1 %v6739_v56  ;;  %v6823_v56 = vld [vmem:[%s9667_s3 + $0x50] ss:$12 sps:$4 sm:$0xff]  }
  0x6c   :  { %4227 = vmatpush1.bf16.msra.mxu0 %v6742_v57  ;;  %4146 = vmatprep.subr.bf16.mxu1 %v6747_v58  ;;  %v6826_v57 = vld [vmem:[%s9667_s3 + $0x6c4] ss:$12 sps:$4 sm:$0xff]   ;;  %v6827_v58 = vld [vmem:[%s9667_s3 + $0x128] ss:$12 sps:$4 sm:$0xff]  }
  0x6d   :  { %4228 = vmatprep.subr.bf16.mxu0 %v6750_v59  ;;  %v6824_v59 = vld [vmem:[%s9667_s3 + $0x6c0] ss:$12 sps:$4 sm:$0xff]  }
  0x6f   :  { %4147 = vmatpush1.bf16.msra.mxu1 %v6745_v60  ;;  %v6828_v60 = vld [vmem:[%s9667_s3 + $0x68] ss:$12 sps:$4 sm:$0xff]  }
  0x70   :  { %4229 = vmatpush1.bf16.msra.mxu0 %v6748_v61  ;;  %4148 = vmatprep.subr.bf16.mxu1 %v6753_v62  ;;  %v6831_v61 = vld [vmem:[%s9667_s3 + $0x6dc] ss:$12 sps:$4 sm:$0xff]   ;;  %v6832_v62 = vld [vmem:[%s9667_s3 + $0x140] ss:$12 sps:$4 sm:$0xff]  }
  0x71   :  { %4230 = vmatprep.subr.bf16.mxu0 %v6756_v63  ;;  %v6829_v63 = vld [vmem:[%s9667_s3 + $0x6d8] ss:$12 sps:$4 sm:$0xff]  }
  0x73   :  { %4149 = vmatpush1.bf16.msra.mxu1 %v6751_v0  ;;  %v6833_v0 = vld [vmem:[%s9667_s3 + $0x80] ss:$12 sps:$4 sm:$0xff]  }
  0x74   :  { %4231 = vmatpush1.bf16.msra.mxu0 %v6754_v1  ;;  %4150 = vmatprep.subr.bf16.mxu1 %v6759_v2  ;;  %v6836_v1 = vld [vmem:[%s9667_s3 + $0x6f4] ss:$12 sps:$4 sm:$0xff]   ;;  %v6837_v2 = vld [vmem:[%s9667_s3 + $0x158] ss:$12 sps:$4 sm:$0xff]  }
  0x75   :  { %4232 = vmatprep.subr.bf16.mxu0 %v6762_v3  ;;  %v6834_v3 = vld [vmem:[%s9667_s3 + $0x6f0] ss:$12 sps:$4 sm:$0xff]  }
  0x77   :  { %4151 = vmatpush1.bf16.msra.mxu1 %v6757_v4  ;;  %v6838_v4 = vld [vmem:[%s9667_s3 + $0x98] ss:$12 sps:$4 sm:$0xff]  }
  0x78   :  { %4233 = vmatpush1.bf16.msra.mxu0 %v6760_v5  ;;  %4152 = vmatprep.subr.bf16.mxu1 %v6765_v6  ;;  %v6841_v5 = vld [vmem:[%s9667_s3 + $0x70c] ss:$12 sps:$4 sm:$0xff]   ;;  %v6842_v6 = vld [vmem:[%s9667_s3 + $0x170] ss:$12 sps:$4 sm:$0xff]  }
  0x79   :  { %4234 = vmatprep.subr.bf16.mxu0 %v6768_v9  ;;  %v6839_v9 = vld [vmem:[%s9667_s3 + $0x708] ss:$12 sps:$4 sm:$0xff]  }
  0x7b   :  { %4153 = vmatpush1.bf16.msra.mxu1 %v6763_v10  ;;  %v6843_v10 = vld [vmem:[%s9667_s3 + $0xb0] ss:$12 sps:$4 sm:$0xff]  }
  0x7c   :  { %4235 = vmatpush1.bf16.msra.mxu0 %v6766_v11  ;;  %4154 = vmatprep.subr.bf16.mxu1 %v6771_v12  ;;  %v6846_v11 = vld [vmem:[%s9667_s3 + $0x724] ss:$12 sps:$4 sm:$0xff]   ;;  %v6847_v12 = vld [vmem:[%s9667_s3 + $0x248] ss:$12 sps:$4 sm:$0xff]  }
  0x7d   :  { %4236 = vmatprep.subr.bf16.mxu0 %v6774_v13  ;;  %v6844_v13 = vld [vmem:[%s9667_s3 + $0x720] ss:$12 sps:$4 sm:$0xff]  }
  0x7f   :  { %4155 = vmatpush1.bf16.msra.mxu1 %v6769_v14  ;;  %v6848_v14 = vld [vmem:[%s9667_s3 + $0x188] ss:$12 sps:$4 sm:$0xff]  }
  0x80   :  { %4237 = vmatpush1.bf16.msra.mxu0 %v6772_v15  ;;  %4575 = vmatprep.subr.bf16.mxu1 %v6784_v17  ;;  %v6851_v15 = vld [vmem:[%s9667_s3 + $0x73c] ss:$12 sps:$4 sm:$0xff]   ;;  %v6849_v17 = vld [vmem:[%s9667_s3 + $0x738] ss:$12 sps:$4 sm:$0xff]  }
  0x81   :  { %4247 = vmatprep.subr.bf16.mxu0 %v6781_v16  ;;  %v6852_v16 = vld [vmem:[%s9667_s3 + $0x260] ss:$12 sps:$4 sm:$0xff]  }
  0x82   :  { %4157 = vmatmul.mubr.bf16.vlgmr.msra.gmra.mrb[0].mxu1 %v7943_v19 }
  0x83   :  { %4239 = vmatmul.mubr.bf16.vlgmr.msra.gmra.mrb[0].mxu0 %v7947_v20  ;;  %4576 = vmatpush1.bf16.msra.mxu1 %v6782_v21  ;;  %v6856_v21 = vld [vmem:[%s9667_s3 + $0x754] ss:$12 sps:$4 sm:$0xff]  }
  0x84   :  { %4248 = vmatpush1.bf16.msra.mxu0 %v6779_v18  ;;  %4577 = vmatprep.subr.bf16.mxu1 %v6790_v24  ;;  %v6853_v18 = vld [vmem:[%s9667_s3 + $0x1a0] ss:$12 sps:$4 sm:$0xff]   ;;  %v6858_v24 = vld [vmem:[%s9667_s3 + $0x1b8] ss:$12 sps:$4 sm:$0xff]  }
  0x85   :  { %4249 = vmatprep.subr.bf16.mxu0 %v6787_v23  ;;  %4607 = vmatprep.mubr.bf16.mxu1 %v7453_v22  ;;  %v6854_v23 = vld [vmem:[%s9667_s3 + $0x750] ss:$12 sps:$4 sm:$0xff]  }
  0x86   :  { %4279 = vmatprep.mubr.bf16.mxu0 %v7998_v36 }
  0x87   :  { %4578 = vmatpush1.bf16.msra.mxu1 %v6788_v26  ;;  %v6862_v26 = vld [vmem:[%s9667_s3 + $0x290] ss:$12 sps:$4 sm:$0xff]  }
  0x88   :  { %4250 = vmatpush1.bf16.msra.mxu0 %v6785_v25  ;;  %4579 = vmatprep.subr.bf16.mxu1 %v6796_v28  ;;  %v6861_v25 = vld [vmem:[%s9667_s3 + $0x76c] ss:$12 sps:$4 sm:$0xff]   ;;  %v6868_v28 = vld [vmem:[%s9667_s3 + $0x784] ss:$12 sps:$4 sm:$0xff]  }
  0x89   :  { %4251 = vmatprep.subr.bf16.mxu0 %v6793_v27  ;;  %v6863_v27 = vld [vmem:[%s9667_s3 + $0x1d0] ss:$12 sps:$4 sm:$0xff]  }
  0x8b   :  { %4580 = vmatpush1.bf16.msra.mxu1 %v6794_v30  ;;  %v6866_v30 = vld [vmem:[%s9667_s3 + $0x780] ss:$12 sps:$4 sm:$0xff]  }
  0x8c   :  { %4252 = vmatpush1.bf16.msra.mxu0 %v6791_v29  ;;  %4581 = vmatprep.subr.bf16.mxu1 %v6802_v32  ;;  %v6869_v29 = vld [vmem:[%s9667_s3 + $0x2a8] ss:$12 sps:$4 sm:$0xff]  }
  0x8d   :  { %4253 = vmatprep.subr.bf16.mxu0 %v6799_v31  ;;  %v8163_v31 = vcombine.low %v7988_v33, %v7988_v33  ;;  %v6870_v32 = vld [vmem:[%s9667_s3 + $0x1e8] ss:$12 sps:$4 sm:$0xff]   ;;  %v6874_v33 = vld [vmem:[%s9667_s3 + $0x2c0] ss:$12 sps:$4 sm:$0xff]  }
  0x8f   :  { %4582 = vmatpush1.bf16.msra.mxu1 %v6800_v35  ;;  %v6873_v35 = vld [vmem:[%s9667_s3 + $0x79c] ss:$12 sps:$4 sm:$0xff]  }
  0x90   :  { %4254 = vmatpush1.bf16.msra.mxu0 %v6797_v34  ;;  %6245 = vmatprep.subr.bf16.mxu1 %v6806_v40  ;;  %v8171_v34 = vld [vmem:[%s9668_s0 + $0x28] sm:$0xff]  ;;  %v6871_v40 = vld [vmem:[%s9667_s3 + $0x798] ss:$12 sps:$4 sm:$0xff]  }
  0x91   :  { %4255 = vmatprep.subr.bf16.mxu0 %v6805_v37  ;;  %v8181_v37 = vcombine.high %v8171_v34, %v8171_v34 }
  0x92   :  { %6204 = vmatmul.mubr.msk.bf16.vlgmr.msra.gmra.mrb[4].mxu1 %vm4079_vm0, %v6807_v42  ;;  %v6878_v42 = vld [vmem:[%s9667_s3 + $0x7b4] ss:$12 sps:$4 sm:$0xff]  }
  0x93   :  { %6246 = vmatpush3.bf16.msra.mxu1 %v6808_v43  ;;  %4648 = vmatprep.mubr.bf16.mxu1 %v7654_v49  ;;  %v6822_v49 = vld [vmem:[%s9667_s3 + $0x110] ss:$12 sps:$4 sm:$0xff]   ;;  %v6879_v43 = vld [vmem:[%s9667_s3 + $0x2d8] ss:$12 sps:$4 sm:$0xff]  }
  0x94   :  { %4256 = vmatpush1.bf16.msra.mxu0 %v6803_v41  ;;  %6247 = vmatprep.subr.bf16.mxu1 %v6812_v45  ;;  %v6875_v41 = vld [vmem:[%s9667_s3 + $0x200] ss:$12 sps:$4 sm:$0xff]   ;;  %v6880_v45 = vld [vmem:[%s9667_s3 + $0x218] ss:$12 sps:$4 sm:$0xff]  }
  0x95   :  { %4257 = vmatprep.subr.bf16.mxu0 %v6811_v44  ;;  %v6876_v44 = vld [vmem:[%s9667_s3 + $0x7b0] ss:$12 sps:$4 sm:$0xff]  }
  0x97   :  { %6248 = vmatpush3.bf16.msra.mxu1 %v6813_v47  ;;  %v6884_v47 = vld [vmem:[%s9667_s3 + $0x2f0] ss:$12 sps:$4 sm:$0xff]  }
  0x98   :  { %4258 = vmatpush1.bf16.msra.mxu0 %v6809_v46  ;;  %6249 = vmatprep.subr.bf16.mxu1 %v6817_v50  ;;  %v6883_v46 = vld [vmem:[%s9667_s3 + $0x7cc] ss:$12 sps:$4 sm:$0xff]   ;;  %v6885_v50 = vld [vmem:[%s9667_s3 + $0x230] ss:$12 sps:$4 sm:$0xff]  }
  0x99   :  { %4259 = vmatprep.subr.bf16.mxu0 %v6816_v48  ;;  %v6881_v48 = vld [vmem:[%s9667_s3 + $0x7c8] ss:$12 sps:$4 sm:$0xff]  }
  0x9b   :  { %6250 = vmatpush3.bf16.msra.mxu1 %v6818_v52  ;;  %v6889_v52 = vld [vmem:[%s9667_s3 + $0x3c8] ss:$12 sps:$4 sm:$0xff]  }
  0x9c   :  { %4260 = vmatpush1.bf16.msra.mxu0 %v6814_v51  ;;  %6251 = vmatprep.subr.bf16.mxu1 %v6822_v49  ;;  %v6888_v51 = vld [vmem:[%s9667_s3 + $0x7e4] ss:$12 sps:$4 sm:$0xff]   ;;  %v6890_v49 = vld [vmem:[%s9667_s3 + $0x308] ss:$12 sps:$4 sm:$0xff]  }
  0x9d   :  { %4261 = vmatprep.subr.bf16.mxu0 %v6821_v53  ;;  %v6886_v53 = vld [vmem:[%s9667_s3 + $0x7e0] ss:$12 sps:$4 sm:$0xff]  }
  0x9f   :  { %6252 = vmatpush3.bf16.msra.mxu1 %v6823_v56  ;;  %v6894_v56 = vld [vmem:[%s9667_s3 + $0x3e0] ss:$12 sps:$4 sm:$0xff]  }
  0xa0   :  { %4262 = vmatpush1.bf16.msra.mxu0 %v6819_v55  ;;  %6253 = vmatprep.subr.bf16.mxu1 %v6827_v58  ;;  %v6893_v55 = vld [vmem:[%s9667_s3 + $0x7fc] ss:$12 sps:$4 sm:$0xff]   ;;  %v6895_v58 = vld [vmem:[%s9667_s3 + $0x320] ss:$12 sps:$4 sm:$0xff]  }
  0xa1   :  { %4263 = vmatprep.subr.bf16.mxu0 %v6826_v57  ;;  %v6891_v57 = vld [vmem:[%s9667_s3 + $0x7f8] ss:$12 sps:$4 sm:$0xff]  }
  0xa3   :  { %6254 = vmatpush3.bf16.msra.mxu1 %v6828_v60  ;;  %v6899_v60 = vld [vmem:[%s9667_s3 + $0x3f8] ss:$12 sps:$4 sm:$0xff]  }
  0xa4   :  { %4264 = vmatpush1.bf16.msra.mxu0 %v6824_v59  ;;  %6255 = vmatprep.subr.bf16.mxu1 %v6832_v62  ;;  %v6898_v59 = vld [vmem:[%s9667_s3 + $0x814] ss:$12 sps:$4 sm:$0xff]   ;;  %v6903_v62 = vld [vmem:[%s9667_s3 + $0x82c] ss:$12 sps:$4 sm:$0xff]  }
  0xa5   :  { %4265 = vmatprep.subr.bf16.mxu0 %v6831_v61  ;;  %v6900_v61 = vld [vmem:[%s9667_s3 + $0x338] ss:$12 sps:$4 sm:$0xff]  }
  0xa7   :  { %6256 = vmatpush3.bf16.msra.mxu1 %v6833_v0  ;;  %v6905_v0 = vld [vmem:[%s9667_s3 + $0x350] ss:$12 sps:$4 sm:$0xff]  }
  0xa8   :  { %4266 = vmatpush1.bf16.msra.mxu0 %v6829_v63  ;;  %6257 = vmatprep.subr.bf16.mxu1 %v6837_v2  ;;  %v6901_v63 = vld [vmem:[%s9667_s3 + $0x828] ss:$12 sps:$4 sm:$0xff]  }
  0xa9   :  { %4267 = vmatprep.subr.bf16.mxu0 %v6836_v1  ;;  %v6908_v1 = vld [vmem:[%s9667_s3 + $0x844] ss:$12 sps:$4 sm:$0xff]   ;;  %v6909_v2 = vld [vmem:[%s9667_s3 + $0x428] ss:$12 sps:$4 sm:$0xff]  }
  0xab   :  { %6258 = vmatpush3.bf16.msra.mxu1 %v6838_v4  ;;  %v6910_v4 = vld [vmem:[%s9667_s3 + $0x368] ss:$12 sps:$4 sm:$0xff]  }
  0xac   :  { %4268 = vmatpush1.bf16.msra.mxu0 %v6834_v3  ;;  %6259 = vmatprep.subr.bf16.mxu1 %v6842_v6  ;;  %v6906_v3 = vld [vmem:[%s9667_s3 + $0x840] ss:$12 sps:$4 sm:$0xff]  }
  0xad   :  { %4269 = vmatprep.subr.bf16.mxu0 %v6841_v5  ;;  %v6913_v5 = vld [vmem:[%s9667_s3 + $0x85c] ss:$12 sps:$4 sm:$0xff]   ;;  %v6914_v6 = vld [vmem:[%s9667_s3 + $0x440] ss:$12 sps:$4 sm:$0xff]  }
  0xaf   :  { %6260 = vmatpush3.bf16.msra.mxu1 %v6843_v10  ;;  %v6915_v10 = vld [vmem:[%s9667_s3 + $0x380] ss:$12 sps:$4 sm:$0xff]  }
  0xb0   :  { %4270 = vmatpush1.bf16.msra.mxu0 %v6839_v9  ;;  %6267 = vmatprep.subr.bf16.mxu1 %v6847_v12  ;;  %v6911_v9 = vld [vmem:[%s9667_s3 + $0x858] ss:$12 sps:$4 sm:$0xff]  }
  0xb1   :  { %4271 = vmatprep.subr.bf16.mxu0 %v6846_v11  ;;  %v6918_v11 = vld [vmem:[%s9667_s3 + $0x874] ss:$12 sps:$4 sm:$0xff]   ;;  %v6919_v12 = vld [vmem:[%s9667_s3 + $0x458] ss:$12 sps:$4 sm:$0xff]  }
  0xb2   :  { %4649 = vmatmul.mubr.bf16.vlgmr.msra.gmra.mrb[8].mxu1 %v7720_v7  ;;  %v6857_v7 = vld [vmem:[%s9667_s3 + $0x278] ss:$12 sps:$4 sm:$0xff]  }
  0xb3   :  { %6268 = vmatpush3.bf16.msra.mxu1 %v6848_v14  ;;  %4688 = vmatprep.mubr.bf16.mxu1 %v7816_v38  ;;  %v6859_v38 = vld [vmem:[%s9667_s3 + $0x768] ss:$12 sps:$4 sm:$0xff]   ;;  %v6920_v14 = vld [vmem:[%s9667_s3 + $0x398] ss:$12 sps:$4 sm:$0xff]  }
  0xb4   :  { %4272 = vmatpush1.bf16.msra.mxu0 %v6844_v13  ;;  %6269 = vmatprep.subr.bf16.mxu1 %v6852_v16  ;;  %v6916_v13 = vld [vmem:[%s9667_s3 + $0x870] ss:$12 sps:$4 sm:$0xff]  }
  0xb5   :  { %4273 = vmatprep.subr.bf16.mxu0 %v6851_v15  ;;  %v6923_v15 = vld [vmem:[%s9667_s3 + $0x88c] ss:$12 sps:$4 sm:$0xff]   ;;  %v6924_v16 = vld [vmem:[%s9667_s3 + $0x470] ss:$12 sps:$4 sm:$0xff]  }
  0xb7   :  { %6270 = vmatpush3.bf16.msra.mxu1 %v6853_v18  ;;  %v6925_v18 = vld [vmem:[%s9667_s3 + $0x3b0] ss:$12 sps:$4 sm:$0xff]  }
  0xb8   :  { %4274 = vmatpush1.bf16.msra.mxu0 %v6849_v17  ;;  %6271 = vmatprep.subr.bf16.mxu1 %v6857_v7  ;;  %v6921_v17 = vld [vmem:[%s9667_s3 + $0x888] ss:$12 sps:$4 sm:$0xff]  }
  0xb9   :  { %4275 = vmatprep.subr.bf16.mxu0 %v6856_v21  ;;  %v6928_v21 = vld [vmem:[%s9667_s3 + $0x8a4] ss:$12 sps:$4 sm:$0xff]   ;;  %v6929_v7 = vld [vmem:[%s9667_s3 + $0x548] ss:$12 sps:$4 sm:$0xff]  }
  0xbb   :  { %6272 = vmatpush3.bf16.msra.mxu1 %v6858_v24  ;;  %v6930_v24 = vld [vmem:[%s9667_s3 + $0x488] ss:$12 sps:$4 sm:$0xff]  }
  0xbc   :  { %4276 = vmatpush1.bf16.msra.mxu0 %v6854_v23  ;;  %6273 = vmatprep.subr.bf16.mxu1 %v6862_v26  ;;  %v6926_v23 = vld [vmem:[%s9667_s3 + $0x8a0] ss:$12 sps:$4 sm:$0xff]  }
  0xbd   :  { %4277 = vmatprep.subr.bf16.mxu0 %v6861_v25  ;;  %v6933_v25 = vld [vmem:[%s9667_s3 + $0x8bc] ss:$12 sps:$4 sm:$0xff]   ;;  %v6934_v26 = vld [vmem:[%s9667_s3 + $0x560] ss:$12 sps:$4 sm:$0xff]  }
  0xbf   :  { %6274 = vmatpush3.bf16.msra.mxu1 %v6863_v27  ;;  %v6935_v27 = vld [vmem:[%s9667_s3 + $0x4a0] ss:$12 sps:$4 sm:$0xff]  }
  0xc0   :  { %4278 = vmatpush1.bf16.msra.mxu0 %v6859_v38  ;;  %6275 = vmatprep.subr.bf16.mxu1 %v6869_v29  ;;  %v6931_v38 = vld [vmem:[%s9667_s3 + $0x8b8] ss:$12 sps:$4 sm:$0xff]   ;;  %v6936_v29 = vld [vmem:[%s9667_s3 + $0x8d0] ss:$12 sps:$4 sm:$0xff]  }
  0xc1   :  { %4288 = vmatprep.subr.bf16.mxu0 %v6868_v28  ;;  %v6938_v28 = vld [vmem:[%s9667_s3 + $0x8d4] ss:$12 sps:$4 sm:$0xff]  }
  0xc3   :  { %4280 = vmatmul.mubr.bf16.vlgmr.msra.gmra.mrb[0].mxu0 %v8163_v31  ;;  %6276 = vmatpush3.bf16.msra.mxu1 %v6870_v32  ;;  %v6943_v32 = vld [vmem:[%s9667_s3 + $0x8ec] ss:$12 sps:$4 sm:$0xff]  }
  0xc4   :  { %4289 = vmatpush1.bf16.msra.mxu0 %v6866_v30  ;;  %6277 = vmatprep.subr.bf16.mxu1 %v6874_v33  ;;  %v6940_v30 = vld [vmem:[%s9667_s3 + $0x4b8] ss:$12 sps:$4 sm:$0xff]   ;;  %v6945_v33 = vld [vmem:[%s9667_s3 + $0x4d0] ss:$12 sps:$4 sm:$0xff]  }
  0xc5   :  { %4290 = vmatprep.subr.bf16.mxu0 %v6873_v35  ;;  %4320 = vmatprep.mubr.bf16.mxu0 %v8181_v37  ;;  %v6944_v35 = vld [vmem:[%s9667_s3 + $0x590] ss:$12 sps:$4 sm:$0xff]  }
  0xc7   :  { %6278 = vmatpush3.bf16.msra.mxu1 %v6875_v41  ;;  %v6951_v41 = vld [vmem:[%s9667_s3 + $0x5a8] ss:$12 sps:$4 sm:$0xff]  }
  0xc8   :  { %4291 = vmatpush1.bf16.msra.mxu0 %v6871_v40  ;;  %6279 = vmatprep.subr.bf16.mxu1 %v6879_v43  ;;  %v6950_v40 = vld [vmem:[%s9667_s3 + $0x904] ss:$12 sps:$4 sm:$0xff]   ;;  %v8374_v43 = vcombine.low %v8171_v34, %v8171_v34  ;;  %v6956_v34 = vld [vmem:[%s9667_s3 + $0x5c0] ss:$12 sps:$4 sm:$0xff]  }
  0xc9   :  { %4292 = vmatprep.subr.bf16.mxu0 %v6878_v42  ;;  %v6948_v42 = vld [vmem:[%s9667_s3 + $0x900] ss:$12 sps:$4 sm:$0xff]  }
  0xcb   :  { %6280 = vmatpush3.bf16.msra.mxu1 %v6880_v45  ;;  %v6952_v45 = vld [vmem:[%s9667_s3 + $0x4e8] ss:$12 sps:$4 sm:$0xff]  }
  0xcc   :  { %4293 = vmatpush1.bf16.msra.mxu0 %v6876_v44  ;;  %6281 = vmatprep.subr.bf16.mxu1 %v6884_v47  ;;  %v8379_v44 = vld [vmem:[%s9668_s0 + $0x30] sm:$0xff]  ;;  %v6953_v47 = vld [vmem:[%s9667_s3 + $0x918] ss:$12 sps:$4 sm:$0xff]  }
  0xcd   :  { %4294 = vmatprep.subr.bf16.mxu0 %v6883_v46  ;;  %v6955_v46 = vld [vmem:[%s9667_s3 + $0x91c] ss:$12 sps:$4 sm:$0xff]  }
  0xcf   :  { %6282 = vmatpush3.bf16.msra.mxu1 %v6885_v50  ;;  %v6957_v50 = vld [vmem:[%s9667_s3 + $0x500] ss:$12 sps:$4 sm:$0xff]  }
  0xd0   :  { %4295 = vmatpush1.bf16.msra.mxu0 %v6881_v48  ;;  %6289 = vmatprep.subr.bf16.mxu1 %v6889_v52  ;;  %v8395_v48 = vcombine.high %v8379_v44, %v8379_v44  ;;  %v6961_v52 = vld [vmem:[%s9667_s3 + $0x5d8] ss:$12 sps:$4 sm:$0xff]  }
  0xd1   :  { %4296 = vmatprep.subr.bf16.mxu0 %v6888_v51  ;;  %v6960_v51 = vld [vmem:[%s9667_s3 + $0x934] ss:$12 sps:$4 sm:$0xff]  }
  0xd2   :  { %4689 = vmatmul.mubr.bf16.vlgmr.msra.gmra.mrb[12].mxu1 %v7943_v19  ;;  %v6896_v19 = vld [vmem:[%s9667_s3 + $0x810] ss:$12 sps:$4 sm:$0xff]  }
  0xd3   :  { %6290 = vmatpush3.bf16.msra.mxu1 %v6890_v49  ;;  %4728 = vmatprep.mubr.bf16.mxu1 %v7668_v54  ;;  %v6904_v54 = vld [vmem:[%s9667_s3 + $0x410] ss:$12 sps:$4 sm:$0xff]   ;;  %v6962_v49 = vld [vmem:[%s9667_s3 + $0x518] ss:$12 sps:$4 sm:$0xff]  }
  0xd4   :  { %4297 = vmatpush1.bf16.msra.mxu0 %v6886_v53  ;;  %6291 = vmatprep.subr.bf16.mxu1 %v6894_v56  ;;  %v6958_v53 = vld [vmem:[%s9667_s3 + $0x930] ss:$12 sps:$4 sm:$0xff]  }
  0xd5   :  { %4298 = vmatprep.subr.bf16.mxu0 %v6893_v55  ;;  %v6965_v55 = vld [vmem:[%s9667_s3 + $0x94c] ss:$12 sps:$4 sm:$0xff]   ;;  %v6966_v56 = vld [vmem:[%s9667_s3 + $0x5f0] ss:$12 sps:$4 sm:$0xff]  }
  0xd7   :  { %6292 = vmatpush3.bf16.msra.mxu1 %v6895_v58  ;;  %v6967_v58 = vld [vmem:[%s9667_s3 + $0x530] ss:$12 sps:$4 sm:$0xff]  }
  0xd8   :  { %4299 = vmatpush1.bf16.msra.mxu0 %v6891_v57  ;;  %6293 = vmatprep.subr.bf16.mxu1 %v6899_v60  ;;  %v6963_v57 = vld [vmem:[%s9667_s3 + $0x948] ss:$12 sps:$4 sm:$0xff]  }
  0xd9   :  { %4300 = vmatprep.subr.bf16.mxu0 %v6898_v59  ;;  %v6970_v59 = vld [vmem:[%s9667_s3 + $0x964] ss:$12 sps:$4 sm:$0xff]   ;;  %v6971_v60 = vld [vmem:[%s9667_s3 + $0x6c8] ss:$12 sps:$4 sm:$0xff]  }
  0xdb   :  { %6294 = vmatpush3.bf16.msra.mxu1 %v6900_v61  ;;  %v6972_v61 = vld [vmem:[%s9667_s3 + $0x608] ss:$12 sps:$4 sm:$0xff]  }
  0xdc   :  { %4301 = vmatpush1.bf16.msra.mxu0 %v6896_v19  ;;  %6295 = vmatprep.subr.bf16.mxu1 %v6904_v54  ;;  %v6968_v19 = vld [vmem:[%s9667_s3 + $0x960] ss:$12 sps:$4 sm:$0xff]  }
  0xdd   :  { %4302 = vmatprep.subr.bf16.mxu0 %v6903_v62  ;;  %v6975_v62 = vld [vmem:[%s9667_s3 + $0x97c] ss:$12 sps:$4 sm:$0xff]   ;;  %v6976_v54 = vld [vmem:[%s9667_s3 + $0x6e0] ss:$12 sps:$4 sm:$0xff]  }
  0xdf   :  { %6296 = vmatpush3.bf16.msra.mxu1 %v6905_v0  ;;  %v6977_v0 = vld [vmem:[%s9667_s3 + $0x620] ss:$12 sps:$4 sm:$0xff]  }
  0xe0   :  { %4303 = vmatpush1.bf16.msra.mxu0 %v6901_v63  ;;  %6297 = vmatprep.subr.bf16.mxu1 %v6909_v2  ;;  %v6973_v63 = vld [vmem:[%s9667_s3 + $0x978] ss:$12 sps:$4 sm:$0xff]   ;;  %v6978_v2 = vld [vmem:[%s9667_s3 + $0x990] ss:$12 sps:$4 sm:$0xff]  }
  0xe1   :  { %4304 = vmatprep.subr.bf16.mxu0 %v6908_v1  ;;  %v6980_v1 = vld [vmem:[%s9667_s3 + $0x994] ss:$12 sps:$4 sm:$0xff]  }
  0xe3   :  { %6298 = vmatpush3.bf16.msra.mxu1 %v6910_v4  ;;  %v6985_v4 = vld [vmem:[%s9667_s3 + $0x9ac] ss:$12 sps:$4 sm:$0xff]  }
  0xe4   :  { %4305 = vmatpush1.bf16.msra.mxu0 %v6906_v3  ;;  %6299 = vmatprep.subr.bf16.mxu1 %v6914_v6  ;;  %v6982_v3 = vld [vmem:[%s9667_s3 + $0x638] ss:$12 sps:$4 sm:$0xff]   ;;  %v6987_v6 = vld [vmem:[%s9667_s3 + $0x650] ss:$12 sps:$4 sm:$0xff]  }
  0xe5   :  { %4306 = vmatprep.subr.bf16.mxu0 %v6913_v5  ;;  %v6986_v5 = vld [vmem:[%s9667_s3 + $0x710] ss:$12 sps:$4 sm:$0xff]  }
  0xe7   :  { %6300 = vmatpush3.bf16.msra.mxu1 %v6915_v10  ;;  %v6991_v10 = vld [vmem:[%s9667_s3 + $0x728] ss:$12 sps:$4 sm:$0xff]  }
  0xe8   :  { %4307 = vmatpush1.bf16.msra.mxu0 %v6911_v9  ;;  %6301 = vmatprep.subr.bf16.mxu1 %v6919_v12  ;;  %v6990_v9 = vld [vmem:[%s9667_s3 + $0x9c4] ss:$12 sps:$4 sm:$0xff]   ;;  %v6992_v12 = vld [vmem:[%s9667_s3 + $0x668] ss:$12 sps:$4 sm:$0xff]  }
  0xe9   :  { %4308 = vmatprep.subr.bf16.mxu0 %v6918_v11  ;;  %v6988_v11 = vld [vmem:[%s9667_s3 + $0x9c0] ss:$12 sps:$4 sm:$0xff]  }
  0xeb   :  { %6302 = vmatpush3.bf16.msra.mxu1 %v6920_v14  ;;  %v6996_v14 = vld [vmem:[%s9667_s3 + $0x740] ss:$12 sps:$4 sm:$0xff]  }
  0xec   :  { %4309 = vmatpush1.bf16.msra.mxu0 %v6916_v13  ;;  %6303 = vmatprep.subr.bf16.mxu1 %v6924_v16  ;;  %v6995_v13 = vld [vmem:[%s9667_s3 + $0x9dc] ss:$12 sps:$4 sm:$0xff]   ;;  %v6997_v16 = vld [vmem:[%s9667_s3 + $0x680] ss:$12 sps:$4 sm:$0xff]  }
  0xed   :  { %4310 = vmatprep.subr.bf16.mxu0 %v6923_v15  ;;  %v6993_v15 = vld [vmem:[%s9667_s3 + $0x9d8] ss:$12 sps:$4 sm:$0xff]  }
  0xef   :  { %6304 = vmatpush3.bf16.msra.mxu1 %v6925_v18  ;;  %v7001_v18 = vld [vmem:[%s9667_s3 + $0x758] ss:$12 sps:$4 sm:$0xff]  }
  0xf0   :  { %4311 = vmatpush1.bf16.msra.mxu0 %v6921_v17  ;;  %6311 = vmatprep.subr.bf16.mxu1 %v6929_v7  ;;  %v7000_v17 = vld [vmem:[%s9667_s3 + $0x9f4] ss:$12 sps:$4 sm:$0xff]   ;;  %v7002_v7 = vld [vmem:[%s9667_s3 + $0x698] ss:$12 sps:$4 sm:$0xff]  }
  0xf1   :  { %4312 = vmatprep.subr.bf16.mxu0 %v6928_v21  ;;  %v6998_v21 = vld [vmem:[%s9667_s3 + $0x9f0] ss:$12 sps:$4 sm:$0xff]  }
  0xf2   :  { %4729 = vmatmul.mubr.bf16.vlgmr.msra.gmra.mrb[16].mxu1 %v7722_v8  ;;  %v6939_v8 = vld [vmem:[%s9667_s3 + $0x578] ss:$12 sps:$4 sm:$0xff]  }
  0xf3   :  { %6312 = vmatpush3.bf16.msra.mxu1 %v6930_v24  ;;  %4768 = vmatprep.mubr.bf16.mxu1 %v7820_v39  ;;  %v6941_v39 = vld [vmem:[%s9667_s3 + $0x8e8] ss:$12 sps:$4 sm:$0xff]   ;;  %v7006_v24 = vld [vmem:[%s9667_s3 + $0x770] ss:$12 sps:$4 sm:$0xff]  }
  0xf4   :  { %4313 = vmatpush1.bf16.msra.mxu0 %v6926_v23  ;;  %6313 = vmatprep.subr.bf16.mxu1 %v6934_v26  ;;  %v7005_v23 = vld [vmem:[%s9667_s3 + $0xa0c] ss:$12 sps:$4 sm:$0xff]   ;;  %v7007_v26 = vld [vmem:[%s9667_s3 + $0x6b0] ss:$12 sps:$4 sm:$0xff]  }
  0xf5   :  { %4314 = vmatprep.subr.bf16.mxu0 %v6933_v25  ;;  %v7003_v25 = vld [vmem:[%s9667_s3 + $0xa08] ss:$12 sps:$4 sm:$0xff]  }
  0xf7   :  { %6314 = vmatpush3.bf16.msra.mxu1 %v6935_v27  ;;  %v7011_v27 = vld [vmem:[%s9667_s3 + $0x848] ss:$12 sps:$4 sm:$0xff]  }
  0xf8   :  { %4315 = vmatpush1.bf16.msra.mxu0 %v6931_v38  ;;  %6315 = vmatprep.subr.bf16.mxu1 %v6939_v8  ;;  %v7010_v38 = vld [vmem:[%s9667_s3 + $0xa24] ss:$12 sps:$4 sm:$0xff]   ;;  %v7012_v8 = vld [vmem:[%s9667_s3 + $0x788] ss:$12 sps:$4 sm:$0xff]  }
  0xf9   :  { %4316 = vmatprep.subr.bf16.mxu0 %v6938_v28  ;;  %v7008_v28 = vld [vmem:[%s9667_s3 + $0xa20] ss:$12 sps:$4 sm:$0xff]  }
  0xfb   :  { %6316 = vmatpush3.bf16.msra.mxu1 %v6940_v30  ;;  %v7016_v30 = vld [vmem:[%s9667_s3 + $0x860] ss:$12 sps:$4 sm:$0xff]  }
  0xfc   :  { %4317 = vmatpush1.bf16.msra.mxu0 %v6936_v29  ;;  %6317 = vmatprep.subr.bf16.mxu1 %v6944_v35  ;;  %v7015_v29 = vld [vmem:[%s9667_s3 + $0xa3c] ss:$12 sps:$4 sm:$0xff]   ;;  %v7017_v35 = vld [vmem:[%s9667_s3 + $0x7a0] ss:$12 sps:$4 sm:$0xff]  }
  0xfd   :  { %4318 = vmatprep.subr.bf16.mxu0 %v6943_v32  ;;  %v7013_v32 = vld [vmem:[%s9667_s3 + $0xa38] ss:$12 sps:$4 sm:$0xff]  }
  0xff   :  { %6318 = vmatpush3.bf16.msra.mxu1 %v6945_v33  ;;  %v7021_v33 = vld [vmem:[%s9667_s3 + $0x878] ss:$12 sps:$4 sm:$0xff]  }
 0x100   :  { %4319 = vmatpush1.bf16.msra.mxu0 %v6941_v39  ;;  %6319 = vmatprep.subr.bf16.mxu1 %v6951_v41  ;;  %v7020_v39 = vld [vmem:[%s9667_s3 + $0xa54] ss:$12 sps:$4 sm:$0xff]   ;;  %v7025_v41 = vld [vmem:[%s9667_s3 + $0xa6c] ss:$12 sps:$4 sm:$0xff]  }
 0x101   :  { %4329 = vmatprep.subr.bf16.mxu0 %v6950_v40  ;;  %v7022_v40 = vld [vmem:[%s9667_s3 + $0x7b8] ss:$12 sps:$4 sm:$0xff]  }
 0x103   :  { %4321 = vmatmul.mubr.bf16.vlgmr.msra.gmra.mrb[0].mxu0 %v8374_v43  ;;  %6320 = vmatpush3.bf16.msra.mxu1 %v6952_v45  ;;  %v7027_v45 = vld [vmem:[%s9667_s3 + $0x7d0] ss:$12 sps:$4 sm:$0xff]  }
 0x104   :  { %4330 = vmatpush1.bf16.msra.mxu0 %v6948_v42  ;;  %6321 = vmatprep.subr.bf16.mxu1 %v6956_v34  ;;  %v7023_v42 = vld [vmem:[%s9667_s3 + $0xa68] ss:$12 sps:$4 sm:$0xff]  }
 0x105   :  { %4331 = vmatprep.subr.bf16.mxu0 %v6955_v46  ;;  %4361 = vmatprep.mubr.bf16.mxu0 %v8395_v48  ;;  %v7032_v46 = vld [vmem:[%s9667_s3 + $0xa84] ss:$12 sps:$4 sm:$0xff]   ;;  %v7033_v34 = vld [vmem:[%s9667_s3 + $0x8a8] ss:$12 sps:$4 sm:$0xff]  }
 0x107   :  { %6322 = vmatpush3.bf16.msra.mxu1 %v6957_v50  ;;  %v8585_v50 = vcombine.low %v8379_v44, %v8379_v44  ;;  %v7038_v44 = vld [vmem:[%s9667_s3 + $0x8c0] ss:$12 sps:$4 sm:$0xff]  }
 0x108   :  { %4332 = vmatpush1.bf16.msra.mxu0 %v6953_v47  ;;  %6323 = vmatprep.subr.bf16.mxu1 %v6961_v52  ;;  %v7030_v47 = vld [vmem:[%s9667_s3 + $0xa80] ss:$12 sps:$4 sm:$0xff]   ;;  %v7034_v52 = vld [vmem:[%s9667_s3 + $0x7e8] ss:$12 sps:$4 sm:$0xff]  }
 0x109   :  { %4333 = vmatprep.subr.bf16.mxu0 %v6960_v51  ;;  %v8590_v51 = vld [vmem:[%s9668_s0 + $0x38] sm:$0xff] }
 0x10b   :  { %6324 = vmatpush3.bf16.msra.mxu1 %v6962_v49  ;;  %v8603_v49 = vcombine.high %v8590_v51, %v8590_v51 }
 0x10c   :  { %4334 = vmatpush1.bf16.msra.mxu0 %v6958_v53  ;;  %6325 = vmatprep.subr.bf16.mxu1 %v6966_v56  ;;  %v7037_v53 = vld [vmem:[%s9667_s3 + $0xa9c] ss:$12 sps:$4 sm:$0xff]   ;;  %v7039_v56 = vld [vmem:[%s9667_s3 + $0x800] ss:$12 sps:$4 sm:$0xff]  }
 0x10d   :  { %4335 = vmatprep.subr.bf16.mxu0 %v6965_v55  ;;  %v7035_v55 = vld [vmem:[%s9667_s3 + $0xa98] ss:$12 sps:$4 sm:$0xff]  }
 0x10f   :  { %6326 = vmatpush3.bf16.msra.mxu1 %v6967_v58  ;;  %v7043_v58 = vld [vmem:[%s9667_s3 + $0x8d8] ss:$12 sps:$4 sm:$0xff]  }
 0x110   :  { %4336 = vmatpush1.bf16.msra.mxu0 %v6963_v57  ;;  %6333 = vmatprep.subr.bf16.mxu1 %v6971_v60  ;;  %v7042_v57 = vld [vmem:[%s9667_s3 + $0xab4] ss:$12 sps:$4 sm:$0xff]   ;;  %v7044_v60 = vld [vmem:[%s9667_s3 + $0x818] ss:$12 sps:$4 sm:$0xff]  }
 0x111   :  { %4337 = vmatprep.subr.bf16.mxu0 %v6970_v59  ;;  %v7040_v59 = vld [vmem:[%s9667_s3 + $0xab0] ss:$12 sps:$4 sm:$0xff]  }
 0x112   :  { %4769 = vmatmul.mubr.bf16.vlgmr.msra.gmra.mrb[20].mxu1 %v7947_v20  ;;  %v6981_v20 = vld [vmem:[%s9667_s3 + $0x6f8] ss:$12 sps:$4 sm:$0xff]  }
 0x113   :  { %6334 = vmatpush3.bf16.msra.mxu1 %v6972_v61  ;;  %4808 = vmatprep.mubr.bf16.mxu1 %v7998_v36  ;;  %v6983_v36 = vld [vmem:[%s9667_s3 + $0x9a8] ss:$12 sps:$4 sm:$0xff]   ;;  %v7048_v61 = vld [vmem:[%s9667_s3 + $0x8f0] ss:$12 sps:$4 sm:$0xff]  }
 0x114   :  { %4338 = vmatpush1.bf16.msra.mxu0 %v6968_v19  ;;  %6335 = vmatprep.subr.bf16.mxu1 %v6976_v54  ;;  %v7047_v19 = vld [vmem:[%s9667_s3 + $0xacc] ss:$12 sps:$4 sm:$0xff]   ;;  %v7049_v54 = vld [vmem:[%s9667_s3 + $0x830] ss:$12 sps:$4 sm:$0xff]  }
 0x115   :  { %4339 = vmatprep.subr.bf16.mxu0 %v6975_v62  ;;  %v7045_v62 = vld [vmem:[%s9667_s3 + $0xac8] ss:$12 sps:$4 sm:$0xff]  }
 0x117   :  { %6336 = vmatpush3.bf16.msra.mxu1 %v6977_v0  ;;  %v7053_v0 = vld [vmem:[%s9667_s3 + $0x9c8] ss:$12 sps:$4 sm:$0xff]  }
 0x118   :  { %4340 = vmatpush1.bf16.msra.mxu0 %v6973_v63  ;;  %6337 = vmatprep.subr.bf16.mxu1 %v6981_v20  ;;  %v7052_v63 = vld [vmem:[%s9667_s3 + $0xae4] ss:$12 sps:$4 sm:$0xff]   ;;  %v7054_v20 = vld [vmem:[%s9667_s3 + $0x908] ss:$12 sps:$4 sm:$0xff]  }
 0x119   :  { %4341 = vmatprep.subr.bf16.mxu0 %v6980_v1  ;;  %v7050_v1 = vld [vmem:[%s9667_s3 + $0xae0] ss:$12 sps:$4 sm:$0xff]  }
 0x11b   :  { %6338 = vmatpush3.bf16.msra.mxu1 %v6982_v3  ;;  %v7058_v3 = vld [vmem:[%s9667_s3 + $0x9e0] ss:$12 sps:$4 sm:$0xff]  }
 0x11c   :  { %4342 = vmatpush1.bf16.msra.mxu0 %v6978_v2  ;;  %6339 = vmatprep.subr.bf16.mxu1 %v6986_v5  ;;  %v7057_v2 = vld [vmem:[%s9667_s3 + $0xafc] ss:$12 sps:$4 sm:$0xff]   ;;  %v7059_v5 = vld [vmem:[%s9667_s3 + $0x920] ss:$12 sps:$4 sm:$0xff]  }
 0x11d   :  { %4343 = vmatprep.subr.bf16.mxu0 %v6985_v4  ;;  %v7055_v4 = vld [vmem:[%s9667_s3 + $0xaf8] ss:$12 sps:$4 sm:$0xff]  }
 0x11f   :  { %6340 = vmatpush3.bf16.msra.mxu1 %v6987_v6  ;;  %v7060_v6 = vld [vmem:[%s9667_s3 + $0xb10] ss:$12 sps:$4 sm:$0xff]  }
 0x120   :  { %4344 = vmatpush1.bf16.msra.mxu0 %v6983_v36  ;;  %6341 = vmatprep.subr.bf16.mxu1 %v6991_v10  ;;  %v7062_v36 = vld [vmem:[%s9667_s3 + $0xb14] ss:$12 sps:$4 sm:$0xff]   ;;  %v7067_v10 = vld [vmem:[%s9667_s3 + $0xb2c] ss:$12 sps:$4 sm:$0xff]  }
 0x121   :  { %4345 = vmatprep.subr.bf16.mxu0 %v6990_v9  ;;  %v7064_v9 = vld [vmem:[%s9667_s3 + $0x938] ss:$12 sps:$4 sm:$0xff]  }
 0x123   :  { %6342 = vmatpush3.bf16.msra.mxu1 %v6992_v12  ;;  %v7069_v12 = vld [vmem:[%s9667_s3 + $0x950] ss:$12 sps:$4 sm:$0xff]  }
 0x124   :  { %4346 = vmatpush1.bf16.msra.mxu0 %v6988_v11  ;;  %6343 = vmatprep.subr.bf16.mxu1 %v6996_v14  ;;  %v7068_v11 = vld [vmem:[%s9667_s3 + $0xa10] ss:$12 sps:$4 sm:$0xff]   ;;  %v7073_v14 = vld [vmem:[%s9667_s3 + $0xa28] ss:$12 sps:$4 sm:$0xff]  }
 0x125   :  { %4347 = vmatprep.subr.bf16.mxu0 %v6995_v13  ;;  %v7072_v13 = vld [vmem:[%s9667_s3 + $0xb44] ss:$12 sps:$4 sm:$0xff]  }
 0x127   :  { %6344 = vmatpush3.bf16.msra.mxu1 %v6997_v16  ;;  %v7074_v16 = vld [vmem:[%s9667_s3 + $0x968] ss:$12 sps:$4 sm:$0xff]  }
 0x128   :  { %4348 = vmatpush1.bf16.msra.mxu0 %v6993_v15  ;;  %6345 = vmatprep.subr.bf16.mxu1 %v7001_v18  ;;  %v7070_v15 = vld [vmem:[%s9667_s3 + $0xb40] ss:$12 sps:$4 sm:$0xff]  }
 0x129   :  { %4349 = vmatprep.subr.bf16.mxu0 %v7000_v17  ;;  %v7077_v17 = vld [vmem:[%s9667_s3 + $0xb5c] ss:$12 sps:$4 sm:$0xff]   ;;  %v7078_v18 = vld [vmem:[%s9667_s3 + $0xa40] ss:$12 sps:$4 sm:$0xff]  }
 0x12b   :  { %6346 = vmatpush3.bf16.msra.mxu1 %v7002_v7  ;;  %v7079_v7 = vld [vmem:[%s9667_s3 + $0x980] ss:$12 sps:$4 sm:$0xff]  }
 0x12c   :  { %4350 = vmatpush1.bf16.msra.mxu0 %v6998_v21  ;;  %6347 = vmatprep.subr.bf16.mxu1 %v7006_v24  ;;  %v7075_v21 = vld [vmem:[%s9667_s3 + $0xb58] ss:$12 sps:$4 sm:$0xff]  }
 0x12d   :  { %4351 = vmatprep.subr.bf16.mxu0 %v7005_v23  ;;  %v7082_v23 = vld [vmem:[%s9667_s3 + $0xb74] ss:$12 sps:$4 sm:$0xff]   ;;  %v7083_v24 = vld [vmem:[%s9667_s3 + $0xa58] ss:$12 sps:$4 sm:$0xff]  }
 0x12f   :  { %6348 = vmatpush3.bf16.msra.mxu1 %v7007_v26  ;;  %v7084_v26 = vld [vmem:[%s9667_s3 + $0x998] ss:$12 sps:$4 sm:$0xff]  }
 0x130   :  { %4352 = vmatpush1.bf16.msra.mxu0 %v7003_v25  ;;  %6355 = vmatprep.subr.bf16.mxu1 %v7011_v27  ;;  %v7080_v25 = vld [vmem:[%s9667_s3 + $0xb70] ss:$12 sps:$4 sm:$0xff]  }
 0x131   :  { %4353 = vmatprep.subr.bf16.mxu0 %v7010_v38  ;;  %v7087_v38 = vld [vmem:[%s9667_s3 + $0xb8c] ss:$12 sps:$4 sm:$0xff]   ;;  %v7088_v27 = vld [vmem:[%s9667_s3 + $0xa70] ss:$12 sps:$4 sm:$0xff]  }
 0x132   :  { %4809 = vmatmul.mubr.bf16.vlgmr.msra.gmra.mrb[24].mxu1 %v8163_v31  ;;  %v7018_v31 = vld [vmem:[%s9667_s3 + $0xa50] ss:$12 sps:$4 sm:$0xff]  }
 0x133   :  { %6356 = vmatpush3.bf16.msra.mxu1 %v7012_v8  ;;  %4848 = vmatprep.mubr.bf16.mxu1 %v8181_v37  ;;  %v7026_v37 = vld [vmem:[%s9667_s3 + $0x890] ss:$12 sps:$4 sm:$0xff]  }
 0x134   :  { %4354 = vmatpush1.bf16.msra.mxu0 %v7008_v28  ;;  %6357 = vmatprep.subr.bf16.mxu1 %v7016_v30  ;;  %v7085_v28 = vld [vmem:[%s9667_s3 + $0xb88] ss:$12 sps:$4 sm:$0xff]   ;;  %v7089_v8 = vld [vmem:[%s9667_s3 + $0x9b0] ss:$12 sps:$4 sm:$0xff]  }
 0x135   :  { %4355 = vmatprep.subr.bf16.mxu0 %v7015_v29  ;;  %v7092_v29 = vld [vmem:[%s9667_s3 + $0xba4] ss:$12 sps:$4 sm:$0xff]   ;;  %v7093_v30 = vld [vmem:[%s9667_s3 + $0xb48] ss:$12 sps:$4 sm:$0xff]  }
 0x137   :  { %6358 = vmatpush3.bf16.msra.mxu1 %v7017_v35  ;;  %v7094_v35 = vld [vmem:[%s9667_s3 + $0xa88] ss:$12 sps:$4 sm:$0xff]  }
 0x138   :  { %4356 = vmatpush1.bf16.msra.mxu0 %v7013_v32  ;;  %6359 = vmatprep.subr.bf16.mxu1 %v7021_v33  ;;  %v7090_v32 = vld [vmem:[%s9667_s3 + $0xba0] ss:$12 sps:$4 sm:$0xff]  }
 0x139   :  { %4357 = vmatprep.subr.bf16.mxu0 %v7020_v39  ;;  %v7097_v39 = vld [vmem:[%s9667_s3 + $0xbbc] ss:$12 sps:$4 sm:$0xff]   ;;  %v7098_v33 = vld [vmem:[%s9667_s3 + $0xb60] ss:$12 sps:$4 sm:$0xff]  }
 0x13b   :  { %6360 = vmatpush3.bf16.msra.mxu1 %v7022_v40  ;;  %v7099_v40 = vld [vmem:[%s9667_s3 + $0xaa0] ss:$12 sps:$4 sm:$0xff]  }
 0x13c   :  { %4358 = vmatpush1.bf16.msra.mxu0 %v7018_v31  ;;  %6361 = vmatprep.subr.bf16.mxu1 %v7026_v37  ;;  %v7095_v31 = vld [vmem:[%s9667_s3 + $0xbb8] ss:$12 sps:$4 sm:$0xff]  }
 0x13d   :  { %4359 = vmatprep.subr.bf16.mxu0 %v7025_v41  ;;  %v7102_v41 = vld [vmem:[%s9667_s3 + $0xbd4] ss:$12 sps:$4 sm:$0xff]   ;;  %v7103_v37 = vld [vmem:[%s9667_s3 + $0xb78] ss:$12 sps:$4 sm:$0xff]  }
 0x13f   :  { %6362 = vmatpush3.bf16.msra.mxu1 %v7027_v45  ;;  %v7104_v45 = vld [vmem:[%s9667_s3 + $0xab8] ss:$12 sps:$4 sm:$0xff]  }
 0x140   :  { %4360 = vmatpush1.bf16.msra.mxu0 %v7023_v42  ;;  %6363 = vmatprep.subr.bf16.mxu1 %v7033_v34  ;;  %v7100_v42 = vld [vmem:[%s9667_s3 + $0xbd0] ss:$12 sps:$4 sm:$0xff]  }
 0x141   :  { %4370 = vmatprep.subr.bf16.mxu0 %v7032_v46  ;;  %v7107_v46 = vld [vmem:[%s9667_s3 + $0xbec] ss:$12 sps:$4 sm:$0xff]   ;;  %v7108_v34 = vld [vmem:[%s9667_s3 + $0xb90] ss:$12 sps:$4 sm:$0xff]  }
 0x143   :  { %4362 = vmatmul.mubr.bf16.vlgmr.msra.gmra.mrb[0].mxu0 %v8585_v50  ;;  %6364 = vmatpush3.bf16.msra.mxu1 %v7034_v52  ;;  %v7114_v52 = vld [vmem:[%s9667_s3 + $0xc04] ss:$12 sps:$4 sm:$0xff]  }
 0x144   :  { %4371 = vmatpush1.bf16.msra.mxu0 %v7030_v47  ;;  %6365 = vmatprep.subr.bf16.mxu1 %v7038_v44  ;;  %v7105_v47 = vld [vmem:[%s9667_s3 + $0xbe8] ss:$12 sps:$4 sm:$0xff]   ;;  %v7112_v44 = vld [vmem:[%s9667_s3 + $0xc00] ss:$12 sps:$4 sm:$0xff]  }
 0x145   :  { %4372 = vmatprep.subr.bf16.mxu0 %v7037_v53  ;;  %4402 = vmatprep.mubr.bf16.mxu0 %v8603_v49  ;;  %v7115_v53 = vld [vmem:[%s9667_s3 + $0xba8] ss:$12 sps:$4 sm:$0xff]  }
 0x147   :  { %6366 = vmatpush3.bf16.msra.mxu1 %v7039_v56  ;;  %v7119_v56 = vld [vmem:[%s9667_s3 + $0xc1c] ss:$12 sps:$4 sm:$0xff]  }
 0x148   :  { %4373 = vmatpush1.bf16.msra.mxu0 %v7035_v55  ;;  %6367 = vmatprep.subr.bf16.mxu1 %v7043_v58  ;;  %v7116_v55 = vld [vmem:[%s9667_s3 + $0xae8] ss:$12 sps:$4 sm:$0xff]   ;;  %v7117_v58 = vld [vmem:[%s9667_s3 + $0xc18] ss:$12 sps:$4 sm:$0xff]  }
 0x149   :  { %4374 = vmatprep.subr.bf16.mxu0 %v7042_v57  ;;  %v7120_v57 = vld [vmem:[%s9667_s3 + $0xbc0] ss:$12 sps:$4 sm:$0xff]  }
 0x14b   :  { %6368 = vmatpush3.bf16.msra.mxu1 %v7044_v60  ;;  %v7124_v60 = vld [vmem:[%s9667_s3 + $0xc34] ss:$12 sps:$4 sm:$0xff]  }
 0x14c   :  { %4375 = vmatpush1.bf16.msra.mxu0 %v7040_v59  ;;  %6369 = vmatprep.subr.bf16.mxu1 %v7048_v61  ;;  %v7121_v59 = vld [vmem:[%s9667_s3 + $0xb00] ss:$12 sps:$4 sm:$0xff]   ;;  %v7125_v61 = vld [vmem:[%s9667_s3 + $0xbd8] ss:$12 sps:$4 sm:$0xff]  }
 0x14d   :  { %4376 = vmatprep.subr.bf16.mxu0 %v7047_v19 }
 0x14f   :  { %6370 = vmatpush3.bf16.msra.mxu1 %v7049_v54  ;;  %v7126_v54 = vld [vmem:[%s9667_s3 + $0xb18] ss:$12 sps:$4 sm:$0xff]  }
 0x150   :  { %4377 = vmatpush1.bf16.msra.mxu0 %v7045_v62  ;;  %6377 = vmatprep.subr.bf16.mxu1 %v7053_v0  ;;  %v7122_v62 = vld [vmem:[%s9667_s3 + $0xc30] ss:$12 sps:$4 sm:$0xff]  }
 0x151   :  { %4378 = vmatprep.subr.bf16.mxu0 %v7052_v63  ;;  %v7129_v63 = vld [vmem:[%s9667_s3 + $0xc4c] ss:$12 sps:$4 sm:$0xff]   ;;  %v7130_v0 = vld [vmem:[%s9667_s3 + $0xbf0] ss:$12 sps:$4 sm:$0xff]  }
 0x152   :  { %4849 = vmatmul.mubr.bf16.vlgmr.msra.gmra.mrb[28].mxu1 %v8374_v43  ;;  %v7063_v43 = vld [vmem:[%s9667_s3 + $0x9f8] ss:$12 sps:$4 sm:$0xff]  }
 0x153   :  { %6378 = vmatpush3.bf16.msra.mxu1 %v7054_v20  ;;  %4888 = vmatprep.mubr.bf16.mxu1 %v8395_v48  ;;  %v7065_v48 = vld [vmem:[%s9667_s3 + $0xb28] ss:$12 sps:$4 sm:$0xff]   ;;  %v7131_v20 = vld [vmem:[%s9667_s3 + $0xb30] ss:$12 sps:$4 sm:$0xff]  }
 0x154   :  { %4379 = vmatpush1.bf16.msra.mxu0 %v7050_v1  ;;  %6379 = vmatprep.subr.bf16.mxu1 %v7058_v3  ;;  %v7127_v1 = vld [vmem:[%s9667_s3 + $0xc48] ss:$12 sps:$4 sm:$0xff]  }
 0x155   :  { %4380 = vmatprep.subr.bf16.mxu0 %v7057_v2  ;;  %v7134_v2 = vld [vmem:[%s9667_s3 + $0xc64] ss:$12 sps:$4 sm:$0xff]   ;;  %v7135_v3 = vld [vmem:[%s9667_s3 + $0xcc8] ss:$12 sps:$4 sm:$0xff]  }
 0x157   :  { %6380 = vmatpush3.bf16.msra.mxu1 %v7059_v5  ;;  %v7136_v5 = vld [vmem:[%s9667_s3 + $0xc08] ss:$12 sps:$4 sm:$0xff]  }
 0x158   :  { %4381 = vmatpush1.bf16.msra.mxu0 %v7055_v4  ;;  %6381 = vmatprep.subr.bf16.mxu1 %v7063_v43  ;;  %v7132_v4 = vld [vmem:[%s9667_s3 + $0xc60] ss:$12 sps:$4 sm:$0xff]  }
 0x159   :  { %4382 = vmatprep.subr.bf16.mxu0 %v7062_v36  ;;  %v7139_v36 = vld [vmem:[%s9667_s3 + $0xc7c] ss:$12 sps:$4 sm:$0xff]   ;;  %v7140_v43 = vld [vmem:[%s9667_s3 + $0xce0] ss:$12 sps:$4 sm:$0xff]  }
 0x15b   :  { %6382 = vmatpush3.bf16.msra.mxu1 %v7064_v9  ;;  %v7141_v9 = vld [vmem:[%s9667_s3 + $0xc20] ss:$12 sps:$4 sm:$0xff]  }
 0x15c   :  { %4383 = vmatpush1.bf16.msra.mxu0 %v7060_v6  ;;  %6383 = vmatprep.subr.bf16.mxu1 %v7068_v11  ;;  %v7137_v6 = vld [vmem:[%s9667_s3 + $0xc78] ss:$12 sps:$4 sm:$0xff]  }
 0x15d   :  { %4384 = vmatprep.subr.bf16.mxu0 %v7067_v10  ;;  %v7144_v10 = vld [vmem:[%s9667_s3 + $0xc94] ss:$12 sps:$4 sm:$0xff]   ;;  %v7145_v11 = vld [vmem:[%s9667_s3 + $0xcf8] ss:$12 sps:$4 sm:$0xff]  }
 0x15f   :  { %6384 = vmatpush3.bf16.msra.mxu1 %v7069_v12  ;;  %v7146_v12 = vld [vmem:[%s9667_s3 + $0xc38] ss:$12 sps:$4 sm:$0xff]  }
 0x160   :  { %4385 = vmatpush1.bf16.msra.mxu0 %v7065_v48  ;;  %6385 = vmatprep.subr.bf16.mxu1 %v7073_v14  ;;  %v7142_v48 = vld [vmem:[%s9667_s3 + $0xc90] ss:$12 sps:$4 sm:$0xff]  }
 0x161   :  { %4386 = vmatprep.subr.bf16.mxu0 %v7072_v13  ;;  %v7149_v13 = vld [vmem:[%s9667_s3 + $0xcac] ss:$12 sps:$4 sm:$0xff]   ;;  %v7150_v14 = vld [vmem:[%s9667_s3 + $0xd10] ss:$12 sps:$4 sm:$0xff]  }
 0x163   :  { %6386 = vmatpush3.bf16.msra.mxu1 %v7074_v16  ;;  %v7151_v16 = vld [vmem:[%s9667_s3 + $0xc50] ss:$12 sps:$4 sm:$0xff]  }
 0x164   :  { %4387 = vmatpush1.bf16.msra.mxu0 %v7070_v15  ;;  %6387 = vmatprep.subr.bf16.mxu1 %v7078_v18  ;;  %v7147_v15 = vld [vmem:[%s9667_s3 + $0xca8] ss:$12 sps:$4 sm:$0xff]  }
 0x165   :  { %4388 = vmatprep.subr.bf16.mxu0 %v7077_v17  ;;  %v7154_v17 = vld [vmem:[%s9667_s3 + $0xcc4] ss:$12 sps:$4 sm:$0xff]   ;;  %v7155_v18 = vld [vmem:[%s9667_s3 + $0xd28] ss:$12 sps:$4 sm:$0xff]  }
 0x167   :  { %6388 = vmatpush3.bf16.msra.mxu1 %v7079_v7  ;;  %v7156_v7 = vld [vmem:[%s9667_s3 + $0xc68] ss:$12 sps:$4 sm:$0xff]  }
 0x168   :  { %4389 = vmatpush1.bf16.msra.mxu0 %v7075_v21  ;;  %6389 = vmatprep.subr.bf16.mxu1 %v7083_v24  ;;  %v7152_v21 = vld [vmem:[%s9667_s3 + $0xcc0] ss:$12 sps:$4 sm:$0xff]  }
 0x169   :  { %4390 = vmatprep.subr.bf16.mxu0 %v7082_v23  ;;  %v7159_v23 = vld [vmem:[%s9667_s3 + $0xcdc] ss:$12 sps:$4 sm:$0xff]   ;;  %v7160_v24 = vld [vmem:[%s9667_s3 + $0xd40] ss:$12 sps:$4 sm:$0xff]  }
 0x16b   :  { %6390 = vmatpush3.bf16.msra.mxu1 %v7084_v26  ;;  %v7161_v26 = vld [vmem:[%s9667_s3 + $0xc80] ss:$12 sps:$4 sm:$0xff]  }
 0x16c   :  { %4391 = vmatpush1.bf16.msra.mxu0 %v7080_v25  ;;  %6391 = vmatprep.subr.bf16.mxu1 %v7088_v27  ;;  %v7157_v25 = vld [vmem:[%s9667_s3 + $0xcd8] ss:$12 sps:$4 sm:$0xff]  }
 0x16d   :  { %4392 = vmatprep.subr.bf16.mxu0 %v7087_v38  ;;  %v7164_v38 = vld [vmem:[%s9667_s3 + $0xcf4] ss:$12 sps:$4 sm:$0xff]   ;;  %v7165_v27 = vld [vmem:[%s9667_s3 + $0xd58] ss:$12 sps:$4 sm:$0xff]  }
 0x16f   :  { %6392 = vmatpush3.bf16.msra.mxu1 %v7089_v8  ;;  %v7162_v8 = vld [vmem:[%s9667_s3 + $0xcf0] ss:$12 sps:$4 sm:$0xff]  }
 0x170   :  { %4393 = vmatpush1.bf16.msra.mxu0 %v7085_v28  ;;  %6399 = vmatprep.subr.bf16.mxu1 %v7093_v30  ;;  %v8920_v28 = vpop.f32.mrb[0].mxu1  ;;  %v7169_v30 = vld [vmem:[%s9667_s3 + $0xd0c] ss:$12 sps:$4 sm:$0xff]  }
 0x171   :  { %4394 = vmatprep.subr.bf16.mxu0 %v7092_v29  ;;  %v7166_v29 = vld [vmem:[%s9667_s3 + $0xc98] ss:$12 sps:$4 sm:$0xff]  }
 0x172   :  { %4889 = vmatmul.mubr.bf16.vlgmr.msra.gmra.mrb[32].mxu1 %v8585_v50  ;;  %v7109_v50 = vld [vmem:[%s9667_s3 + $0xad0] ss:$12 sps:$4 sm:$0xff]  }
 0x173   :  { %6400 = vmatpush3.bf16.msra.mxu1 %v7094_v35  ;;  %4928 = vmatprep.mubr.bf16.mxu1 %v8603_v49  ;;  %v5605_v49 = vcombine.low %v8590_v51, %v8590_v51  ;;  %v8808_v51 = vld [vmem:[%s9668_s0 + $0x40] sm:$0xff]  ;;  %v7167_v35 = vld [vmem:[%s9667_s3 + $0xd08] ss:$12 sps:$4 sm:$0xff]  }
 0x174   :  { %4395 = vmatpush1.bf16.msra.mxu0 %v7090_v32  ;;  %6401 = vmatprep.subr.bf16.mxu1 %v7098_v33  ;;  %v5608_v19 = vcombine.high %v8808_v51, %v8808_v51  ;;  %v7170_v32 = vld [vmem:[%s9667_s3 + $0xd70] ss:$12 sps:$4 sm:$0xff]  }
 0x175   :  { %4396 = vmatprep.subr.bf16.mxu0 %v7097_v39  ;;  %v8937_v39 = vpop.f32.mrb[1].mxu1  ;;  %v7171_v33 = vld [vmem:[%s9667_s3 + $0xcb0] ss:$12 sps:$4 sm:$0xff]  }
 0x177   :  { %6402 = vmatpush3.bf16.msra.mxu1 %v7099_v40  ;;  %v4162_v40 = vpop.f32.mrb[2].mxu1 }
 0x178   :  { %4397 = vmatpush1.bf16.msra.mxu0 %v7095_v31  ;;  %6403 = vmatprep.subr.bf16.mxu1 %v7103_v37  ;;  %v7174_v31 = vld [vmem:[%s9667_s3 + $0xd24] ss:$12 sps:$4 sm:$0xff]   ;;  %v4163_v37 = vpop.f32.mrb[3].mxu1 }
 0x179   :  { %4398 = vmatprep.subr.bf16.mxu0 %v7102_v41  ;;  %v7177_v41 = vld [vmem:[%s9667_s3 + $0xe48] ss:$12 sps:$4 sm:$0xff]   ;;  %v7241_v40 = vld [vmem:[%s9667_s3 + $0xe58] ss:$12 sps:$4 sm:$0xff]  }
 0x17a   :  { %v7248_v37 = vld [vmem:[%s9667_s3 + $0xe74] ss:$12 sps:$4 sm:$0xff]  }
 0x17b   :  { %6404 = vmatpush3.bf16.msra.mxu1 %v7104_v45  ;;  %v8953_v45 = vld [vmem:[%s9668_s0 + $0x48] sm:$0xff] }
 0x17c   :  { %4399 = vmatpush1.bf16.msra.mxu0 %v7100_v42  ;;  %6405 = vmatprep.subr.bf16.mxu1 %v7108_v34  ;;  %v5607_v42 = vcombine.low %v8808_v51, %v8808_v51  ;;  %v7178_v34 = vld [vmem:[%s9667_s3 + $0xd88] ss:$12 sps:$4 sm:$0xff]   ;;  %v7191_v51 = vld [vmem:[%s9667_s3 + $0xd6c] ss:$12 sps:$4 sm:$0xff]  }
 0x17d   :  { %4400 = vmatprep.subr.bf16.mxu0 %v7107_v46  ;;  %v7172_v46 = vld [vmem:[%s9667_s3 + $0xd20] ss:$12 sps:$4 sm:$0xff]  }
 0x17f   :  { %6406 = vmatpush3.bf16.msra.mxu1 %v7109_v50  ;;  %v7182_v50 = vld [vmem:[%s9667_s3 + $0xe60] ss:$12 sps:$4 sm:$0xff]  }
 0x180   :  { %4401 = vmatpush1.bf16.msra.mxu0 %v7105_v47  ;;  %6407 = vmatprep.subr.bf16.mxu1 %v7115_v53  ;;  %v7181_v47 = vld [vmem:[%s9667_s3 + $0xd3c] ss:$12 sps:$4 sm:$0xff]   ;;  %v7179_v53 = vld [vmem:[%s9667_s3 + $0xd38] ss:$12 sps:$4 sm:$0xff]  }
 0x181   :  { %4411 = vmatprep.subr.bf16.mxu0 %v7114_v52  ;;  %v5610_v52 = vcombine.high %v8953_v45, %v8953_v45 }
 0x183   :  { %4403 = vmatmul.mubr.bf16.vlgmr.msra.gmra.mrb[0].mxu0 %v5605_v49  ;;  %6408 = vmatpush3.bf16.msra.mxu1 %v7116_v55  ;;  %v7187_v55 = vld [vmem:[%s9667_s3 + $0xe78] ss:$12 sps:$4 sm:$0xff]  }
 0x184   :  { %4412 = vmatpush1.bf16.msra.mxu0 %v7112_v44  ;;  %6409 = vmatprep.subr.bf16.mxu1 %v7120_v57  ;;  %v7183_v44 = vld [vmem:[%s9667_s3 + $0xda0] ss:$12 sps:$4 sm:$0xff]   ;;  %v7188_v57 = vld [vmem:[%s9667_s3 + $0xdb8] ss:$12 sps:$4 sm:$0xff]  }
 0x185   :  { %4413 = vmatprep.subr.bf16.mxu0 %v7119_v56  ;;  %4443 = vmatprep.mubr.bf16.mxu0 %v5608_v19  ;;  %v7184_v56 = vld [vmem:[%s9667_s3 + $0xd50] ss:$12 sps:$4 sm:$0xff]  }
 0x187   :  { %6410 = vmatpush3.bf16.msra.mxu1 %v7121_v59  ;;  %v7189_v59 = vld [vmem:[%s9667_s3 + $0xd68] ss:$12 sps:$4 sm:$0xff]  }
 0x188   :  { %4414 = vmatpush1.bf16.msra.mxu0 %v7117_v58  ;;  %6411 = vmatprep.subr.bf16.mxu1 %v7125_v61  ;;  %v7192_v58 = vld [vmem:[%s9667_s3 + $0xe90] ss:$12 sps:$4 sm:$0xff]   ;;  %v7197_v61 = vld [vmem:[%s9667_s3 + $0xea8] ss:$12 sps:$4 sm:$0xff]  }
 0x189   :  { %4415 = vmatprep.subr.bf16.mxu0 %v7124_v60  ;;  %v7193_v60 = vld [vmem:[%s9667_s3 + $0xdd0] ss:$12 sps:$4 sm:$0xff]  }
 0x18b   :  { %6412 = vmatpush3.bf16.msra.mxu1 %v7126_v54  ;;  %v7198_v54 = vld [vmem:[%s9667_s3 + $0xde8] ss:$12 sps:$4 sm:$0xff]  }
 0x18c   :  { %4416 = vmatpush1.bf16.msra.mxu0 %v7122_v62  ;;  %6413 = vmatprep.subr.bf16.mxu1 %v7130_v0  ;;  %v7194_v62 = vld [vmem:[%s9667_s3 + $0xd80] ss:$12 sps:$4 sm:$0xff]  }
 0x18d   :  { %4417 = vmatprep.subr.bf16.mxu0 %v7129_v63  ;;  %v7201_v63 = vld [vmem:[%s9667_s3 + $0xd9c] ss:$12 sps:$4 sm:$0xff]   ;;  %v7202_v0 = vld [vmem:[%s9667_s3 + $0xec0] ss:$12 sps:$4 sm:$0xff]  }
 0x18f   :  { %6414 = vmatpush3.bf16.msra.mxu1 %v7131_v20  ;;  %v7203_v20 = vld [vmem:[%s9667_s3 + $0xe00] ss:$12 sps:$4 sm:$0xff]  }
 0x190   :  { %4418 = vmatpush1.bf16.msra.mxu0 %v7127_v1  ;;  %6421 = vmatprep.subr.bf16.mxu1 %v7135_v3  ;;  %v7199_v1 = vld [vmem:[%s9667_s3 + $0xd98] ss:$12 sps:$4 sm:$0xff]  }
 0x191   :  { %4419 = vmatprep.subr.bf16.mxu0 %v7134_v2  ;;  %v7206_v2 = vld [vmem:[%s9667_s3 + $0xdb4] ss:$12 sps:$4 sm:$0xff]   ;;  %v7207_v3 = vld [vmem:[%s9667_s3 + $0xed8] ss:$12 sps:$4 sm:$0xff]  }
 0x192   :  { %4929 = vmatmul.mubr.bf16.vlgmr.msra.gmra.mrb[36].mxu1 %v5605_v49  ;;  %v7186_v49 = vld [vmem:[%s9667_s3 + $0xd54] ss:$12 sps:$4 sm:$0xff]  }
 0x193   :  { %6422 = vmatpush3.bf16.msra.mxu1 %v7136_v5  ;;  %4968 = vmatprep.mubr.bf16.mxu1 %v5608_v19  ;;  %v7196_v19 = vld [vmem:[%s9667_s3 + $0xd84] ss:$12 sps:$4 sm:$0xff]  }
 0x194   :  { %4420 = vmatpush1.bf16.msra.mxu0 %v7132_v4  ;;  %6423 = vmatprep.subr.bf16.mxu1 %v7140_v43  ;;  %v7204_v4 = vld [vmem:[%s9667_s3 + $0xdb0] ss:$12 sps:$4 sm:$0xff]   ;;  %v7208_v5 = vld [vmem:[%s9667_s3 + $0xe18] ss:$12 sps:$4 sm:$0xff]  }
 0x195   :  { %4421 = vmatprep.subr.bf16.mxu0 %v7139_v36  ;;  %v7211_v36 = vld [vmem:[%s9667_s3 + $0xdcc] ss:$12 sps:$4 sm:$0xff]   ;;  %v7212_v43 = vld [vmem:[%s9667_s3 + $0xef0] ss:$12 sps:$4 sm:$0xff]  }
 0x197   :  { %6424 = vmatpush3.bf16.msra.mxu1 %v7141_v9  ;;  %v7213_v9 = vld [vmem:[%s9667_s3 + $0xe30] ss:$12 sps:$4 sm:$0xff]  }
 0x198   :  { %4422 = vmatpush1.bf16.msra.mxu0 %v7137_v6  ;;  %6425 = vmatprep.subr.bf16.mxu1 %v7145_v11  ;;  %v7209_v6 = vld [vmem:[%s9667_s3 + $0xdc8] ss:$12 sps:$4 sm:$0xff]  }
 0x199   :  { %4423 = vmatprep.subr.bf16.mxu0 %v7144_v10  ;;  %v7216_v10 = vld [vmem:[%s9667_s3 + $0xde4] ss:$12 sps:$4 sm:$0xff]   ;;  %v7219_v11 = vld [vmem:[%s9667_s3 + $0xfc8] ss:$12 sps:$4 sm:$0xff]  }
 0x19b   :  { %6426 = vmatpush3.bf16.msra.mxu1 %v7146_v12  ;;  %v9060_v12 = vld [vmem:[%s9668_s0 + $0x50] sm:$0xff] }
 0x19c   :  { %4424 = vmatpush1.bf16.msra.mxu0 %v7142_v48  ;;  %6427 = vmatprep.subr.bf16.mxu1 %v7150_v14  ;;  %v9055_v48 = vcombine.low %v8953_v45, %v8953_v45  ;;  %v7220_v14 = vld [vmem:[%s9667_s3 + $0xf08] ss:$12 sps:$4 sm:$0xff]   ;;  %v7246_v45 = vld [vmem:[%s9667_s3 + $0xe70] ss:$12 sps:$4 sm:$0xff]  }
 0x19d   :  { %4425 = vmatprep.subr.bf16.mxu0 %v7149_v13  ;;  %v7214_v13 = vld [vmem:[%s9667_s3 + $0xde0] ss:$12 sps:$4 sm:$0xff]  }
 0x19f   :  { %6428 = vmatpush3.bf16.msra.mxu1 %v7151_v16  ;;  %v7224_v16 = vld [vmem:[%s9667_s3 + $0xfe0] ss:$12 sps:$4 sm:$0xff]  }
 0x1a0   :  { %4426 = vmatpush1.bf16.msra.mxu0 %v7147_v15  ;;  %6429 = vmatprep.subr.bf16.mxu1 %v7155_v18  ;;  %v7223_v15 = vld [vmem:[%s9667_s3 + $0xdfc] ss:$12 sps:$4 sm:$0xff]   ;;  %v7221_v18 = vld [vmem:[%s9667_s3 + $0xdf8] ss:$12 sps:$4 sm:$0xff]  }
 0x1a1   :  { %4427 = vmatprep.subr.bf16.mxu0 %v7154_v17  ;;  %v9076_v17 = vcombine.high %v9060_v12, %v9060_v12 }
 0x1a3   :  { %6430 = vmatpush3.bf16.msra.mxu1 %v7156_v7  ;;  %v7228_v7 = vld [vmem:[%s9667_s3 + $0xe14] ss:$12 sps:$4 sm:$0xff]  }
 0x1a4   :  { %4428 = vmatpush1.bf16.msra.mxu0 %v7152_v21  ;;  %6431 = vmatprep.subr.bf16.mxu1 %v7160_v24  ;;  %v7225_v21 = vld [vmem:[%s9667_s3 + $0xf20] ss:$12 sps:$4 sm:$0xff]   ;;  %v7226_v24 = vld [vmem:[%s9667_s3 + $0xe10] ss:$12 sps:$4 sm:$0xff]  }
 0x1a5   :  { %4429 = vmatprep.subr.bf16.mxu0 %v7159_v23  ;;  %v7229_v23 = vld [vmem:[%s9667_s3 + $0xff8] ss:$12 sps:$4 sm:$0xff]  }
 0x1a7   :  { %6432 = vmatpush3.bf16.msra.mxu1 %v7161_v26  ;;  %v7233_v26 = vld [vmem:[%s9667_s3 + $0xe2c] ss:$12 sps:$4 sm:$0xff]  }
 0x1a8   :  { %4430 = vmatpush1.bf16.msra.mxu0 %v7157_v25  ;;  %6433 = vmatprep.subr.bf16.mxu1 %v7165_v27  ;;  %v7230_v25 = vld [vmem:[%s9667_s3 + $0xf38] ss:$12 sps:$4 sm:$0xff]   ;;  %v7231_v27 = vld [vmem:[%s9667_s3 + $0xe28] ss:$12 sps:$4 sm:$0xff]  }
 0x1a9   :  { %4431 = vmatprep.subr.bf16.mxu0 %v7164_v38  ;;  %v7234_v38 = vld [vmem:[%s9667_s3 + $0x1010] ss:$12 sps:$4 sm:$0xff]  }
 0x1ab   :  { %6434 = vmatpush3.bf16.msra.mxu1 %v7166_v29  ;;  %v7238_v29 = vld [vmem:[%s9667_s3 + $0xe44] ss:$12 sps:$4 sm:$0xff]  }
 0x1ac   :  { %4432 = vmatpush1.bf16.msra.mxu0 %v7162_v8  ;;  %6435 = vmatprep.subr.bf16.mxu1 %v7170_v32  ;;  %v7235_v8 = vld [vmem:[%s9667_s3 + $0xf50] ss:$12 sps:$4 sm:$0xff]   ;;  %v7236_v32 = vld [vmem:[%s9667_s3 + $0xe40] ss:$12 sps:$4 sm:$0xff]  }
 0x1ad   :  { %4433 = vmatprep.subr.bf16.mxu0 %v7169_v30  ;;  %v7239_v30 = vld [vmem:[%s9667_s3 + $0x1028] ss:$12 sps:$4 sm:$0xff]  }
 0x1af   :  { %6436 = vmatpush3.bf16.msra.mxu1 %v7171_v33  ;;  %v7243_v33 = vld [vmem:[%s9667_s3 + $0xe5c] ss:$12 sps:$4 sm:$0xff]  }
 0x1b0   :  { %4434 = vmatpush1.bf16.msra.mxu0 %v7167_v35  ;;  %6443 = vmatprep.subr.bf16.mxu1 %v7177_v41  ;;  %v7240_v35 = vld [vmem:[%s9667_s3 + $0xf68] ss:$12 sps:$4 sm:$0xff]   ;;  %v7245_v41 = vld [vmem:[%s9667_s3 + $0xf80] ss:$12 sps:$4 sm:$0xff]  }
 0x1b1   :  { %4435 = vmatprep.subr.bf16.mxu0 %v7174_v31  ;;  %v7244_v31 = vld [vmem:[%s9667_s3 + $0x1040] ss:$12 sps:$4 sm:$0xff]  }
 0x1b2   :  { %4969 = vmatmul.mubr.bf16.vlgmr.msra.gmra.mrb[40].mxu1 %v5607_v42 }
 0x1b3   :  { %6444 = vmatpush3.bf16.msra.mxu1 %v7178_v34  ;;  %5008 = vmatprep.mubr.bf16.mxu1 %v5610_v52  ;;  %v7253_v34 = vld [vmem:[%s9667_s3 + $0xe8c] ss:$12 sps:$4 sm:$0xff]  }
 0x1b4   :  { %4436 = vmatpush1.bf16.msra.mxu0 %v7172_v46  ;;  %6445 = vmatprep.subr.bf16.mxu1 %v7182_v50  ;;  %v7250_v46 = vld [vmem:[%s9667_s3 + $0xf98] ss:$12 sps:$4 sm:$0xff]   ;;  %v7251_v50 = vld [vmem:[%s9667_s3 + $0xe88] ss:$12 sps:$4 sm:$0xff]  }
 0x1b5   :  { %4437 = vmatprep.subr.bf16.mxu0 %v7181_v47  ;;  %v7254_v47 = vld [vmem:[%s9667_s3 + $0x1070] ss:$12 sps:$4 sm:$0xff]  }
 0x1b7   :  { %6446 = vmatpush3.bf16.msra.mxu1 %v7183_v44  ;;  %v7261_v44 = vld [vmem:[%s9667_s3 + $0x1148] ss:$12 sps:$4 sm:$0xff]  }
 0x1b8   :  { %4438 = vmatpush1.bf16.msra.mxu0 %v7179_v53  ;;  %6447 = vmatprep.subr.bf16.mxu1 %v7187_v55  ;;  %v7260_v53 = vld [vmem:[%s9667_s3 + $0xea4] ss:$12 sps:$4 sm:$0xff]   ;;  %v9171_v55 = vld [vmem:[%s9668_s0 + $0x58] sm:$0xff] }
 0x1b9   :  { %4439 = vmatprep.subr.bf16.mxu0 %v7186_v49  ;;  %v9166_v49 = vcombine.low %v9060_v12, %v9060_v12  ;;  %v7285_v12 = vld [vmem:[%s9667_s3 + $0xf1c] ss:$12 sps:$4 sm:$0xff]  }
 0x1bb   :  { %6448 = vmatpush3.bf16.msra.mxu1 %v7188_v57  ;;  %v7262_v57 = vld [vmem:[%s9667_s3 + $0x1088] ss:$12 sps:$4 sm:$0xff]  }
 0x1bc   :  { %4440 = vmatpush1.bf16.msra.mxu0 %v7184_v56  ;;  %6449 = vmatprep.subr.bf16.mxu1 %v7192_v58  ;;  %v7258_v56 = vld [vmem:[%s9667_s3 + $0xea0] ss:$12 sps:$4 sm:$0xff]  }
 0x1bd   :  { %4441 = vmatprep.subr.bf16.mxu0 %v7191_v51  ;;  %v7265_v51 = vld [vmem:[%s9667_s3 + $0xebc] ss:$12 sps:$4 sm:$0xff]   ;;  %v7266_v58 = vld [vmem:[%s9667_s3 + $0x1160] ss:$12 sps:$4 sm:$0xff]  }
 0x1bf   :  { %6450 = vmatpush3.bf16.msra.mxu1 %v7193_v60  ;;  %v7263_v60 = vld [vmem:[%s9667_s3 + $0xeb8] ss:$12 sps:$4 sm:$0xff]  }
 0x1c0   :  { %4442 = vmatpush1.bf16.msra.mxu0 %v7189_v59  ;;  %6451 = vmatprep.subr.bf16.mxu1 %v7197_v61  ;;  %v9187_v59 = vcombine.high %v9171_v55, %v9171_v55  ;;  %v7270_v61 = vld [vmem:[%s9667_s3 + $0xed4] ss:$12 sps:$4 sm:$0xff]  }
 0x1c1   :  { %4452 = vmatprep.subr.bf16.mxu0 %v7196_v19  ;;  %v7267_v19 = vld [vmem:[%s9667_s3 + $0x10a0] ss:$12 sps:$4 sm:$0xff]  }
 0x1c3   :  { %4444 = vmatmul.mubr.bf16.vlgmr.msra.gmra.mrb[0].mxu0 %v5607_v42  ;;  %6452 = vmatpush3.bf16.msra.mxu1 %v7198_v54  ;;  %v7249_v42 = vld [vmem:[%s9667_s3 + $0x1058] ss:$12 sps:$4 sm:$0xff]   ;;  %v7268_v54 = vld [vmem:[%s9667_s3 + $0xed0] ss:$12 sps:$4 sm:$0xff]  }
 0x1c4   :  { %4453 = vmatpush1.bf16.msra.mxu0 %v7194_v62  ;;  %6453 = vmatprep.subr.bf16.mxu1 %v7202_v0  ;;  %v7271_v62 = vld [vmem:[%s9667_s3 + $0x1178] ss:$12 sps:$4 sm:$0xff]   ;;  %v9209_v0 = vpop.f32.mrb[4].mxu1 }
 0x1c5   :  { %4454 = vmatprep.subr.bf16.mxu0 %v7201_v63  ;;  %4484 = vmatprep.mubr.bf16.mxu0 %v5610_v52  ;;  %v7255_v52 = vld [vmem:[%s9667_s3 + $0xfb0] ss:$12 sps:$4 sm:$0xff]   ;;  %v7272_v63 = vld [vmem:[%s9667_s3 + $0x10b8] ss:$12 sps:$4 sm:$0xff]  }
 0x1c7   :  { %6454 = vmatpush3.bf16.msra.mxu1 %v7203_v20  ;;  %v7276_v20 = vld [vmem:[%s9667_s3 + $0x1190] ss:$12 sps:$4 sm:$0xff]  }
 0x1c8   :  { %4455 = vmatpush1.bf16.msra.mxu0 %v7199_v1  ;;  %6455 = vmatprep.subr.bf16.mxu1 %v7207_v3  ;;  %v7275_v1 = vld [vmem:[%s9667_s3 + $0xeec] ss:$12 sps:$4 sm:$0xff]  }
 0x1c9   :  { %4456 = vmatprep.subr.bf16.mxu0 %v7206_v2  ;;  %v9217_v2 = vpop.f32.mrb[5].mxu1 }
 0x1ca   :  { %v4613_v3 = vpop.f32.mrb[6].mxu1 }
 0x1cb   :  { %6456 = vmatpush3.bf16.msra.mxu1 %v7208_v5  ;;  %v7273_v5 = vld [vmem:[%s9667_s3 + $0xee8] ss:$12 sps:$4 sm:$0xff]   ;;  %v7307_v3 = vld [vmem:[%s9667_s3 + $0x1220] ss:$12 sps:$4 sm:$0xff]  }
 0x1cc   :  { %4457 = vmatpush1.bf16.msra.mxu0 %v7204_v4  ;;  %6457 = vmatprep.subr.bf16.mxu1 %v7212_v43  ;;  %v4614_v4 = vpop.f32.mrb[7].mxu1  ;;  %v7280_v43 = vld [vmem:[%s9667_s3 + $0xf04] ss:$12 sps:$4 sm:$0xff]  }
 0x1cd   :  { %4458 = vmatprep.subr.bf16.mxu0 %v7211_v36  ;;  %v7277_v36 = vld [vmem:[%s9667_s3 + $0x10d0] ss:$12 sps:$4 sm:$0xff]  }
 0x1cf   :  { %6458 = vmatpush3.bf16.msra.mxu1 %v7213_v9  ;;  %v841_v9 = vlaneseq }
 0x1d0   :  { %4459 = vmatpush1.bf16.msra.mxu0 %v7209_v6  ;;  %6465 = vmatprep.subr.bf16.mxu1 %v7219_v11  ;;  %v7281_v6 = vld [vmem:[%s9667_s3 + $0x11a8] ss:$12 sps:$4 sm:$0xff]  }
 0x1d1   :  { %4460 = vmatprep.subr.bf16.mxu0 %v7216_v10  ;;  %v7278_v10 = vld [vmem:[%s9667_s3 + $0xf00] ss:$12 sps:$4 sm:$0xff]   ;;  %v7282_v11 = vld [vmem:[%s9667_s3 + $0x10e8] ss:$12 sps:$4 sm:$0xff]  }
 0x1d2   :  { %5009 = vmatmul.mubr.bf16.vlgmr.msra.gmra.mrb[44].mxu1 %v9055_v48 }
 0x1d3   :  { %6466 = vmatpush3.bf16.msra.mxu1 %v7220_v14  ;;  %5048 = vmatprep.mubr.bf16.mxu1 %v9076_v17  ;;  %v9243_v14 = vshrl.u32 %v841_v9, 7 }
 0x1d4   :  { %4461 = vmatpush1.bf16.msra.mxu0 %v7214_v13  ;;  %6467 = vmatprep.subr.bf16.mxu1 %v7224_v16  ;;  %v7286_v13 = vld [vmem:[%s9667_s3 + $0x11c0] ss:$12 sps:$4 sm:$0xff]   ;;  %v6261_v16 = vpop.f32.mrb[8].mxu1 }
 0x1d5   :  { %4462 = vmatprep.subr.bf16.mxu0 %v7223_v15  ;;  %v7283_v15 = vld [vmem:[%s9667_s3 + $0xf18] ss:$12 sps:$4 sm:$0xff]  }
 0x1d7   :  { %6468 = vmatpush3.bf16.msra.mxu1 %v7225_v21  ;;  %v7287_v21 = vld [vmem:[%s9667_s3 + $0x1100] ss:$12 sps:$4 sm:$0xff]  }
 0x1d8   :  { %4463 = vmatpush1.bf16.msra.mxu0 %v7221_v18  ;;  %6469 = vmatprep.subr.bf16.mxu1 %v7229_v23  ;;  %v851_v18 = vsub.s32 2, %v9243_v14  ;;  %v6262_v23 = vpop.f32.mrb[9].mxu1 }
 0x1d9   :  { %4464 = vmatprep.subr.bf16.mxu0 %v7228_v7  ;;  %v9256_v7 = vld [vmem:[%s9669_s4] sm:$0x7] }
 0x1db   :  { %6470 = vmatpush3.bf16.msra.mxu1 %v7230_v25  ;;  %v852_v25 = vrot.slane %v9256_v7, %v851_v18 }
 0x1dc   :  { %4465 = vmatpush1.bf16.msra.mxu0 %v7226_v24  ;;  %6471 = vmatprep.subr.bf16.mxu1 %v7234_v38  ;;  %v7291_v24 = vld [vmem:[%s9667_s3 + $0x11d8] ss:$12 sps:$4 sm:$0xff]   ;;  %v6264_v38 = vpop.f32.mrb[10].mxu1 }
 0x1dd   :  { %4466 = vmatprep.subr.bf16.mxu0 %v7233_v26  ;;  %v6263_v26 = vadd.f32 %v6262_v23, %v6261_v16  ;;  %v7318_v16 = vld [vmem:[%s9667_s3 + $0xfc4] ss:$12 sps:$4 sm:$0xff]   ;;  %v7321_v23 = vld [vmem:[%s9667_s3 + $0xfdc] ss:$12 sps:$4 sm:$0xff]  }
 0x1df   :  { %6472 = vmatpush3.bf16.msra.mxu1 %v7235_v8  ;;  %v4651_v8 = vadd.f32 %v6263_v26, %v852_v25  ;;  %v7324_v25 = vld [vmem:[%s9667_s3 + $0xff4] ss:$12 sps:$4 sm:$0xff]  }
 0x1e0   :  { %4467 = vmatpush1.bf16.msra.mxu0 %v7231_v27  ;;  %6473 = vmatprep.subr.bf16.mxu1 %v7239_v30  ;;  %v6265_v27 = vpop.f32.mrb[11].mxu1  ;;  %v7288_v30 = vld [vmem:[%s9667_s3 + $0xf30] ss:$12 sps:$4 sm:$0xff]  }
 0x1e1   :  { %4468 = vmatprep.subr.bf16.mxu0 %v7238_v29  ;;  %v6283_v29 = vpop.f32.mrb[12].mxu1  ;;  %v7322_v27 = vld [vmem:[%s9667_s3 + $0xff0] ss:$12 sps:$4 sm:$0xff]  }
 0x1e3   :  { %6474 = vmatpush3.bf16.msra.mxu1 %v7240_v35  ;;  %v6284_v35 = vpop.f32.mrb[13].mxu1 }
 0x1e4   :  { %4469 = vmatpush1.bf16.msra.mxu0 %v7236_v32  ;;  %6475 = vmatprep.subr.bf16.mxu1 %v7244_v31  ;;  %v7292_v32 = vld [vmem:[%s9667_s3 + $0x1118] ss:$12 sps:$4 sm:$0xff]   ;;  %v6285_v31 = vadd.f32 %v6284_v35, %v6283_v29 }
 0x1e5   :  { %4470 = vmatprep.subr.bf16.mxu0 %v7243_v33  ;;  %v7296_v33 = vld [vmem:[%s9667_s3 + $0x11f0] ss:$12 sps:$4 sm:$0xff]  }
 0x1e7   :  { %6476 = vmatpush3.bf16.msra.mxu1 %v7245_v41 }
 0x1e8   :  { %4471 = vmatpush1.bf16.msra.mxu0 %v7241_v40  ;;  %6477 = vmatprep.subr.bf16.mxu1 %v7249_v42  ;;  %v6286_v40 = vpop.f32.mrb[14].mxu1 }
 0x1e9   :  { %4472 = vmatprep.subr.bf16.mxu0 %v7248_v37  ;;  %v6287_v41 = vpop.f32.mrb[15].mxu1  ;;  %v4691_v37 = vadd.f32 %v6285_v31, %v4651_v8  ;;  %v7328_v31 = vld [vmem:[%s9667_s3 + $0x1020] ss:$12 sps:$4 sm:$0xff]   ;;  %v7333_v40 = vld [vmem:[%s9667_s3 + $0x103c] ss:$12 sps:$4 sm:$0xff]  }
 0x1ea   :  { %v6305_v42 = vpop.f32.mrb[16].mxu1  ;;  %v7331_v41 = vld [vmem:[%s9667_s3 + $0x1038] ss:$12 sps:$4 sm:$0xff]  }
 0x1eb   :  { %6478 = vmatpush3.bf16.msra.mxu1 %v7250_v46  ;;  %v7297_v46 = vld [vmem:[%s9667_s3 + $0x1130] ss:$12 sps:$4 sm:$0xff]  }
 0x1ec   :  { %4473 = vmatpush1.bf16.msra.mxu0 %v7246_v45  ;;  %6479 = vmatprep.subr.bf16.mxu1 %v7254_v47  ;;  %v7293_v45 = vld [vmem:[%s9667_s3 + $0xf48] ss:$12 sps:$4 sm:$0xff]   ;;  %v7302_v47 = vld [vmem:[%s9667_s3 + $0xf64] ss:$12 sps:$4 sm:$0xff]  }
 0x1ed   :  { %4474 = vmatprep.subr.bf16.mxu0 %v7253_v34  ;;  %v6306_v34 = vpop.f32.mrb[17].mxu1 }
 0x1ef   :  { %6480 = vmatpush3.bf16.msra.mxu1 %v7255_v52  ;;  %v6308_v52 = vpop.f32.mrb[18].mxu1 }
 0x1f0   :  { %4475 = vmatpush1.bf16.msra.mxu0 %v7251_v50  ;;  %6487 = vmatprep.subr.bf16.mxu1 %v7261_v44  ;;  %v6307_v50 = vadd.f32 %v6306_v34, %v6305_v42  ;;  %v9291_v44 = vcombine.low %v9171_v55, %v9171_v55  ;;  %v7306_v55 = vld [vmem:[%s9667_s3 + $0xf7c] ss:$12 sps:$4 sm:$0xff]   ;;  %v7342_v34 = vld [vmem:[%s9667_s3 + $0x1084] ss:$12 sps:$4 sm:$0xff]  }
 0x1f1   :  { %4476 = vmatprep.subr.bf16.mxu0 %v7260_v53  ;;  %v6309_v53 = vpop.f32.mrb[19].mxu1  ;;  %v7334_v42 = vld [vmem:[%s9667_s3 + $0x1050] ss:$12 sps:$4 sm:$0xff]   ;;  %v7343_v52 = vld [vmem:[%s9667_s3 + $0x1098] ss:$12 sps:$4 sm:$0xff]  }
 0x1f2   :  { %5049 = vmatmul.mubr.bf16.vlgmr.msra.gmra.mrb[48].mxu1 %v9166_v49  ;;  %v7348_v53 = vld [vmem:[%s9667_s3 + $0x10b4] ss:$12 sps:$4 sm:$0xff]  }
 0x1f3   :  { %6488 = vmatpush3.bf16.msra.mxu1 %v7262_v57  ;;  %5088 = vmatprep.mubr.bf16.mxu1 %v9187_v59  ;;  %v6327_v57 = vpop.f32.mrb[20].mxu1 }
 0x1f4   :  { %4477 = vmatpush1.bf16.msra.mxu0 %v7258_v56  ;;  %6489 = vmatprep.subr.bf16.mxu1 %v7266_v58  ;;  %v4731_v56 = vadd.f32 %v6307_v50, %v4691_v37  ;;  %v7303_v58 = vld [vmem:[%s9667_s3 + $0x1208] ss:$12 sps:$4 sm:$0xff]  }
 0x1f5   :  { %4478 = vmatprep.subr.bf16.mxu0 %v7265_v51  ;;  %v7300_v51 = vld [vmem:[%s9667_s3 + $0xf60] ss:$12 sps:$4 sm:$0xff]   ;;  %v7345_v50 = vld [vmem:[%s9667_s3 + $0x109c] ss:$12 sps:$4 sm:$0xff]  }
 0x1f6   :  { %v7336_v37 = vld [vmem:[%s9667_s3 + $0x1054] ss:$12 sps:$4 sm:$0xff]  }
 0x1f7   :  { %6490 = vmatpush3.bf16.msra.mxu1 %v7267_v19  ;;  %v7454_v19 = vmov 0.0  }
 0x1f8   :  { %4479 = vmatpush1.bf16.msra.mxu0 %v7263_v60  ;;  %6491 = vmatprep.subr.bf16.mxu1 %v7271_v62  ;;  %v6328_v60 = vpop.f32.mrb[21].mxu1 }
 0x1f9   :  { %4480 = vmatprep.subr.bf16.mxu0 %v7270_v61  ;;  %v6329_v61 = vadd.f32 %v6328_v60, %v6327_v57  ;;  %v6330_v62 = vpop.f32.mrb[22].mxu1  ;;  %v7351_v60 = vld [vmem:[%s9667_s3 + $0x10cc] ss:$12 sps:$4 sm:$0xff]  }
 0x1fa   :  { %v7354_v62 = vld [vmem:[%s9667_s3 + $0x10e4] ss:$12 sps:$4 sm:$0xff]  }
 0x1fb   :  { %6492 = vmatpush3.bf16.msra.mxu1 %v7272_v63  ;;  %v4771_v63 = vadd.f32 %v6329_v61, %v4731_v56  ;;  %v7349_v61 = vld [vmem:[%s9667_s3 + $0x10c8] ss:$12 sps:$4 sm:$0xff]  }
 0x1fc   :  { %4481 = vmatpush1.bf16.msra.mxu0 %v7268_v54  ;;  %6493 = vmatprep.subr.bf16.mxu1 %v7276_v20  ;;  %v6331_v54 = vpop.f32.mrb[23].mxu1  ;;  %v7304_v20 = vld [vmem:[%s9667_s3 + $0xf78] ss:$12 sps:$4 sm:$0xff]  }
 0x1fd   :  { %4482 = vmatprep.subr.bf16.mxu0 %v7275_v1  ;;  %v7352_v54 = vld [vmem:[%s9667_s3 + $0x10e0] ss:$12 sps:$4 sm:$0xff]  }
 0x1ff   :  { %6494 = vmatpush3.bf16.msra.mxu1 %v7277_v36 }
 0x200   :  { %4483 = vmatpush1.bf16.msra.mxu0 %v7273_v5  ;;  %6495 = vmatprep.subr.bf16.mxu1 %v7281_v6  ;;  %v7310_v5 = vld [vmem:[%s9667_s3 + $0xf94] ss:$12 sps:$4 sm:$0xff]  }
 0x201   :  { %4493 = vmatprep.subr.bf16.mxu0 %v7280_v43 }
 0x203   :  { %4485 = vmatmul.mubr.bf16.vlgmr.msra.gmra.mrb[0].mxu0 %v9055_v48  ;;  %6496 = vmatpush3.bf16.msra.mxu1 %v7282_v11  ;;  %v7290_v48 = vld [vmem:[%s9667_s3 + $0xf34] ss:$12 sps:$4 sm:$0xff]   ;;  %v7311_v11 = vld [vmem:[%s9667_s3 + $0x1238] ss:$12 sps:$4 sm:$0xff]  }
 0x204   :  { %4494 = vmatpush1.bf16.msra.mxu0 %v7278_v10  ;;  %6497 = vmatprep.subr.bf16.mxu1 %v7286_v13  ;;  %v7308_v10 = vld [vmem:[%s9667_s3 + $0xf90] ss:$12 sps:$4 sm:$0xff]   ;;  %v7312_v13 = vld [vmem:[%s9667_s3 + $0xfa8] ss:$12 sps:$4 sm:$0xff]  }
 0x205   :  { %4495 = vmatprep.subr.bf16.mxu0 %v7285_v12  ;;  %4525 = vmatprep.mubr.bf16.mxu0 %v9076_v17  ;;  %v7295_v17 = vld [vmem:[%s9667_s3 + $0xf4c] ss:$12 sps:$4 sm:$0xff]   ;;  %v6349_v1 = vpop.f32.mrb[24].mxu1 }
 0x206   :  { %v6350_v4 = vpop.f32.mrb[25].mxu1  ;;  %v7314_v12 = vld [vmem:[%s9667_s3 + $0xfac] ss:$12 sps:$4 sm:$0xff]  }
 0x207   :  { %6498 = vmatpush3.bf16.msra.mxu1 %v7287_v21  ;;  %v6351_v36 = vadd.f32 %v6350_v4, %v6349_v1  ;;  %v6352_v43 = vpop.f32.mrb[26].mxu1  ;;  %v7316_v21 = vld [vmem:[%s9667_s3 + $0xfc0] ss:$12 sps:$4 sm:$0xff]   ;;  %v7355_v1 = vld [vmem:[%s9667_s3 + $0x10f8] ss:$12 sps:$4 sm:$0xff]  }
 0x208   :  { %4496 = vmatpush1.bf16.msra.mxu0 %v7283_v15  ;;  %6499 = vmatprep.subr.bf16.mxu1 %v7291_v24  ;;  %v6353_v6 = vpop.f32.mrb[27].mxu1  ;;  %v7315_v15 = vld [vmem:[%s9667_s3 + $0x1250] ss:$12 sps:$4 sm:$0xff]   ;;  %v7319_v24 = vld [vmem:[%s9667_s3 + $0xfd8] ss:$12 sps:$4 sm:$0xff]  }
 0x209   :  { %4497 = vmatprep.subr.bf16.mxu0 %v7290_v48  ;;  %v4811_v9 = vadd.f32 %v6351_v36, %v4771_v63  ;;  %v7452_v48 = vld [vmem:[%s9668_s0 + $0x60] ss:$0 sps:$4 sm:$0xff]   ;;  %v7357_v63 = vld [vmem:[%s9667_s3 + $0x10fc] ss:$12 sps:$4 sm:$0xff]   ;;  %v7363_v4 = vld [vmem:[%s9667_s3 + $0x112c] ss:$12 sps:$4 sm:$0xff]  }
 0x20a   :  { %v7366_v36 = vld [vmem:[%s9667_s3 + $0x1144] ss:$12 sps:$4 sm:$0xff]   ;;  %v7364_v43 = vld [vmem:[%s9667_s3 + $0x1140] ss:$12 sps:$4 sm:$0xff]   ;;  %v7369_v6 = vld [vmem:[%s9667_s3 + $0x115c] ss:$12 sps:$4 sm:$0xff]  }
 0x20b   :  { %6500 = vmatpush3.bf16.msra.mxu1 %v7292_v32 }
 0x20c   :  { %4498 = vmatpush1.bf16.msra.mxu0 %v7288_v30  ;;  %6501 = vmatprep.subr.bf16.mxu1 %v7296_v33  ;;  %v7327_v30 = vld [vmem:[%s9667_s3 + $0x100c] ss:$12 sps:$4 sm:$0xff]   ;;  %v7330_v33 = vld [vmem:[%s9667_s3 + $0x1024] ss:$12 sps:$4 sm:$0xff]  }
 0x20d   :  { %4499 = vmatprep.subr.bf16.mxu0 %v7295_v17  ;;  %v7325_v17 = vld [vmem:[%s9667_s3 + $0x1008] ss:$12 sps:$4 sm:$0xff]  }
 0x20f   :  { %6502 = vmatpush3.bf16.msra.mxu1 %v7297_v46  ;;  %v7337_v46 = vld [vmem:[%s9667_s3 + $0x1068] ss:$12 sps:$4 sm:$0xff]  }
 0x210   :  { %4500 = vmatpush1.bf16.msra.mxu0 %v7293_v45  ;;  %6514 = vmatprep.subr.bf16.mxu1 %v7454_v19  ;;  %v7339_v45 = vld [vmem:[%s9667_s3 + $0x106c] ss:$12 sps:$4 sm:$0xff]  }
 0x211   :  { %4501 = vmatprep.subr.bf16.mxu0 %v7302_v47  ;;  %v7340_v47 = vld [vmem:[%s9667_s3 + $0x1080] ss:$12 sps:$4 sm:$0xff]  }
 0x212   :  { %5089 = vmatmul.mubr.bf16.vlgmr.msra.gmra.mrb[52].mxu1 %v9291_v44 }
 0x213   :  { %6515 = vmatpush3.bf16.msra.mxu1 %v7303_v58  ;;  %6522 = vmatprep.mubr.msk.bf16.mxu1 %vm7455_vm1, %v7454_v19 }
 0x214   :  { %4502 = vmatpush1.bf16.msra.mxu0 %v7300_v51  ;;  %6516 = vmatprep.subr.bf16.mxu1 %v7454_v19  ;;  %v7346_v51 = vld [vmem:[%s9667_s3 + $0x10b0] ss:$12 sps:$4 sm:$0xff]  }
 0x215   :  { %4503 = vmatprep.subr.bf16.mxu0 %v7306_v55  ;;  %v48_v55 = vld [vmem:[%s9670_s2] sm:$0xff] }
 0x216   :  { %51 = vperm.xlu0 %6578, %v48_v55  }
 0x217   :  { %6517 = vmatpush3.bf16.msra.mxu1 %v7307_v3  ;;  %v7358_v3 = vld [vmem:[%s9667_s3 + $0x1110] ss:$12 sps:$4 sm:$0xff]  }
 0x218   :  { %4504 = vmatpush1.bf16.msra.mxu0 %v7304_v20  ;;  %6518 = vmatprep.subr.bf16.mxu1 %v7454_v19  ;;  %v7360_v20 = vld [vmem:[%s9667_s3 + $0x1114] ss:$12 sps:$4 sm:$0xff]  }
 0x219   :  { %4505 = vmatprep.subr.bf16.mxu0 %v7310_v5  ;;  %v7361_v5 = vld [vmem:[%s9667_s3 + $0x1128] ss:$12 sps:$4 sm:$0xff]  }
 0x21b   :  { %6519 = vmatpush3.bf16.msra.mxu1 %v7311_v11 }
 0x21c   :  { %4506 = vmatpush1.bf16.msra.mxu0 %v7308_v10  ;;  %6520 = vmatprep.subr.bf16.mxu1 %v7454_v19  ;;  %v7372_v10 = vld [vmem:[%s9667_s3 + $0x1174] ss:$12 sps:$4 sm:$0xff]  }
 0x21d   :  { %4507 = vmatprep.subr.bf16.mxu0 %v7314_v12 }
 0x21f   :  { %6521 = vmatpush3.bf16.msra.mxu1 %v7315_v15 }
 0x220   :  { %4508 = vmatpush1.bf16.msra.mxu0 %v7312_v13  ;;  %v7370_v13 = vld [vmem:[%s9667_s3 + $0x1170] ss:$12 sps:$4 sm:$0xff]  }
 0x221   :  { %4509 = vmatprep.subr.bf16.mxu0 %v7318_v16 }
 0x222   :  { %6523 = vmatmul.mubr.msk.bf16.vlgmr.msra.gmra.mrb[56].mxu1 %vm4079_vm0, %v7452_v48 }
 0x224   :  { %4510 = vmatpush1.bf16.msra.mxu0 %v7316_v21  ;;  %v7375_v21 = vld [vmem:[%s9667_s3 + $0x118c] ss:$12 sps:$4 sm:$0xff]  }
 0x225   :  { %4511 = vmatprep.subr.bf16.mxu0 %v7321_v23  ;;  %v6371_v26 = vpop.f32.mrb[28].mxu1 }
 0x226   :  { %v6372_v38 = vpop.f32.mrb[29].mxu1 }
 0x227   :  { %v6373_v8 = vadd.f32 %v6372_v38, %v6371_v26  ;;  %v6374_v29 = vpop.f32.mrb[30].mxu1  ;;  %v7376_v26 = vld [vmem:[%s9667_s3 + $0x11a0] ss:$12 sps:$4 sm:$0xff]   ;;  %v7381_v38 = vld [vmem:[%s9667_s3 + $0x11bc] ss:$12 sps:$4 sm:$0xff]  }
 0x228   :  { %4512 = vmatpush1.bf16.msra.mxu0 %v7319_v24  ;;  %v6375_v32 = vpop.f32.mrb[31].mxu1  ;;  %v7373_v24 = vld [vmem:[%s9667_s3 + $0x1188] ss:$12 sps:$4 sm:$0xff]   ;;  %v7382_v29 = vld [vmem:[%s9667_s3 + $0x11d0] ss:$12 sps:$4 sm:$0xff]  }
 0x229   :  { %4513 = vmatprep.subr.bf16.mxu0 %v7324_v25  ;;  %v4851_v35 = vadd.f32 %v6373_v8, %v4811_v9  ;;  %v7367_v9 = vld [vmem:[%s9667_s3 + $0x1158] ss:$12 sps:$4 sm:$0xff]   ;;  %v7384_v8 = vld [vmem:[%s9667_s3 + $0x11d4] ss:$12 sps:$4 sm:$0xff]  }
 0x22a   :  { %v7378_v25 = vld [vmem:[%s9667_s3 + $0x11a4] ss:$12 sps:$4 sm:$0xff]   ;;  %v7388_v32 = vld [vmem:[%s9671_s5] ss:$12 sps:$4 sm:$0xff]  }
 0x22c   :  { %4514 = vmatpush1.bf16.msra.mxu0 %v7322_v27  ;;  %v7379_v27 = vld [vmem:[%s9667_s3 + $0x11b8] ss:$12 sps:$4 sm:$0xff]  }
 0x22d   :  { %4515 = vmatprep.subr.bf16.mxu0 %v7327_v30  ;;  %v7387_v30 = vld [vmem:[%s9667_s3 + $0x11ec] ss:$12 sps:$4 sm:$0xff]  }
 0x230   :  { %4516 = vmatpush1.bf16.msra.mxu0 %v7325_v17  ;;  %v7393_v17 = vld [vmem:[%s9671_s5 + $0x1c] ss:$12 sps:$4 sm:$0xff]  }
 0x231   :  { %4517 = vmatprep.subr.bf16.mxu0 %v7330_v33  ;;  %v7385_v33 = vld [vmem:[%s9667_s3 + $0x11e8] ss:$12 sps:$4 sm:$0xff]  }
 0x234   :  { %4518 = vmatpush1.bf16.msra.mxu0 %v7328_v31  ;;  %v7391_v31 = vld [vmem:[%s9671_s5 + $0x18] ss:$12 sps:$4 sm:$0xff]  }
 0x235   :  { %4519 = vmatprep.subr.bf16.mxu0 %v7333_v40  ;;  %v7396_v40 = vld [vmem:[%s9671_s5 + $0x34] ss:$12 sps:$4 sm:$0xff]  }
 0x238   :  { %4520 = vmatpush1.bf16.msra.mxu0 %v7331_v41  ;;  %v7394_v41 = vld [vmem:[%s9671_s5 + $0x30] ss:$12 sps:$4 sm:$0xff]  }
 0x239   :  { %4521 = vmatprep.subr.bf16.mxu0 %v7336_v37  ;;  %v7399_v37 = vld [vmem:[%s9671_s5 + $0x4c] ss:$12 sps:$4 sm:$0xff]  }
 0x23c   :  { %4522 = vmatpush1.bf16.msra.mxu0 %v7334_v42  ;;  %v7397_v42 = vld [vmem:[%s9671_s5 + $0x48] ss:$12 sps:$4 sm:$0xff]  }
 0x23d   :  { %4523 = vmatprep.subr.bf16.mxu0 %v7339_v45  ;;  %v7402_v45 = vld [vmem:[%s9671_s5 + $0x64] ss:$12 sps:$4 sm:$0xff]  }
 0x240   :  { %4524 = vmatpush1.bf16.msra.mxu0 %v7337_v46 }
 0x241   :  { %4534 = vmatprep.subr.bf16.mxu0 %v7342_v34  ;;  %v7400_v34 = vld [vmem:[%s9671_s5 + $0x60] ss:$12 sps:$4 sm:$0xff]  }
 0x243   :  { %4526 = vmatmul.mubr.bf16.vlgmr.msra.gmra.mrb[0].mxu0 %v9166_v49 }
 0x244   :  { %4535 = vmatpush1.bf16.msra.mxu0 %v7340_v47  ;;  %4566 = vmatprep.mubr.bf16.mxu0 %v9187_v59 }
 0x245   :  { %4536 = vmatprep.subr.bf16.mxu0 %v7345_v50  ;;  %v6393_v56 = vpop.f32.mrb[32].mxu1  ;;  %v7405_v50 = vld [vmem:[%s9671_s5 + $0x7c] ss:$12 sps:$4 sm:$0xff]  }
 0x246   :  { %v6394_v57 = vpop.f32.mrb[33].mxu1 }
 0x247   :  { %v6395_v49 = vadd.f32 %v6394_v57, %v6393_v56  ;;  %v6396_v58 = vpop.f32.mrb[34].mxu1  ;;  %v7403_v57 = vld [vmem:[%s9671_s5 + $0x78] ss:$12 sps:$4 sm:$0xff]  }
 0x248   :  { %4537 = vmatpush1.bf16.msra.mxu0 %v7343_v52  ;;  %v6397_v59 = vpop.f32.mrb[35].mxu1  ;;  %v7411_v58 = vld [vmem:[%s9671_s5 + $0xac] ss:$12 sps:$4 sm:$0xff]  }
 0x249   :  { %4538 = vmatprep.subr.bf16.mxu0 %v7348_v53  ;;  %v4891_v19 = vadd.f32 %v6395_v49, %v4851_v35  ;;  %v7390_v35 = vld [vmem:[%s9671_s5 + $0x4] ss:$12 sps:$4 sm:$0xff]  }
 0x24a   :  { %5399 = vmatprep.subr.bf16.mxu1 %v7390_v35  ;;  %v7406_v49 = vld [vmem:[%s9671_s5 + $0x90] ss:$12 sps:$4 sm:$0xff]  }
 0x24b   :  { %5400 = vmatpush1.bf16.msra.mxu1 %v7388_v32 }
 0x24c   :  { %4539 = vmatpush1.bf16.msra.mxu0 %v7346_v51  ;;  %5401 = vmatprep.subr.bf16.mxu1 %v7393_v17  ;;  %v7408_v51 = vld [vmem:[%s9671_s5 + $0x94] ss:$12 sps:$4 sm:$0xff]   ;;  %v843_v17 = vsub.s32 0, %v9243_v14 }
 0x24d   :  { %4540 = vmatprep.subr.bf16.mxu0 %v7351_v60  ;;  %v7409_v60 = vld [vmem:[%s9671_s5 + $0xa8] ss:$12 sps:$4 sm:$0xff]  }
 0x24f   :  { %5402 = vmatpush1.bf16.msra.mxu1 %v7391_v31  ;;  %v844_v31 = vrot.slane %v9256_v7, %v843_v17 }
 0x250   :  { %4541 = vmatpush1.bf16.msra.mxu0 %v7349_v61  ;;  %5403 = vmatprep.subr.bf16.mxu1 %v7396_v40 }
 0x251   :  { %4542 = vmatprep.subr.bf16.mxu0 %v7354_v62 }
 0x253   :  { %5404 = vmatpush1.bf16.msra.mxu1 %v7394_v41  ;;  %v6526_v41 = vadd.f32 %v8920_v28, %v844_v31 }
 0x254   :  { %4543 = vmatpush1.bf16.msra.mxu0 %v7352_v54  ;;  %5405 = vmatprep.subr.bf16.mxu1 %v7399_v37 }
 0x255   :  { %4544 = vmatprep.subr.bf16.mxu0 %v7357_v63 }
 0x257   :  { %5406 = vmatpush1.bf16.msra.mxu1 %v7397_v42 }
 0x258   :  { %4545 = vmatpush1.bf16.msra.mxu0 %v7355_v1  ;;  %5407 = vmatprep.subr.bf16.mxu1 %v7402_v45 }
 0x259   :  { %4546 = vmatprep.subr.bf16.mxu0 %v7360_v20 }
 0x25b   :  { %5408 = vmatpush1.bf16.msra.mxu1 %v7400_v34 }
 0x25c   :  { %4547 = vmatpush1.bf16.msra.mxu0 %v7358_v3  ;;  %5409 = vmatprep.subr.bf16.mxu1 %v7405_v50 }
 0x25d   :  { %4548 = vmatprep.subr.bf16.mxu0 %v7363_v4 }
 0x25f   :  { %5410 = vmatpush1.bf16.msra.mxu1 %v7403_v57  ;;  %v7429_v57 = vld [vmem:[%s9671_s5 + $0x80] ss:$12 sps:$4 sm:$0xff]  }
 0x260   :  { %4549 = vmatpush1.bf16.msra.mxu0 %v7361_v5  ;;  %5411 = vmatprep.subr.bf16.mxu1 %v7408_v51  ;;  %v7430_v51 = vld [vmem:[%s9671_s5 + $0x98] ss:$12 sps:$4 sm:$0xff]  }
 0x261   :  { %4550 = vmatprep.subr.bf16.mxu0 %v7366_v36  ;;  %v7414_v36 = vld [vmem:[%s9671_s5 + $0xc4] ss:$12 sps:$4 sm:$0xff]  }
 0x263   :  { %5412 = vmatpush1.bf16.msra.mxu1 %v7406_v49  ;;  %v7431_v49 = vld [vmem:[%s9671_s5 + $0xb0] ss:$12 sps:$4 sm:$0xff]  }
 0x264   :  { %4551 = vmatpush1.bf16.msra.mxu0 %v7364_v43  ;;  %5413 = vmatprep.subr.bf16.mxu1 %v7411_v58  ;;  %v7412_v43 = vld [vmem:[%s9671_s5 + $0xc0] ss:$12 sps:$4 sm:$0xff]   ;;  %v7432_v58 = vld [vmem:[%s9671_s5 + $0xc8] ss:$12 sps:$4 sm:$0xff]  }
 0x265   :  { %4552 = vmatprep.subr.bf16.mxu0 %v7369_v6  ;;  %v6415_v11 = vpop.f32.mrb[36].mxu1  ;;  %v7417_v6 = vld [vmem:[%s9671_s5 + $0xdc] ss:$12 sps:$4 sm:$0xff]  }
 0x266   :  { %v6416_v12 = vpop.f32.mrb[37].mxu1 }
 0x267   :  { %v6417_v15 = vadd.f32 %v6416_v12, %v6415_v11  ;;  %v6418_v16 = vpop.f32.mrb[38].mxu1  ;;  %5414 = vmatpush1.bf16.msra.mxu1 %v7409_v60  ;;  %v7418_v11 = vld [vmem:[%s9671_s5 + $0xf0] ss:$12 sps:$4 sm:$0xff]   ;;  %v7423_v12 = vld [vmem:[%s9671_s5 + $0x10c] ss:$12 sps:$4 sm:$0xff]  }
 0x268   :  { %4553 = vmatpush1.bf16.msra.mxu0 %v7367_v9  ;;  %v6419_v23 = vpop.f32.mrb[39].mxu1  ;;  %5415 = vmatprep.subr.bf16.mxu1 %v7414_v36  ;;  %v7415_v9 = vld [vmem:[%s9671_s5 + $0xd8] ss:$12 sps:$4 sm:$0xff]   ;;  %v7421_v16 = vld [vmem:[%s9671_s5 + $0x108] ss:$12 sps:$4 sm:$0xff]  }
 0x269   :  { %4554 = vmatprep.subr.bf16.mxu0 %v7372_v10  ;;  %v4931_v48 = vadd.f32 %v6417_v15, %v4891_v19  ;;  %v7420_v10 = vld [vmem:[%s9671_s5 + $0xf4] ss:$12 sps:$4 sm:$0xff]  }
 0x26a   :  { %v47_v15 = vld [vmem:[%s9672_s1] sm:$0xff]  ;;  %s7456_s1 = smov 64  }
 0x26b   :  { %5416 = vmatpush1.bf16.msra.mxu1 %v7412_v43  ;;  %v7433_v60 = vld [vmem:[%s9671_s5 + $0xe0] ss:$12 sps:$4 sm:$0xff]  }
 0x26c   :  { %4555 = vmatpush1.bf16.msra.mxu0 %v7370_v13  ;;  %5417 = vmatprep.subr.bf16.mxu1 %v7417_v6 }
 0x26d   :  { %4556 = vmatprep.subr.bf16.mxu0 %v7375_v21 }
 0x26f   :  { %5418 = vmatpush1.bf16.msra.mxu1 %v7415_v9 }
 0x270   :  { %4557 = vmatpush1.bf16.msra.mxu0 %v7373_v24  ;;  %5419 = vmatprep.subr.bf16.mxu1 %v7420_v10 }
 0x271   :  { %4558 = vmatprep.subr.bf16.mxu0 %v7378_v25 }
 0x273   :  { %5420 = vmatpush1.bf16.msra.mxu1 %v7418_v11 }
 0x274   :  { %4559 = vmatpush1.bf16.msra.mxu0 %v7376_v26  ;;  %5421 = vmatprep.subr.bf16.mxu1 %v7423_v12 }
 0x275   :  { %4560 = vmatprep.subr.bf16.mxu0 %v7381_v38 }
 0x277   :  { %5422 = vmatpush1.bf16.msra.mxu1 %v7421_v16 }
 0x278   :  { %4561 = vmatpush1.bf16.msra.mxu0 %v7379_v27  ;;  %5440 = vmatprep.subr.bf16.mxu1 %v7453_v22 }
 0x279   :  { %4562 = vmatprep.subr.bf16.mxu0 %v7384_v8 }
 0x27c   :  { %4563 = vmatpush1.bf16.msra.mxu0 %v7382_v29 }
 0x27d   :  { %4564 = vmatprep.subr.bf16.mxu0 %v7387_v30 }
 0x280   :  { %4565 = vmatpush1.bf16.msra.mxu0 %v7385_v33  ;;  %v847_v33 = vsub.s32 1, %v9243_v14 }
 0x282   :  { %v848_v40 = vrot.slane %v9256_v7, %v847_v33  ;;  %v7424_v7 = vld [vmem:[%s9671_s5 + $0x8] ss:$12 sps:$4 sm:$0xff]  }
 0x283   :  { %4567 = vmatmul.mubr.bf16.vlgmr.msra.gmra.mrb[0].mxu0 %v9291_v44 }
 0x284   :  { %v6529_v37 = vadd.f32 %v8937_v39, %v848_v40  ;;  %v7425_v39 = vld [vmem:[%s9671_s5 + $0x20] ss:$12 sps:$4 sm:$0xff]  }
 0x285   :  { %v6437_v46 = vpop.f32.mrb[40].mxu1 }
 0x286   :  { %v6438_v47 = vpop.f32.mrb[41].mxu1 }
 0x287   :  { %v6439_v52 = vadd.f32 %v6438_v47, %v6437_v46  ;;  %v6440_v53 = vpop.f32.mrb[42].mxu1 }
 0x288   :  { %v6441_v44 = vpop.f32.mrb[43].mxu1 }
 0x289   :  { %v4971_v56 = vadd.f32 %v6439_v52, %v4931_v48 }
 0x295   :  { %v52_v13 = vpop.permute.xlu0 %51 }
 0x296   :  { %v9556_v21 = vmul.f32 %v52_v13, %v47_v15 }
 0x298   :  { %v5138_v23 = vpack.c.bf16 %v9556_v21, %v9556_v21 }
 0x29a   :  { %6242 = vmatprep.mubr.msk.bf16.mxu1 %vm4079_vm0, %v5138_v23 }
 0x2a5   :  { %v6459_v59 = vpop.f32.mrb[44].mxu1 }
 0x2a6   :  { %v6460_v19 = vpop.f32.mrb[45].mxu1 }
 0x2a7   :  { %v6461_v55 = vadd.f32 %v6460_v19, %v6459_v59  ;;  %v6462_v61 = vpop.f32.mrb[46].mxu1  ;;  %v7434_v59 = vld [vmem:[%s9671_s5 + $0xf8] ss:$12 sps:$4 sm:$0xff]   ;;  %v7435_v19 = vld [vmem:[%s9671_s5 + $0x110] ss:$12 sps:$4 sm:$0xff]  }
 0x2a8   :  { %v6463_v62 = vpop.f32.mrb[47].mxu1 }
 0x2a9   :  { %v5011_v54 = vadd.f32 %v6461_v55, %v4971_v56  ;;  %v7428_v56 = vld [vmem:[%s9671_s5 + $0x68] ss:$12 sps:$4 sm:$0xff]   ;;  %v5187_v55 = vld [vmem:[%s9673_s6] sm:$0x7]  ;;  %s7458_s6 = smov 96  }
 0x2aa   :  { %v5196_v61 = vrot.slane %v5187_v55, %v847_v33 }
 0x2c5   :  { %v6481_v63 = vpop.f32.mrb[48].mxu1 }
 0x2c6   :  { %v6482_v1 = vpop.f32.mrb[49].mxu1 }
 0x2c7   :  { %v6483_v20 = vadd.f32 %v6482_v1, %v6481_v63  ;;  %v6484_v3 = vpop.f32.mrb[50].mxu1 }
 0x2c8   :  { %v6485_v4 = vpop.f32.mrb[51].mxu1  ;;  %v5200_v3 = vrot.slane %v5187_v55, %v851_v18 }
 0x2c9   :  { %v5051_v5 = vadd.f32 %v6483_v20, %v5011_v54 }
 0x2e5   :  { %v6503_v48 = vpop.f32.mrb[52].mxu1 }
 0x2e6   :  { %v6504_v24 = vpop.f32.mrb[53].mxu1 }
 0x2e7   :  { %v6505_v25 = vadd.f32 %v6504_v24, %v6503_v48  ;;  %v6506_v26 = vpop.f32.mrb[54].mxu1 }
 0x2e8   :  { %v6507_v38 = vpop.f32.mrb[55].mxu1  ;;  %v5192_v26 = vrot.slane %v5187_v55, %v843_v17 }
 0x2e9   :  { %v5091_v27 = vadd.f32 %v6505_v25, %v5051_v5 }
 0x2f5   :  { %v5130_v8 = vpop.f32.mrb[56].mxu1 }
 0x2f6   :  { %v9562_v29 = vadd.f32 %v5130_v8, %v5091_v27  ;;  %v6524_v30 = vpop.f32.mrb[57].mxu1 }
 0x2f7   :  { %v5133_v32 = vpop.f32.mrb[58].mxu1 }
 0x2f8   :  { %v6525_v35 = vpop.f32.mrb[59].mxu1 }
 0x356   :  { %v4568_v42 = vpop.f32.mrb[0].mxu0 }
 0x357   :  { %v6527_v45 = vadd.f32 %v6526_v41, %v4568_v42  ;;  %v4570_v46 = vpop.f32.mrb[1].mxu0 }
 0x358   :  { %v6530_v34 = vadd.f32 %v6529_v37, %v4570_v46  ;;  %v4572_v47 = vpop.f32.mrb[2].mxu0 }
 0x359   :  { %v6528_v50 = vadd.f32 %v6527_v45, %v9209_v0  ;;  %v4573_v52 = vpop.f32.mrb[3].mxu0  ;;  %v7426_v0 = vld [vmem:[%s9671_s5 + $0x38] ss:$12 sps:$4 sm:$0xff]  }
 0x35a   :  { %v9574_v53 = vadd.f32 %v6530_v34, %v9217_v2  ;;  %v7427_v2 = vld [vmem:[%s9671_s5 + $0x50] ss:$12 sps:$4 sm:$0xff]   ;;  %s7457_s5 = smov 32  }
 0x35b   :  { %7436 = vtanh.f32 %v6528_v50 }
 0x365   :  { %v7437_v44 = vpop.eup %7436 }
 0x366   :  { %v5137_v28 = vpack.c.bf16 %v7437_v44, %v7437_v44 }
 0x368   :  { %5432 = vmatmul.mubr.bf16.vlgmr.msra.gmra.mrb[60].mxu1 %v5137_v28 }
 0x369   :  { %5441 = vmatpush1.bf16.msra.mxu1 %v7424_v7  ;;  %6243 = vmatprep.mubr.msk.bf16.mxu1 %vm4079_vm0, %v5138_v23 }
 0x36a   :  { %5442 = vmatprep.subr.bf16.mxu1 %v7453_v22 }
 0x36d   :  { %5443 = vmatpush1.bf16.msra.mxu1 %v7425_v39 }
 0x36e   :  { %5444 = vmatprep.subr.bf16.mxu1 %v7453_v22 }
 0x371   :  { %5445 = vmatpush1.bf16.msra.mxu1 %v7426_v0 }
 0x372   :  { %5446 = vmatprep.subr.bf16.mxu1 %v7453_v22 }
 0x375   :  { %5447 = vmatpush1.bf16.msra.mxu1 %v7427_v2 }
 0x376   :  { %5448 = vmatprep.subr.bf16.mxu1 %v7453_v22 }
 0x379   :  { %5449 = vmatpush1.bf16.msra.mxu1 %v7428_v56 }
 0x37a   :  { %5450 = vmatprep.subr.bf16.mxu1 %v7453_v22 }
 0x37d   :  { %5451 = vmatpush1.bf16.msra.mxu1 %v7429_v57 }
 0x37e   :  { %5452 = vmatprep.subr.bf16.mxu1 %v7453_v22 }
 0x381   :  { %5453 = vmatpush1.bf16.msra.mxu1 %v7430_v51 }
 0x382   :  { %5454 = vmatprep.subr.bf16.mxu1 %v7453_v22 }
 0x385   :  { %5455 = vmatpush1.bf16.msra.mxu1 %v7431_v49 }
 0x386   :  { %5456 = vmatprep.subr.bf16.mxu1 %v7453_v22 }
 0x389   :  { %5457 = vmatpush1.bf16.msra.mxu1 %v7432_v58  ;;  %v5575_v58 = vstv %s9675_s8 }
 0x38a   :  { %5458 = vmatprep.subr.bf16.mxu1 %v7453_v22 }
 0x38d   :  { %5459 = vmatpush1.bf16.msra.mxu1 %v7433_v60 }
 0x38e   :  { %5460 = vmatprep.subr.bf16.mxu1 %v7453_v22 }
 0x391   :  { %5461 = vmatpush1.bf16.msra.mxu1 %v7434_v59 }
 0x392   :  { %5462 = vmatprep.subr.bf16.mxu1 %v7453_v22 }
 0x395   :  { %5463 = vmatpush1.bf16.msra.mxu1 %v7435_v19 }
 0x398   :  { %5473 = vmatmul.mubr.bf16.vlgmr.msra.gmra.mrb[64].mxu1 %v5137_v28 }
 0x43b   :  { %v5433_v62 = vpop.f32.mrb[60].mxu1 }
 0x43c   :  { %v5435_v54 = vpop.f32.mrb[61].mxu1  ;;  %v5434_v8 = vadd.f32 %v5433_v62, %v5192_v26 }
 0x43d   :  { %v5436_v63 = vadd.f32 %v5435_v54, %v5196_v61  ;;  %v5437_v1 = vpop.f32.mrb[62].mxu1 }
 0x43e   :  { %v5438_v20 = vpop.f32.mrb[63].mxu1 }
 0x43f   :  { %5489 = vrot.lane.b32.xlu0 %v5436_v63, %s7456_s1  ;;  %v5481_v6 = vadd.f32 %v9574_v53, %v5436_v63 }
 0x441   :  { %v5482_v9 = vsub.f32 0.0, %v5481_v6 }
 0x443   :  { %v5483_v10 = vmul.f32 1.442695, %v5482_v9 }
 0x445   :  { %7438 = vpow2.f32 %v5483_v10 }
 0x44f   :  { %v7439_v11 = vpop.eup %7438 }
 0x450   :  { %v5485_v12 = vadd.f32 1.0, %v7439_v11 }
 0x452   :  { %7440 = vrcp.f32 %v5485_v12 }
 0x45c   :  { %v7441_v13 = vpop.eup %7440 }
 0x45d   :  { %v5499_v35 = vsub.f32 1.0, %v7441_v13 }
 0x46b   :  { %v5474_v4 = vpop.f32.mrb[64].mxu1 }
 0x46c   :  { %v5475_v22 = vadd.f32 %v5474_v4, %v5200_v3  ;;  %v5476_v5 = vpop.f32.mrb[65].mxu1 }
 0x46d   :  { %v5477_v36 = vpop.f32.mrb[66].mxu1 }
 0x46e   :  { %v5478_v43 = vpop.f32.mrb[67].mxu1  ;;  %5519 = vrot.lane.b32.xlu1 %v5475_v22, %s7456_s1  ;;  %v5511_v14 = vadd.f32 %v5475_v22, %v9562_v29 }
 0x470   :  { %v5512_v17 = vsub.f32 0.0, %v5511_v14 }
 0x472   :  { %v5513_v37 = vmul.f32 1.442695, %v5512_v17 }
 0x4b1   :  { %v5490_v15 = vpop.permute.xlu0 %5489 }
 0x4b2   :  { %v5492_v16 = vmul.f32 %v7441_v13, %v5490_v15 }
 0x4b4   :  { %5494 = vrot.lane.b32.xlu1 %v5492_v16, %s7456_s1 }
 0x4e0   :  { %v5520_v18 = vpop.permute.xlu1 %5519 }
 0x4e1   :  { %v5522_v23 = vmul.f32 %v7441_v13, %v5520_v18 }
 0x4e3   :  { %5524 = vrot.lane.b32.xlu0 %v5522_v23, %s7456_s1 }
 0x4e7   :  { %5506 = vrot.lane.b32.xlu0 %v9556_v21, %s7457_s5 }
 0x4eb   :  { %5535 = vrot.lane.b32.xlu0 %v9556_v21, %s7458_s6 }
 0x526   :  { %v5495_v48 = vpop.permute.xlu1 %5494 }
 0x527   :  { %v5497_v24 = vadd.f32 %v9574_v53, %v5495_v48 }
 0x529   :  { %7442 = vtanh.f32 %v5497_v24 }
 0x533   :  { %v7443_v25 = vpop.eup %7442 }
 0x534   :  { %5501 = vrot.lane.b32.xlu1 %v7443_v25, %s7458_s6 }
 0x555   :  { %v5525_v38 = vpop.permute.xlu0 %5524 }
 0x556   :  { %v5527_v27 = vadd.f32 %v5525_v38, %v9562_v29  ;;  %v6244_v29 = vld [vmem:[%s9674_s7] ss:$0 sm:$0xff] }
 0x558   :  { %7444 = vtanh.f32 %v5527_v27 }
 0x559   :  { %7446 = vtanh.f32 %v5434_v8  ;;  %v5507_v32 = vpop.permute.xlu0 %5506 }
 0x55a   :  { %v5509_v31 = vmul.f32 %v7441_v13, %v5507_v32  ;;  %7448 = vpow2.f32 %v5513_v37 }
 0x55d   :  { %v5536_v34 = vpop.permute.xlu0 %5535 }
 0x562   :  { %v7445_v30 = vpop.eup %7444 }
 0x563   :  { %5531 = vrot.lane.b32.xlu1 %v7445_v30, %s7458_s6  ;;  %v7447_v21 = vpop.eup %7446 }
 0x564   :  { %v7449_v42 = vpop.eup %7448 }
 0x565   :  { %v5515_v45 = vadd.f32 1.0, %v7449_v42 }
 0x567   :  { %5541 = vrot.lane.b32.xlu1 %v7447_v21, %s7456_s1  ;;  %7450 = vrcp.f32 %v5515_v45 }
 0x571   :  { %v7451_v46 = vpop.eup %7450 }
 0x572   :  { %v5529_v47 = vsub.f32 1.0, %v7451_v46  ;;  %v5538_v52 = vmul.f32 %v7451_v46, %v5536_v34 }
 0x5a6   :  { %v5502_v33 = vpop.permute.xlu1 %5501 }
 0x5a7   :  { %v5504_v40 = vmul.f32 %v5502_v33, %v5499_v35 }
 0x5a9   :  { %v5510_v41 = vadd.f32 %v5509_v31, %v5504_v40 }
 0x5ab   :  { %5545 = vrot.lane.b32.xlu0 %v5510_v41, %s7457_s5  ;;  %5554 = vrot.lane.b32.xlu1 %v5510_v41, %s7458_s6 }
 0x5d5   :  { %v5532_v50 = vpop.permute.xlu1 %5531 }
 0x5d6   :  { %v5534_v53 = vmul.f32 %v5532_v50, %v5529_v47 }
 0x5d8   :  { %v5539_v44 = vadd.f32 %v5538_v52, %v5534_v53 }
 0x5d9   :  { %v5542_v7 = vpop.permute.xlu1 %5541 }
 0x5da   :  { %5557 = vrot.lane.b32.xlu0 %v5539_v44, %s7457_s5 }
 0x5de   :  { %5550 = vrot.lane.b32.xlu0 %v5539_v44, %s7456_s1 }
 0x61d   :  { %v5546_v28 = vpop.permute.xlu0 %5545  ;;  %v5555_v56 = vpop.permute.xlu1 %5554 }
 0x61e   :  { %v5548_v39 = vsel %vm4079_vm0, %v5542_v7, %v5546_v28 }
 0x61f   :  { %v5569_v0 = vmul.f32 %v6244_v29, %v5548_v39 }
 0x621   :  { %v5571_v2 = vsel %vm5570_vm2, %v5569_v0, 0.0 }
 0x622   :  { %5572 = vadd.xlane.f32.xlu1 %v5571_v2 }
 0x64c   :  { %v5558_v57 = vpop.permute.xlu0 %5557 }
 0x64d   :  { %v5561_v51 = vsel %vm5560_vm3, %v5555_v56, %v5558_v57 }
 0x64e   :  { %5578 = vrot.lane.b32.xlu0 %v5561_v51, %s7458_s6 }
 0x650   :  { %v5551_v49 = vpop.permute.xlu0 %5550 }
 0x651   :  { %v5553_v19 = vsel %vm4079_vm0, %v7447_v21, %v5551_v49 }
 0x6af   :  { %v5573_v60 = vpop.xlane.xlu1 %5572 }
 0x6b0   :  { %v5576_v59 = vadd.f32 %v5575_v58, %v5573_v60 }
 0x6c0   :  { %v5579_v55 = vpop.permute.xlu0 %5578 }
 0x6c1   :  { %v5581_v61 = vsel %vm5570_vm2, %v5553_v19, %v5579_v55  ;;  %v5582_v62 = vsel %vm5560_vm3, %v5579_v55, %v5576_v59 }
 0x6c2   :  { %v5584_v54 = vsel %vm5583_vm4, %v5582_v62, 0.0  ;;  %5585 = vst [vmem:[%s9676_s9] sm:$0xff] %v5581_v61 }
 0x6c3   :  { %5586 = vst [vmem:[%s9676_s9 + $0x8] sm:$0xff] %v5584_v54 }

</bundles_post_ra>
